<compile_context>
chip_gen: v6e
topology: v6e:2x2x1
jax: 0.10.0
libtpu: 0.0.40
codegen_flags: <defaults>
</compile_context>

<pallas_src>
import functools

import jax
import jax.numpy as jnp
from jax.experimental import pallas as pl
from jax.experimental.pallas import tpu as pltpu

RES_MULTIPLIER = 0.5

_TAPS = tuple((dy, dx) for dy in range(3) for dx in range(3))


def _im2col_3x3(src_ref, h_out, w_out, stride):
    """(h_out, w_out, 9*C) im2col LHS for a 3x3 conv over a halo-padded ref.

    Built as 9 shifted ref-window reads concatenated along the channel axis --
    no per-tap value reshapes; the single leading-dim merge happens at the
    caller right before the matmul.
    """
    wins = []
    for dy, dx in _TAPS:
        if stride == 1:
            wins.append(src_ref[pl.ds(dy, h_out), pl.ds(dx, w_out), :])
        else:
            wins.append(
                src_ref[pl.ds(dy, h_out, stride), pl.ds(dx, w_out, stride), :])
    return jnp.concatenate(wins, axis=-1)


def _fused_kernel(x_ref, wa_ref, wb_ref, sb_ref, o_ref,
                  xp_ref, zp_ref, col_b_ref, *, stride):
    """conv_a(3x3, stride) + SReLU + conv_b(3x3, 1) (+ folded SharedScale).

    Grid = (batch n [parallel], cout tile co [arbitrary]).
      x_ref    : (1, H, W, Cin)       input image (f32 or bf16)
      wa_ref   : (9*Cin, Cout)        conv_a weights, tap-major rows, bf16
      wb_ref   : (9*Cout, co_t)       conv_b weights * RES_MULTIPLIER, bf16
      sb_ref   : (1, Cout)            SReLU bias, f32
      o_ref    : (1, Ho*Wo, co_t)     output tile, spatially flattened
      xp_ref   : (H+2, W+2, Cin)      VMEM scratch: halo-padded input, bf16
      zp_ref   : (Ho+2, Wo+2, Cout)   VMEM scratch: halo-padded SReLU(conv_a), bf16
      col_b_ref: (Ho, Wo, 9*Cout)     VMEM scratch: conv_b im2col cache, bf16
                                      (persists across the co grid axis)
    """
    _, H, W, Cin = x_ref.shape
    Ho, Wo, _ = col_b_ref.shape
    Cout = zp_ref.shape[2]

    @pl.when(pl.program_id(1) == 0)
    def _build_intermediate():
        # --- halo-padded input: full-width memset + dense interior copy -----
        xp_ref[...] = jnp.zeros_like(xp_ref)
        xp_ref[pl.ds(1, H), pl.ds(1, W), :] = x_ref[0].astype(xp_ref.dtype)

        # --- conv_a: one (Ho*Wo, 9*Cin) @ (9*Cin, Cout) MXU matmul -----------
        lhs_a = _im2col_3x3(xp_ref, Ho, Wo, stride).reshape(Ho * Wo, 9 * Cin)
        acc_a = jnp.dot(lhs_a, wa_ref[...], preferred_element_type=jnp.float32)

        # --- SReLU (f32 epilogue) --------------------------------------------
        b = sb_ref[...]                      # (1, Cout), broadcasts over rows
        z = jnp.maximum(acc_a - b, 0.0) + b

        # --- halo-padded intermediate + conv_b im2col cache -------------------
        zp_ref[...] = jnp.zeros_like(zp_ref)
        zp_ref[pl.ds(1, Ho), pl.ds(1, Wo), :] = (
            z.reshape(Ho, Wo, Cout).astype(zp_ref.dtype))
        col_b_ref[...] = _im2col_3x3(zp_ref, Ho, Wo, 1)

    # --- conv_b for this Cout tile: one MXU matmul + store --------------------
    co_t = wb_ref.shape[1]
    lhs_b = col_b_ref[...].reshape(Ho * Wo, 9 * Cout)
    acc_b = jnp.dot(lhs_b, wb_ref[...], preferred_element_type=jnp.float32)
    o_ref[...] = acc_b.reshape(1, Ho * Wo, co_t).astype(o_ref.dtype)


def init_params(key, w_in, w_out):
    """Parameters in the PyTorch module's layouts (OIHW conv weights, etc.)."""
    ka, kb = jax.random.split(key)
    wa = jax.random.normal(ka, (w_out, w_in, 3, 3), jnp.float32) * 0.1
    wb = jax.random.normal(kb, (w_out, w_out, 3, 3), jnp.float32) * 0.1
    srelu_bias = jnp.full((1, w_out, 1, 1), -1.0, jnp.float32)   # nn.init.constant_(-1.0)
    scale = jnp.full((1, 1, 1, 1), RES_MULTIPLIER, jnp.float32)  # SharedScale
    return {"wa": wa, "wb": wb, "srelu_bias": srelu_bias, "scale": scale}


def basic_transform(x_nhwc, params, *, stride=1, cout_tile=None):
    """BasicTransform.forward in the TPU-native NHWC layout.

    x_nhwc: (N, H, W, Cin) float array.  Returns (N, Ho, Wo, Cout) in x's dtype.
    """
    N, H, W, Cin = x_nhwc.shape
    Cout = params["wa"].shape[0]
    Ho = (H - 1) // stride + 1
    Wo = (W - 1) // stride + 1

    # Tap-fold the (small) weights once: OIHW -> ((ky*3+kx)*Cin, Cout), bf16 MXU
    # operands.  SharedScale is folded into conv_b (forward math is identical).
    wa9 = jnp.transpose(params["wa"], (2, 3, 1, 0)).reshape(9 * Cin, Cout)
    wb_scaled = params["wb"] * params["scale"].reshape(())
    wb9 = jnp.transpose(wb_scaled, (2, 3, 1, 0)).reshape(9 * Cout, Cout)
    wa9 = wa9.astype(jnp.bfloat16)
    wb9 = wb9.astype(jnp.bfloat16)
    srelu_b = params["srelu_bias"].reshape(1, Cout).astype(jnp.float32)

    co_t = Cout if cout_tile is None else min(cout_tile, Cout)
    assert Cout % co_t == 0, (Cout, co_t)
    n_co = Cout // co_t

    kernel = functools.partial(_fused_kernel, stride=stride)
    out = pl.pallas_call(
        kernel,
        out_shape=jax.ShapeDtypeStruct((N, Ho * Wo, Cout), x_nhwc.dtype),
        grid=(N, n_co),
        in_specs=[
            pl.BlockSpec((1, H, W, Cin), lambda n, co: (n, 0, 0, 0)),
            pl.BlockSpec((9 * Cin, Cout), lambda n, co: (0, 0)),
            pl.BlockSpec((9 * Cout, co_t), lambda n, co: (0, co)),
            pl.BlockSpec((1, Cout), lambda n, co: (0, 0)),
        ],
        out_specs=pl.BlockSpec((1, Ho * Wo, co_t), lambda n, co: (n, 0, co)),
        scratch_shapes=[
            pltpu.VMEM((H + 2, W + 2, Cin), jnp.bfloat16),     # halo-padded x
            pltpu.VMEM((Ho + 2, Wo + 2, Cout), jnp.bfloat16),  # halo-padded SReLU(conv_a)
            pltpu.VMEM((Ho, Wo, 9 * Cout), jnp.bfloat16),      # conv_b im2col cache
        ],
        compiler_params=pltpu.CompilerParams(
            dimension_semantics=("parallel", "arbitrary")),
    )(x_nhwc, wa9, wb9, srelu_b)

    # (N, Ho*Wo, Cout) -> (N, Ho, Wo, Cout) shares the same HBM byte layout:
    # this reshape is metadata-only (no extra HBM pass).
    return out.reshape(N, Ho, Wo, Cout)


def basic_transform_nchw(x_nchw, params, *, stride=1):
    """Drop-in layout shim matching the PyTorch NCHW interface (adds two
    transpose passes; prefer keeping the network NHWC end-to-end)."""
    x_nhwc = jnp.transpose(x_nchw, (0, 2, 3, 1))
    y = basic_transform(x_nhwc, params, stride=stride)
    return jnp.transpose(y, (0, 3, 1, 2))


def _reference_forward_nchw(x_nchw, params, *, stride=1):
    """Pure-JAX f32 reference mirroring the PyTorch module (NCHW)."""
    dn = ("NCHW", "OIHW", "NCHW")
    y = jax.lax.conv_general_dilated(x_nchw, params["wa"], (stride, stride),
                                     ((1, 1), (1, 1)), dimension_numbers=dn)
    b = params["srelu_bias"]
    y = jnp.maximum(y - b, 0.0) + b
    y = jax.lax.conv_general_dilated(y, params["wb"], (1, 1),
                                     ((1, 1), (1, 1)), dimension_numbers=dn)
    return y * params["scale"]


if __name__ == "__main__":
    key = jax.random.PRNGKey(0)
    kx, kp = jax.random.split(key)

    N, w_in, w_out, H, W, stride = 2, 4, 8, 16, 16, 1
    x_nhwc = jax.random.normal(kx, (N, H, W, w_in), jnp.float32)
    params = init_params(kp, w_in, w_out)

    y = basic_transform(x_nhwc, params, stride=stride)
    y = jax.block_until_ready(y)

    y_ref = jnp.transpose(
        _reference_forward_nchw(jnp.transpose(x_nhwc, (0, 3, 1, 2)), params,
                                stride=stride),
        (0, 2, 3, 1))
    assert y.shape == y_ref.shape, (y.shape, y_ref.shape)
    # bf16 MXU operands + bf16 intermediate vs. full-f32 reference.
    max_err = float(jnp.max(jnp.abs(y - y_ref)))
    assert max_err < 5e-2, f"max abs error {max_err}"

    print("KERNEL_OK")
</pallas_src>

<mosaic_0001>
module attributes {stable_mosaic.version = 11 : i64} {
  func.func @_fused_kernel(%arg0: i32, %arg1: i32, %arg2: memref<1x16x16x4xf32, #tpu.memory_space<vmem>>, %arg3: memref<36x8xbf16, #tpu.memory_space<vmem>>, %arg4: memref<72x8xbf16, #tpu.memory_space<vmem>>, %arg5: memref<1x8xf32, #tpu.memory_space<vmem>>, %arg6: memref<1x256x8xf32, #tpu.memory_space<vmem>>, %arg7: memref<18x18x4xbf16, #tpu.memory_space<vmem>>, %arg8: memref<18x18x8xbf16, #tpu.memory_space<vmem>>, %arg9: memref<16x16x72xbf16, #tpu.memory_space<vmem>>) attributes {dimension_semantics = [#tpu.dimension_semantics<parallel>, #tpu.dimension_semantics<arbitrary>], iteration_bounds = array<i64: 2, 1>, scalar_prefetch = 0 : i64, scratch_operands = 3 : i64, tpu.core_type = #tpu.core_type<tc>, window_params = [{transform_indices = @transform_0, window_bounds = array<i64: 1, 16, 16, 4>}, {pipeline_mode = #tpu.pipeline_mode<synchronous>, transform_indices = @transform_1, window_bounds = array<i64: 36, 8>}, {transform_indices = @transform_2, window_bounds = array<i64: 72, 8>}, {pipeline_mode = #tpu.pipeline_mode<synchronous>, transform_indices = @transform_3, window_bounds = array<i64: 1, 8>}, {transform_indices = @transform_4, window_bounds = array<i64: 1, 256, 8>}]} {
    %c0_i32 = arith.constant 0 : i32
    %0 = arith.cmpi eq, %arg1, %c0_i32 : i32
    %1 = arith.extui %0 : i1 to i32
    %c0_i32_0 = arith.constant 0 : i32
    %2 = arith.cmpi ne, %1, %c0_i32_0 : i32
    scf.if %2 {
      %cst_8 = arith.constant 0.000000e+00 : bf16
      %9 = vector.broadcast %cst_8 : bf16 to vector<18x18x4xbf16>
      %c0_9 = arith.constant 0 : index
      %c0_10 = arith.constant 0 : index
      %c0_11 = arith.constant 0 : index
      %10 = vector.load %arg7[%c0_9, %c0_10, %c0_11] : memref<18x18x4xbf16, #tpu.memory_space<vmem>>, vector<18x18x4xbf16>
      tpu.vector_store %arg7[%c0_9, %c0_10, %c0_11], %9 {strides = array<i32>} : memref<18x18x4xbf16, #tpu.memory_space<vmem>>, vector<18x18x4xbf16>,
      %c0_12 = arith.constant 0 : index
      %c0_13 = arith.constant 0 : index
      %c0_14 = arith.constant 0 : index
      %c0_15 = arith.constant 0 : index
      %11 = vector.load %arg2[%c0_12, %c0_13, %c0_14, %c0_15] : memref<1x16x16x4xf32, #tpu.memory_space<vmem>>, vector<1x16x16x4xf32>
      %12 = vector.shape_cast %11 : vector<1x16x16x4xf32> to vector<16x16x4xf32>
      %13 = arith.truncf %12 : vector<16x16x4xf32> to vector<16x16x4xbf16>
      %c1 = arith.constant 1 : index
      %c1_16 = arith.constant 1 : index
      %c0_17 = arith.constant 0 : index
      %14 = vector.load %arg7[%c1, %c1_16, %c0_17] : memref<18x18x4xbf16, #tpu.memory_space<vmem>>, vector<16x16x4xbf16>
      tpu.vector_store %arg7[%c1, %c1_16, %c0_17], %13 {strides = array<i32>} : memref<18x18x4xbf16, #tpu.memory_space<vmem>>, vector<16x16x4xbf16>,
      %c0_18 = arith.constant 0 : index
      %c0_19 = arith.constant 0 : index
      %c0_20 = arith.constant 0 : index
      %15 = vector.load %arg7[%c0_18, %c0_19, %c0_20] : memref<18x18x4xbf16, #tpu.memory_space<vmem>>, vector<16x16x4xbf16>
      %c0_21 = arith.constant 0 : index
      %c1_22 = arith.constant 1 : index
      %c0_23 = arith.constant 0 : index
      %16 = vector.load %arg7[%c0_21, %c1_22, %c0_23] : memref<18x18x4xbf16, #tpu.memory_space<vmem>>, vector<16x16x4xbf16>
      %c0_24 = arith.constant 0 : index
      %c2 = arith.constant 2 : index
      %c0_25 = arith.constant 0 : index
      %17 = vector.load %arg7[%c0_24, %c2, %c0_25] : memref<18x18x4xbf16, #tpu.memory_space<vmem>>, vector<16x16x4xbf16>
      %c1_26 = arith.constant 1 : index
      %c0_27 = arith.constant 0 : index
      %c0_28 = arith.constant 0 : index
      %18 = vector.load %arg7[%c1_26, %c0_27, %c0_28] : memref<18x18x4xbf16, #tpu.memory_space<vmem>>, vector<16x16x4xbf16>
      %c1_29 = arith.constant 1 : index
      %c1_30 = arith.constant 1 : index
      %c0_31 = arith.constant 0 : index
      %19 = vector.load %arg7[%c1_29, %c1_30, %c0_31] : memref<18x18x4xbf16, #tpu.memory_space<vmem>>, vector<16x16x4xbf16>
      %c1_32 = arith.constant 1 : index
      %c2_33 = arith.constant 2 : index
      %c0_34 = arith.constant 0 : index
      %20 = vector.load %arg7[%c1_32, %c2_33, %c0_34] : memref<18x18x4xbf16, #tpu.memory_space<vmem>>, vector<16x16x4xbf16>
      %c2_35 = arith.constant 2 : index
      %c0_36 = arith.constant 0 : index
      %c0_37 = arith.constant 0 : index
      %21 = vector.load %arg7[%c2_35, %c0_36, %c0_37] : memref<18x18x4xbf16, #tpu.memory_space<vmem>>, vector<16x16x4xbf16>
      %c2_38 = arith.constant 2 : index
      %c1_39 = arith.constant 1 : index
      %c0_40 = arith.constant 0 : index
      %22 = vector.load %arg7[%c2_38, %c1_39, %c0_40] : memref<18x18x4xbf16, #tpu.memory_space<vmem>>, vector<16x16x4xbf16>
      %c2_41 = arith.constant 2 : index
      %c2_42 = arith.constant 2 : index
      %c0_43 = arith.constant 0 : index
      %23 = vector.load %arg7[%c2_41, %c2_42, %c0_43] : memref<18x18x4xbf16, #tpu.memory_space<vmem>>, vector<16x16x4xbf16>
      %24 = tpu.concatenate %15, %16, %17, %18, %19, %20, %21, %22, %23 in 2 : vector<16x16x4xbf16>, vector<16x16x4xbf16>, vector<16x16x4xbf16>, vector<16x16x4xbf16>, vector<16x16x4xbf16>, vector<16x16x4xbf16>, vector<16x16x4xbf16>, vector<16x16x4xbf16>, vector<16x16x4xbf16> -> vector<16x16x36xbf16>
      %25 = vector.shape_cast %24 : vector<16x16x36xbf16> to vector<256x36xbf16>
      %c0_44 = arith.constant 0 : index
      %c0_45 = arith.constant 0 : index
      %26 = vector.load %arg3[%c0_44, %c0_45] : memref<36x8xbf16, #tpu.memory_space<vmem>>, vector<36x8xbf16>
      %cst_46 = arith.constant dense<0.000000e+00> : vector<256x8xf32>
      %27 = tpu.matmul %25, %26, %cst_46 {dimension_numbers = #tpu.dot_dimension_numbers<[1], [0], [0], [1], [0, 0, 1, 1], [], []>} : vector<256x36xbf16>, vector<36x8xbf16>, vector<256x8xf32> -> vector<256x8xf32>
      %c0_47 = arith.constant 0 : index
      %c0_48 = arith.constant 0 : index
      %28 = vector.load %arg5[%c0_47, %c0_48] : memref<1x8xf32, #tpu.memory_space<vmem>>, vector<1x8xf32>
      %29 = vector.broadcast %28 : vector<1x8xf32> to vector<256x8xf32>
      %30 = arith.subf %27, %29 : vector<256x8xf32>
      %cst_49 = arith.constant 0.000000e+00 : f32
      %31 = vector.broadcast %cst_49 : f32 to vector<256x8xf32>
      %32 = arith.maximumf %30, %31 : vector<256x8xf32>
      %33 = vector.broadcast %28 : vector<1x8xf32> to vector<256x8xf32>
      %34 = arith.addf %32, %33 : vector<256x8xf32>
      %cst_50 = arith.constant 0.000000e+00 : bf16
      %35 = vector.broadcast %cst_50 : bf16 to vector<18x18x8xbf16>
      %c0_51 = arith.constant 0 : index
      %c0_52 = arith.constant 0 : index
      %c0_53 = arith.constant 0 : index
      %36 = vector.load %arg8[%c0_51, %c0_52, %c0_53] : memref<18x18x8xbf16, #tpu.memory_space<vmem>>, vector<18x18x8xbf16>
      tpu.vector_store %arg8[%c0_51, %c0_52, %c0_53], %35 {strides = array<i32>} : memref<18x18x8xbf16, #tpu.memory_space<vmem>>, vector<18x18x8xbf16>,
      %37 = vector.shape_cast %34 : vector<256x8xf32> to vector<16x16x8xf32>
      %38 = arith.truncf %37 : vector<16x16x8xf32> to vector<16x16x8xbf16>
      %c1_54 = arith.constant 1 : index
      %c1_55 = arith.constant 1 : index
      %c0_56 = arith.constant 0 : index
      %39 = vector.load %arg8[%c1_54, %c1_55, %c0_56] : memref<18x18x8xbf16, #tpu.memory_space<vmem>>, vector<16x16x8xbf16>
      tpu.vector_store %arg8[%c1_54, %c1_55, %c0_56], %38 {strides = array<i32>} : memref<18x18x8xbf16, #tpu.memory_space<vmem>>, vector<16x16x8xbf16>,
      %c0_57 = arith.constant 0 : index
      %c0_58 = arith.constant 0 : index
      %c0_59 = arith.constant 0 : index
      %40 = vector.load %arg8[%c0_57, %c0_58, %c0_59] : memref<18x18x8xbf16, #tpu.memory_space<vmem>>, vector<16x16x8xbf16>
      %c0_60 = arith.constant 0 : index
      %c1_61 = arith.constant 1 : index
      %c0_62 = arith.constant 0 : index
      %41 = vector.load %arg8[%c0_60, %c1_61, %c0_62] : memref<18x18x8xbf16, #tpu.memory_space<vmem>>, vector<16x16x8xbf16>
      %c0_63 = arith.constant 0 : index
      %c2_64 = arith.constant 2 : index
      %c0_65 = arith.constant 0 : index
      %42 = vector.load %arg8[%c0_63, %c2_64, %c0_65] : memref<18x18x8xbf16, #tpu.memory_space<vmem>>, vector<16x16x8xbf16>
      %c1_66 = arith.constant 1 : index
      %c0_67 = arith.constant 0 : index
      %c0_68 = arith.constant 0 : index
      %43 = vector.load %arg8[%c1_66, %c0_67, %c0_68] : memref<18x18x8xbf16, #tpu.memory_space<vmem>>, vector<16x16x8xbf16>
      %c1_69 = arith.constant 1 : index
      %c1_70 = arith.constant 1 : index
      %c0_71 = arith.constant 0 : index
      %44 = vector.load %arg8[%c1_69, %c1_70, %c0_71] : memref<18x18x8xbf16, #tpu.memory_space<vmem>>, vector<16x16x8xbf16>
      %c1_72 = arith.constant 1 : index
      %c2_73 = arith.constant 2 : index
      %c0_74 = arith.constant 0 : index
      %45 = vector.load %arg8[%c1_72, %c2_73, %c0_74] : memref<18x18x8xbf16, #tpu.memory_space<vmem>>, vector<16x16x8xbf16>
      %c2_75 = arith.constant 2 : index
      %c0_76 = arith.constant 0 : index
      %c0_77 = arith.constant 0 : index
      %46 = vector.load %arg8[%c2_75, %c0_76, %c0_77] : memref<18x18x8xbf16, #tpu.memory_space<vmem>>, vector<16x16x8xbf16>
      %c2_78 = arith.constant 2 : index
      %c1_79 = arith.constant 1 : index
      %c0_80 = arith.constant 0 : index
      %47 = vector.load %arg8[%c2_78, %c1_79, %c0_80] : memref<18x18x8xbf16, #tpu.memory_space<vmem>>, vector<16x16x8xbf16>
      %c2_81 = arith.constant 2 : index
      %c2_82 = arith.constant 2 : index
      %c0_83 = arith.constant 0 : index
      %48 = vector.load %arg8[%c2_81, %c2_82, %c0_83] : memref<18x18x8xbf16, #tpu.memory_space<vmem>>, vector<16x16x8xbf16>
      %49 = tpu.concatenate %40, %41, %42, %43, %44, %45, %46, %47, %48 in 2 : vector<16x16x8xbf16>, vector<16x16x8xbf16>, vector<16x16x8xbf16>, vector<16x16x8xbf16>, vector<16x16x8xbf16>, vector<16x16x8xbf16>, vector<16x16x8xbf16>, vector<16x16x8xbf16>, vector<16x16x8xbf16> -> vector<16x16x72xbf16>
      %c0_84 = arith.constant 0 : index
      %c0_85 = arith.constant 0 : index
      %c0_86 = arith.constant 0 : index
      %50 = vector.load %arg9[%c0_84, %c0_85, %c0_86] : memref<16x16x72xbf16, #tpu.memory_space<vmem>>, vector<16x16x72xbf16>
      tpu.vector_store %arg9[%c0_84, %c0_85, %c0_86], %49 {strides = array<i32>} : memref<16x16x72xbf16, #tpu.memory_space<vmem>>, vector<16x16x72xbf16>,
    } else {
    }
    %c0 = arith.constant 0 : index
    %c0_1 = arith.constant 0 : index
    %c0_2 = arith.constant 0 : index
    %3 = vector.load %arg9[%c0, %c0_1, %c0_2] : memref<16x16x72xbf16, #tpu.memory_space<vmem>>, vector<16x16x72xbf16>
    %4 = vector.shape_cast %3 : vector<16x16x72xbf16> to vector<256x72xbf16>
    %c0_3 = arith.constant 0 : index
    %c0_4 = arith.constant 0 : index
    %5 = vector.load %arg4[%c0_3, %c0_4] : memref<72x8xbf16, #tpu.memory_space<vmem>>, vector<72x8xbf16>
    %cst = arith.constant dense<0.000000e+00> : vector<256x8xf32>
    %6 = tpu.matmul %4, %5, %cst {dimension_numbers = #tpu.dot_dimension_numbers<[1], [0], [0], [1], [0, 0, 1, 1], [], []>} : vector<256x72xbf16>, vector<72x8xbf16>, vector<256x8xf32> -> vector<256x8xf32>
    %7 = vector.shape_cast %6 : vector<256x8xf32> to vector<1x256x8xf32>
    %c0_5 = arith.constant 0 : index
    %c0_6 = arith.constant 0 : index
    %c0_7 = arith.constant 0 : index
    %8 = vector.load %arg6[%c0_5, %c0_6, %c0_7] : memref<1x256x8xf32, #tpu.memory_space<vmem>>, vector<1x256x8xf32>
    tpu.vector_store %arg6[%c0_5, %c0_6, %c0_7], %7 {strides = array<i32>} : memref<1x256x8xf32, #tpu.memory_space<vmem>>, vector<1x256x8xf32>,
    return
  }
  func.func @transform_0(%arg0: i32, %arg1: i32) -> (i32, i32, i32, i32) {
    %c0_i32 = arith.constant 0 : i32
    %c0_i32_0 = arith.constant 0 : i32
    %c0_i32_1 = arith.constant 0 : i32
    %c0_i32_2 = arith.constant 0 : i32
    return %arg0, %c0_i32, %c0_i32_0, %c0_i32_1 : i32, i32, i32, i32
  }
  func.func @transform_1(%arg0: i32, %arg1: i32) -> (i32, i32) {
    %c0_i32 = arith.constant 0 : i32
    %c0_i32_0 = arith.constant 0 : i32
    %c0_i32_1 = arith.constant 0 : i32
    return %c0_i32, %c0_i32_0 : i32, i32
  }
  func.func @transform_2(%arg0: i32, %arg1: i32) -> (i32, i32) {
    %c0_i32 = arith.constant 0 : i32
    %c0_i32_0 = arith.constant 0 : i32
    return %c0_i32, %arg1 : i32, i32
  }
  func.func @transform_3(%arg0: i32, %arg1: i32) -> (i32, i32) {
    %c0_i32 = arith.constant 0 : i32
    %c0_i32_0 = arith.constant 0 : i32
    %c0_i32_1 = arith.constant 0 : i32
    return %c0_i32, %c0_i32_0 : i32, i32
  }
  func.func @transform_4(%arg0: i32, %arg1: i32) -> (i32, i32, i32) {
    %c0_i32 = arith.constant 0 : i32
    %c0_i32_0 = arith.constant 0 : i32
    return %arg0, %c0_i32, %arg1 : i32, i32, i32
  }
}

</mosaic_0001>

<bundles_post_ra>
// kernel: tpu_custom_call.1
= control target key start
LH: loop header
LB: loop body
LE: loop exit
PB: predicated region body
PF: predicated region fallthrough
CT: control target
= control target key end

     0   :  { %s7365_s15 = smov 0   ;;  %s7367_s16 = smov 0   ;;  %s10267_s0 = inlined_call_operand.vmem [shape: f32[2,16,16,4], index: 0, kind: input, shape index: {}]   ;;  %s10268_s1 = inlined_call_operand.vmem [shape: bf16[36,8], index: 1, kind: input, shape index: {}]   ;;  %s10269_s2 = inlined_call_operand.vmem [shape: bf16[72,8], index: 2, kind: input, shape index: {}]   ;;  %s10270_s3 = inlined_call_operand.vmem [shape: f32[1,8], index: 3, kind: input, shape index: {}]   ;;  %s10271_s4 = inlined_call_operand.vmem [shape: f32[2,256,8], index: 4, kind: output, shape index: {}]  }
   0x1   :  { %s7369_s17 = smov 0  }
   0x2 LB: > { %s26_s18 = sadd.s32 1, %s7321_s16  ;;  %p6333_p0 = scmp.ge.s32.totalorder %s7325_s17, 1  ;;  %s7325_s17 = sphi %s7369_s17, %s14_s17   ;;  %s7321_s16 = sphi %s7367_s16, %s10354_s16   ;;  %s7317_s15 = sphi %s7365_s15, %s10353_s15  }
   0x3   : > { %p28_p1 = scmp.ge.s32.totalorder %s26_s18, 2  ;;  %p185_p2 = scmp.lt.s32.totalorder %s7325_s17, 3 }
   0x5   : > { %s10356_s18 = smov (%p28_p1, %s26_s18), 0  ;;  %p186_p3 = pnand %p6333_p0, %p185_p2 }
   0x6   : > { %p218_p4 = scmp.lt.s32.totalorder (!%p186_p3), %s7317_s15, 1  ;;  %s7328_s23 = smov (!%p186_p3), 8  }
   0x7   : > { %189 = sbr.rel (%p186_p3) target bundleno = 1020 (0x3fc), region = 36  ;;  %s7329_s24 = smov (!%p186_p3), 4  }
   0x8   : > { %s7330_s25 = smov (!%p186_p3), 12   ;;  %s7331_s26 = smov (!%p186_p3), 24  }
   0x9   : > { %s7332_s27 = smov (!%p186_p3), 20   ;;  %s7333_s28 = smov (!%p186_p3), 32  }
   0xa   : > { %s7334_s29 = smov (!%p186_p3), 16   ;;  %s7335_s30 = smov (!%p186_p3), 28  }
   0xb   : > { %s7336_s13 = smov (!%p186_p3), 48   ;;  %s7337_s14 = smov (!%p186_p3), 40  }
   0xc   : > { %vm240_vm0 = vcmask 27648   ;;  %vm243_vm1 = vcmask 24576   ;;  %v10272_v0 = vmov 0   ;;  %vm10274_vm2 = vsmask.f32 256  ;;  %s10358_s15 = smov (!%p218_p4, %s7317_s15), 1 }
   0xd   : > { %241 = vst.msk [vmem:[#allocation2] sm:$0xf] %vm240_vm0, %v10272_v0  ;;  %242 = vst.msk [vmem:[#allocation2 + $0x4] sm:$0xf] %vm240_vm0, %v10272_v0  ;;  %vm425_vm3 = vsmask.f32 4368 }
   0xe   : > { %244 = vst.msk [vmem:[#allocation2 + $0x8] sm:$0x1] %vm243_vm1, %v10272_v0  ;;  %247 = vst.msk [vmem:[#allocation2 + $0x14] sm:$0x1] %vm243_vm1, %v10272_v0  ;;  %s6781_s19 = sshll.u32 %s10358_s15, 8  ;;  %vm1459_vm6 = vcmask 1046528  }
   0xf   : > { %245 = vst.msk [vmem:[#allocation2 + $0xc] sm:$0xf] %vm240_vm0, %v10272_v0  ;;  %246 = vst.msk [vmem:[#allocation2 + $0x10] sm:$0xf] %vm240_vm0, %v10272_v0  ;;  %s7503_s22 = scalar_lea.vmem %s10267_s0, %s6781_s19  ;;  %vm10275_vm4 = vsmask.f32 7424 }
  0x10   : > { %248 = vst.msk [vmem:[#allocation2 + $0x18] sm:$0xf] %vm240_vm0, %v10272_v0  ;;  %249 = vst.msk [vmem:[#allocation2 + $0x1c] sm:$0xf] %vm240_vm0, %v10272_v0  ;;  %v298_v1 = vld [vmem:[%s7503_s22 + $0x10] sm:$0xff]  ;;  %v299_v2 = vld [vmem:[%s7503_s22 + $0x18] sm:$0xff] }
  0x11   : > { %250 = vst.msk [vmem:[#allocation2 + $0x20] sm:$0x1] %vm243_vm1, %v10272_v0  ;;  %253 = vst.msk [vmem:[#allocation2 + $0x2c] sm:$0x1] %vm243_vm1, %v10272_v0  ;;  %vm749_vm5 = vsmask.f32 7938  ;;  %v6785_v6 = vpack.c.bf16 %v298_v1, %v298_v1  ;;  %v6786_v7 = vpack.c.bf16 %v299_v2, %v299_v2 }
  0x12   : > { %251 = vst.msk [vmem:[#allocation2 + $0x24] sm:$0xf] %vm240_vm0, %v10272_v0  ;;  %252 = vst.msk [vmem:[#allocation2 + $0x28] sm:$0xf] %vm240_vm0, %v10272_v0  ;;  %v296_v3 = vld [vmem:[%s7503_s22] sm:$0xff]  ;;  %v297_v16 = vld [vmem:[%s7503_s22 + $0x8] sm:$0xff] }
  0x13   : > { %254 = vst.msk [vmem:[#allocation2 + $0x30] sm:$0xf] %vm240_vm0, %v10272_v0  ;;  %255 = vst.msk [vmem:[#allocation2 + $0x34] sm:$0xf] %vm240_vm0, %v10272_v0  ;;  %v6783_v11 = vpack.c.bf16 %v296_v3, %v296_v3  ;;  %v445_v13 = vshrl.u32 %v6785_v6, 16  ;;  %v448_v14 = vshll.u32 %v6785_v6, 16  ;;  %v6784_v30 = vpack.c.bf16 %v297_v16, %v297_v16 }
  0x14   : > { %256 = vst.msk [vmem:[#allocation2 + $0x38] sm:$0x1] %vm243_vm1, %v10272_v0  ;;  %259 = vst.msk [vmem:[#allocation2 + $0x44] sm:$0x1] %vm243_vm1, %v10272_v0  ;;  %v866_v4 = vld [vmem:[#allocation2 + $0x4] sm:$0xf] }
  0x15   : > { %257 = vst.msk [vmem:[#allocation2 + $0x3c] sm:$0xf] %vm240_vm0, %v10272_v0  ;;  %258 = vst.msk [vmem:[#allocation2 + $0x40] sm:$0xf] %vm240_vm0, %v10272_v0  ;;  %v913_v5 = vld [vmem:[#allocation2] sm:$0xe] }
  0x16   : > { %260 = vst.msk [vmem:[#allocation2 + $0x48] sm:$0xf] %vm240_vm0, %v10272_v0  ;;  %261 = vst.msk [vmem:[#allocation2 + $0x4c] sm:$0xf] %vm240_vm0, %v10272_v0  ;;  %v6402_v9 = vcombine.low %v913_v5, %v866_v4  ;;  %v865_v10 = vld [vmem:[#allocation2] sm:$0xf] }
  0x17   : > { %262 = vst.msk [vmem:[#allocation2 + $0x50] sm:$0x1] %vm243_vm1, %v10272_v0  ;;  %265 = vst.msk [vmem:[#allocation2 + $0x5c] sm:$0x1] %vm243_vm1, %v10272_v0  ;;  %v7508_v12 = vcombine.low %v865_v10, %v866_v4  ;;  %v453_v15 = vshrl.u32 %v6786_v7, 16  ;;  %v456_v20 = vshll.u32 %v6786_v7, 16 }
  0x18   : > { %263 = vst.msk [vmem:[#allocation2 + $0x54] sm:$0xf] %vm240_vm0, %v10272_v0  ;;  %264 = vst.msk [vmem:[#allocation2 + $0x58] sm:$0xf] %vm240_vm0, %v10272_v0  ;;  %v1460_v17 = vrot.slane %v6402_v9, 1  ;;  %v447_v24 = vrot.slane %v445_v13, 7 }
  0x19   : > { %266 = vst.msk [vmem:[#allocation2 + $0x60] sm:$0xf] %vm240_vm0, %v10272_v0  ;;  %267 = vst.msk [vmem:[#allocation2 + $0x64] sm:$0xf] %vm240_vm0, %v10272_v0  ;;  %v1188_v21 = vshrl.u32 %v7508_v12, 16  ;;  %v1190_v22 = vshll.u32 %v7508_v12, 16 }
  0x1a   : > { %268 = vst.msk [vmem:[#allocation2 + $0x68] sm:$0x1] %vm243_vm1, %v10272_v0  ;;  %271 = vst.msk [vmem:[#allocation2 + $0x74] sm:$0x1] %vm243_vm1, %v10272_v0  ;;  %v455_v25 = vrot.slane %v453_v15, 7  ;;  %v428_v31 = vshrl.u32 %v6783_v11, 16  ;;  %v450_v34 = vor.u32 %v448_v14, %v447_v24 }
  0x1b   : > { %269 = vst.msk [vmem:[#allocation2 + $0x6c] sm:$0xf] %vm240_vm0, %v10272_v0  ;;  %270 = vst.msk [vmem:[#allocation2 + $0x70] sm:$0xf] %vm240_vm0, %v10272_v0  ;;  %v760_v29 = vld [vmem:[#allocation2 + $0x18] sm:$0xf] }
  0x1c   : > { %272 = vst.msk [vmem:[#allocation2 + $0x78] sm:$0xf] %vm240_vm0, %v10272_v0  ;;  %273 = vst.msk [vmem:[#allocation2 + $0x7c] sm:$0xf] %vm240_vm0, %v10272_v0  ;;  %v300_v32 = vld [vmem:[%s7503_s22 + $0x20] sm:$0xff]  ;;  %v1192_v33 = vrot.slane %v1190_v22, 1  ;;  %v458_v36 = vor.u32 %v456_v20, %v455_v25 }
  0x1d   : > { %274 = vst.msk [vmem:[#allocation2 + $0x80] sm:$0x1] %vm243_vm1, %v10272_v0  ;;  %277 = vst.msk [vmem:[#allocation2 + $0x8c] sm:$0x1] %vm243_vm1, %v10272_v0  ;;  %v451_v35 = vrot.slane %v447_v24, 4  ;;  %v301_v37 = vld [vmem:[%s7503_s22 + $0x28] sm:$0xff]  ;;  %v6787_v46 = vpack.c.bf16 %v300_v32, %v300_v32 }
  0x1e   : > { %275 = vst.msk [vmem:[#allocation2 + $0x84] sm:$0xf] %vm240_vm0, %v10272_v0  ;;  %276 = vst.msk [vmem:[#allocation2 + $0x88] sm:$0xf] %vm240_vm0, %v10272_v0  ;;  %v430_v38 = vrot.slane %v428_v31, 7  ;;  %v431_v39 = vshll.u32 %v6783_v11, 16  ;;  %v1193_v42 = vor.u32 %v1192_v33, %v1188_v21  ;;  %v6788_v50 = vpack.c.bf16 %v301_v37, %v301_v37 }
  0x1f   : > { %278 = vst.msk [vmem:[#allocation2 + $0x90] sm:$0xf] %vm240_vm0, %v10272_v0  ;;  %279 = vst.msk [vmem:[#allocation2 + $0x94] sm:$0xf] %vm240_vm0, %v10272_v0  ;;  %v436_v40 = vshrl.u32 %v6784_v30, 16  ;;  %v439_v41 = vshll.u32 %v6784_v30, 16 }
  0x20   : > { %280 = vst.msk [vmem:[#allocation2 + $0x98] sm:$0x1] %vm243_vm1, %v10272_v0  ;;  %283 = vst.msk [vmem:[#allocation2 + $0xa4] sm:$0x1] %vm243_vm1, %v10272_v0  ;;  %v751_v45 = vld [vmem:[#allocation2 + $0xc] sm:$0xf]  ;;  %v433_v47 = vor.u32 %v431_v39, %v430_v38 }
  0x21   : > { %281 = vst.msk [vmem:[#allocation2 + $0x9c] sm:$0xf] %vm240_vm0, %v10272_v0  ;;  %282 = vst.msk [vmem:[#allocation2 + $0xa0] sm:$0xf] %vm240_vm0, %v10272_v0  ;;  %v434_v48 = vrot.slane %v430_v38, 4  ;;  %v438_v49 = vrot.slane %v436_v40, 7 }
  0x22   : > { %284 = vst.msk [vmem:[#allocation2 + $0xa8] sm:$0xf] %vm240_vm0, %v10272_v0  ;;  %285 = vst.msk [vmem:[#allocation2 + $0xac] sm:$0xf] %vm240_vm0, %v10272_v0  ;;  %v764_v51 = vld [vmem:[#allocation2 + $0x20] sm:$0x1] }
  0x23   : > { %286 = vst.msk [vmem:[#allocation2 + $0xb0] sm:$0x1] %vm243_vm1, %v10272_v0  ;;  %289 = vst.msk [vmem:[#allocation2 + $0xbc] sm:$0x1] %vm243_vm1, %v10272_v0  ;;  %v462_v53 = vshrl.u32 %v6787_v46, 16  ;;  %v465_v54 = vshll.u32 %v6787_v46, 16  ;;  %v441_v56 = vor.u32 %v439_v41, %v438_v49 }
  0x24   : > { %287 = vst.msk [vmem:[#allocation2 + $0xb4] sm:$0xf] %vm240_vm0, %v10272_v0  ;;  %288 = vst.msk [vmem:[#allocation2 + $0xb8] sm:$0xf] %vm240_vm0, %v10272_v0  ;;  %v460_v55 = vrot.slane %v455_v25, 4  ;;  %v470_v58 = vshrl.u32 %v6788_v50, 16 }
  0x25   : > { %290 = vst.msk [vmem:[#allocation2 + $0xc0] sm:$0xf] %vm240_vm0, %v10272_v0  ;;  %291 = vst.msk [vmem:[#allocation2 + $0xc4] sm:$0xf] %vm240_vm0, %v10272_v0  ;;  %v473_v59 = vshll.u32 %v6788_v50, 16  ;;  %v464_v62 = vrot.slane %v462_v53, 7 }
  0x26   : > { %292 = vst.msk [vmem:[#allocation2 + $0xc8] sm:$0x1] %vm243_vm1, %v10272_v0  ;;  %295 = vst.msk [vmem:[#allocation2 + $0xd4] sm:$0x1] %vm243_vm1, %v10272_v0  ;;  %v757_v61 = vld [vmem:[#allocation2 + $0x14] sm:$0x1] }
  0x27   : > { %293 = vst.msk [vmem:[#allocation2 + $0xcc] sm:$0xf] %vm240_vm0, %v10272_v0  ;;  %294 = vst.msk [vmem:[#allocation2 + $0xd0] sm:$0xf] %vm240_vm0, %v10272_v0  ;;  %v443_v63 = vrot.slane %v438_v49, 4  ;;  %v302_v2 = vld [vmem:[%s7503_s22 + $0x30] sm:$0xff]  ;;  %v467_v7 = vor.u32 %v465_v54, %v464_v62 }
  0x28   : > { %v7006_v8 = vld [vmem:[#allocation2 + $0x8] ss:$0 sps:$4 sm:$0x11]   ;;  %vm7515_vm7 = vmor %vm10274_vm2, %vm425_vm3  ;;  %v472_v4 = vrot.slane %v470_v58, 7  ;;  %v767_v5 = vld [vmem:[#allocation2 + $0x24] sm:$0xf]  ;;  %v7553_v14 = vpack.c.bf16 %v302_v2, %v302_v2 }
  0x29   : > { %v1461_v18 = vrot.slane %v7006_v8, 1  ;;  %v1195_v19 = vshll.u32 %v7006_v8, 16  ;;  %vm7522_vm8 = vmand %vm240_vm0, %vm749_vm5  ;;  %v459_v43 = vsel %vm7515_vm7, %v451_v35, %v458_v36  ;;  %v442_v3 = vsel %vm7515_vm7, %v434_v48, %v441_v56  ;;  %v303_v6 = vld [vmem:[%s7503_s22 + $0x38] sm:$0xff]  ;;  %v771_v10 = vld [vmem:[#allocation2 + $0x2c] sm:$0x1]  ;;  %s7338_s20 = smov 64  }
  0x2a   : > { %v761_v44 = vsel %vm7522_vm8, %v450_v34, %v760_v29  ;;  %763 = vst.msk [vmem:[#allocation2 + $0x1c] sm:$0xf] %vm240_vm0, %v459_v43  ;;  %v752_v57 = vsel %vm7522_vm8, %v433_v47, %v751_v45  ;;  %vm7540_vm9 = vmand %vm243_vm1, %vm10274_vm2  ;;  %v468_v8 = vrot.slane %v464_v62, 4  ;;  %v475_v11 = vor.u32 %v473_v59, %v472_v4  ;;  %v304_v2 = vld [vmem:[%s7503_s22 + $0x40] sm:$0xff]  ;;  %s7339_s21 = smov 56  }
  0x2b   : > { %v1462_v26 = vsel %vm1459_vm6, %v1460_v17, %v1461_v18  ;;  %v1197_v27 = vrot.slane %v1195_v19, 1  ;;  %762 = vst [vmem:[#allocation2 + $0x18] sm:$0xf] %v761_v44  ;;  %753 = vst [vmem:[#allocation2 + $0xc] sm:$0xf] %v752_v57  ;;  %v765_v1 = vsel %vm7540_vm9, %v460_v55, %v764_v51  ;;  %v758_v9 = vsel %vm7540_vm9, %v443_v63, %v757_v61 }
  0x2c   : > { %1508 = vrot.lane.b32.xlu1 %v1462_v26, %s7328_s23  ;;  %766 = vst [vmem:[#allocation2 + $0x20] sm:$0x1] %v765_v1  ;;  %754 = vst.msk [vmem:[#allocation2 + $0x10] sm:$0xf] %vm240_vm0, %v442_v3  ;;  %v477_v13 = vrot.slane %v472_v4, 4  ;;  %v768_v18 = vsel %vm7522_vm8, %v467_v7, %v767_v5  ;;  %v7557_v19 = vpack.c.bf16 %v303_v6, %v303_v6  ;;  %v479_v31 = vshrl.u32 %v7553_v14, 16 }
  0x2d   : > { %v1198_v52 = vsel %vm10275_vm4, %v1193_v42, %v1197_v27  ;;  %759 = vst [vmem:[#allocation2 + $0x14] sm:$0x1] %v758_v9  ;;  %v476_v21 = vsel %vm7515_vm7, %v468_v8, %v475_v11  ;;  %769 = vst [vmem:[#allocation2 + $0x24] sm:$0xf] %v768_v18  ;;  %v482_v32 = vshll.u32 %v7553_v14, 16  ;;  %vm2881_vm10 = vcmask 1041408  }
  0x2e   : > { %1379 = vrot.lane.b32.xlu0 %v1198_v52, %s7329_s24  ;;  %v772_v24 = vsel %vm7540_vm9, %v477_v13, %v771_v10  ;;  %770 = vst.msk [vmem:[#allocation2 + $0x28] sm:$0xf] %vm240_vm0, %v476_v21  ;;  %v487_v37 = vshrl.u32 %v7557_v19, 16  ;;  %vm2564_vm11 = vcmask 31744   ;;  %vm2597_vm12 = vcmask 64512  }
  0x2f   : > { %773 = vst [vmem:[#allocation2 + $0x2c] sm:$0x1] %v772_v24  ;;  %vm2630_vm13 = vcmask 97280   ;;  %vm10277_vm14 = vcmask 130048   ;;  %vm2696_vm15 = vcmask 162816   ;;  %vm10276_vm1 = vcmask 195584  }
  0x30   : > { %vm2762_vm3 = vcmask 228352   ;;  %vm2848_vm2 = vcmask 293888  }
  0x31   : > { %v932_v16 = vld [vmem:[#allocation2 + $0x1c] sm:$0xf] }
  0x32   : > { %v931_v15 = vld [vmem:[#allocation2 + $0x18] sm:$0xf]  ;;  %v995_v27 = vld [vmem:[#allocation2 + $0x1c] sm:$0xf]  ;;  %v929_v29 = vld [vmem:[#allocation2 + $0xc] sm:$0xf] }
  0x33   : > { %v978_v17 = vld [vmem:[#allocation2 + $0x18] sm:$0xe]  ;;  %v7559_v20 = vcombine.low %v931_v15, %v932_v16  ;;  %v977_v30 = vld [vmem:[#allocation2 + $0xc] sm:$0xe]  ;;  %v930_v38 = vld [vmem:[#allocation2 + $0x10] sm:$0xf] }
  0x34   : > { %v1042_v22 = vld [vmem:[#allocation2 + $0x18] sm:$0xe]  ;;  %v6451_v25 = vcombine.low %v978_v17, %v932_v16  ;;  %v914_v35 = vld [vmem:[#allocation2 + $0xc] sm:$0xe]  ;;  %v868_v40 = vld [vmem:[#allocation2 + $0x10] sm:$0xf]  ;;  %v7574_v41 = vcombine.low %v929_v29, %v930_v38  ;;  %v6450_v42 = vcombine.low %v977_v30, %v930_v38  ;;  %v7605_v29 = vpack.c.bf16 %v304_v2, %v304_v2 }
  0x35   : > { %v994_v26 = vld [vmem:[#allocation2 + $0x18] sm:$0xf]  ;;  %1622 = vrot.lane.b32.xlu1 %v7559_v20, %s7330_s25  ;;  %v1715_v33 = vshll.u32 %v7559_v20, 16  ;;  %v6498_v34 = vcombine.low %v1042_v22, %v995_v27  ;;  %v867_v36 = vld [vmem:[#allocation2 + $0xc] sm:$0xf]  ;;  %v6403_v44 = vcombine.low %v914_v35, %v868_v40  ;;  %v1713_v59 = vshrl.u32 %v7559_v20, 16 }
  0x36   : > { %v7572_v39 = vcombine.low %v994_v26, %v995_v27  ;;  %v7576_v43 = vld [vmem:[#allocation2 + $0x14] ss:$0 sps:$4 sm:$0x11]   ;;  %v1975_v45 = vrot.slane %v6451_v25, 1  ;;  %v869_v46 = vld [vmem:[#allocation2 + $0x18] sm:$0xf]  ;;  %v7581_v50 = vcombine.low %v867_v36, %v868_v40  ;;  %1620 = vrot.lane.b32.xlu0 %v7574_v41, %s7330_s25 }
  0x37   : > { %v7578_v47 = vld [vmem:[#allocation2 + $0x1c] sm:$0xf]  ;;  %v7018_v49 = vld [vmem:[#allocation2 + $0x14] ss:$0 sps:$4 sm:$0x11]   ;;  %v1972_v53 = vrot.slane %v6450_v42, 1 }
  0x38   : > { %v2215_v48 = vshll.u32 %v7572_v39, 16  ;;  %v996_v51 = vld [vmem:[#allocation2 + $0x24] sm:$0xf]  ;;  %v2484_v54 = vrot.slane %v6498_v34, 1  ;;  %v997_v55 = vld [vmem:[#allocation2 + $0x28] sm:$0xf]  ;;  %v7592_v5 = vcombine.low %v869_v46, %v7578_v47 }
  0x39   : > { %v1043_v52 = vld [vmem:[#allocation2 + $0x24] sm:$0xe]  ;;  %v1973_v56 = vrot.slane %v7576_v43, 1  ;;  %v1463_v57 = vrot.slane %v6403_v44, 1  ;;  %v1464_v58 = vrot.slane %v7018_v49, 1  ;;  %v6467_v61 = vcombine.low %v996_v51, %v997_v55  ;;  %v305_v17 = vld [vmem:[%s7503_s22 + $0x48] sm:$0xff] }
  0x3a   : > { %v6499_v62 = vcombine.low %v1043_v52, %v997_v55  ;;  %v7587_v63 = vld [vmem:[#allocation2 + $0x20] ss:$0 sps:$4 sm:$0x11]   ;;  %v1717_v1 = vrot.slane %v1715_v33, 1  ;;  %v1202_v4 = vshll.u32 %v7581_v50, 16  ;;  %2132 = vrot.lane.b32.xlu0 %v7572_v39, %s7331_s26  ;;  %v1200_v10 = vshrl.u32 %v7581_v50, 16 }
  0x3b   : > { %v7022_v3 = vld [vmem:[#allocation2 + $0x20] ss:$0 sps:$4 sm:$0x11]   ;;  %v2227_v6 = vshll.u32 %v6467_v61, 16  ;;  %2134 = vrot.lane.b32.xlu1 %v6467_v61, %s7331_s26  ;;  %v1974_v7 = vsel %vm1459_vm6, %v1972_v53, %v1973_v56  ;;  %v2485_v8 = vrot.slane %v7587_v63, 1  ;;  %v1465_v11 = vsel %vm1459_vm6, %v1463_v57, %v1464_v58  ;;  %v306_v46 = vld [vmem:[%s7503_s22 + $0x50] sm:$0xff] }
  0x3c   : > { %v7023_v9 = vld [vmem:[#allocation2 + $0x2c] ss:$0 sps:$4 sm:$0x11]   ;;  %v1976_v13 = vrot.slane %v7022_v3, 1  ;;  %v1720_v15 = vshll.u32 %v7022_v3, 16  ;;  %v1204_v16 = vrot.slane %v1202_v4, 1  ;;  %v1718_v33 = vor.u32 %v1717_v1, %v1713_v59 }
  0x3d   : > { %v1703_v18 = vshll.u32 %v7574_v41, 16  ;;  %v2487_v20 = vrot.slane %v6499_v62, 1  ;;  %v2225_v21 = vshrl.u32 %v6467_v61, 16  ;;  %v2229_v22 = vrot.slane %v2227_v6, 1  ;;  %v871_v34 = vld [vmem:[#allocation2 + $0x24] sm:$0xf] }
  0x3e   : > { %v2488_v24 = vrot.slane %v7023_v9, 1  ;;  %v2232_v25 = vshll.u32 %v7023_v9, 16  ;;  %v1207_v26 = vshll.u32 %v7018_v49, 16  ;;  %v7603_v27 = vld [vmem:[#allocation2 + $0x20] ss:$0 sps:$4 sm:$0x11]   ;;  %2020 = vrot.lane.b32.xlu0 %v1974_v7, %s7332_s27  ;;  %v2486_v30 = vsel %vm1459_vm6, %v2484_v54, %v2485_v8 }
  0x3f   : > { %1510 = vrot.lane.b32.xlu1 %v1465_v11, %s7328_s23  ;;  %v872_v35 = vld [vmem:[#allocation2 + $0x28] sm:$0xf]  ;;  %v7610_v36 = vpack.c.bf16 %v305_v17, %v305_v17  ;;  %v1977_v38 = vsel %vm1459_vm6, %v1975_v45, %v1976_v13  ;;  %v1722_v40 = vrot.slane %v1720_v15, 1  ;;  %v1205_v42 = vor.u32 %v1204_v16, %v1200_v10  ;;  %v307_v49 = vld [vmem:[%s7503_s22 + $0x58] sm:$0xff]  ;;  %v916_v45 = vld [vmem:[#allocation2 + $0x24] sm:$0xe] }
  0x40   : > { %v1214_v44 = vshll.u32 %v7592_v5, 16  ;;  %v2230_v51 = vor.u32 %v2229_v22, %v2225_v21  ;;  %v1701_v52 = vshrl.u32 %v7574_v41, 16  ;;  %v1705_v53 = vrot.slane %v1703_v18, 1  ;;  %v915_v54 = vld [vmem:[#allocation2 + $0x18] sm:$0xe] }
  0x41   : > { %v1708_v55 = vshll.u32 %v7576_v43, 16  ;;  %v2234_v56 = vrot.slane %v2232_v25, 1  ;;  %v1209_v57 = vrot.slane %v1207_v26, 1  ;;  %v1212_v58 = vshrl.u32 %v7592_v5, 16 }
  0x42   : > { %v7619_v59 = vcombine.low %v871_v34, %v872_v35  ;;  %2532 = vrot.lane.b32.xlu0 %v2486_v30, %s7333_s28  ;;  %v2489_v61 = vsel %vm1459_vm6, %v2487_v20, %v2488_v24  ;;  %v1219_v41 = vshll.u32 %v7603_v27, 16  ;;  %v7027_v62 = vld [vmem:[#allocation2 + $0x2c] ss:$0 sps:$4 sm:$0x11]   ;;  %v7625_v1 = vpack.c.bf16 %v306_v46, %v306_v46  ;;  %v7646_v24 = vld [vmem:[#allocation2 + $0x28] sm:$0xf] }
  0x43   : > { %2022 = vrot.lane.b32.xlu1 %v1977_v38, %s7332_s27  ;;  %v7627_v43 = vpack.c.bf16 %v307_v49, %v307_v49  ;;  %v1723_v2 = vsel %vm10275_vm4, %v1718_v33, %v1722_v40  ;;  %v1216_v3 = vrot.slane %v1214_v44, 1  ;;  %v1706_v4 = vor.u32 %v1705_v53, %v1701_v52  ;;  %v774_v34 = vld [vmem:[#allocation2 + $0x30] sm:$0xf]  ;;  %v7661_v52 = vld [vmem:[#allocation2 + $0x2c] ss:$0 sps:$4 sm:$0x11]  }
  0x44   : > { %v1226_v6 = vshll.u32 %v7619_v59, 16  ;;  %v1710_v7 = vrot.slane %v1708_v55, 1  ;;  %v2213_v8 = vshrl.u32 %v7572_v39, 16  ;;  %v2217_v9 = vrot.slane %v2215_v48, 1  ;;  %v933_v48 = vld [vmem:[#allocation2 + $0x24] sm:$0xf] }
  0x45   : > { %v2220_v10 = vshll.u32 %v7587_v63, 16  ;;  %v2235_v11 = vsel %vm10275_vm4, %v2230_v51, %v2234_v56  ;;  %v1210_v13 = vsel %vm10275_vm4, %v1205_v42, %v1209_v57  ;;  %v6405_v15 = vcombine.low %v916_v45, %v872_v35  ;;  %v778_v35 = vld [vmem:[#allocation2 + $0x38] sm:$0x1] }
  0x46   : > { %v6404_v16 = vcombine.low %v915_v54, %v7578_v47  ;;  %2534 = vrot.lane.b32.xlu0 %v2489_v61, %s7333_s28  ;;  %v1221_v17 = vrot.slane %v1219_v41, 1  ;;  %v1224_v18 = vshrl.u32 %v7619_v59, 16  ;;  %v1228_v20 = vrot.slane %v1226_v6, 1 }
  0x47   : > { %1894 = vrot.lane.b32.xlu1 %v1723_v2, %s7334_s29  ;;  %v1231_v39 = vshll.u32 %v7027_v62, 16  ;;  %v1217_v21 = vor.u32 %v1216_v3, %v1212_v58  ;;  %v481_v63 = vrot.slane %v479_v31, 7  ;;  %v489_v22 = vrot.slane %v487_v37, 7 }
  0x48   : > { %v490_v47 = vshll.u32 %v7557_v19, 16  ;;  %v1711_v25 = vsel %vm10275_vm4, %v1706_v4, %v1710_v7  ;;  %v2218_v26 = vor.u32 %v2217_v9, %v2213_v8  ;;  %v2222_v30 = vrot.slane %v2220_v10, 1  ;;  %v781_v4 = vld [vmem:[#allocation2 + $0x3c] sm:$0xf]  ;;  %v785_v10 = vld [vmem:[#allocation2 + $0x44] sm:$0x1] }
  0x49   : > { %v1470_v33 = vrot.slane %v7027_v62, 1  ;;  %v1469_v38 = vrot.slane %v6405_v15, 1  ;;  %v484_v40 = vor.u32 %v482_v32, %v481_v63  ;;  %v485_v42 = vrot.slane %v481_v63, 4 }
  0x4a   : > { %v492_v31 = vor.u32 %v490_v47, %v489_v22  ;;  %1381 = vrot.lane.b32.xlu0 %v1210_v13, %s7329_s24  ;;  %v1229_v19 = vor.u32 %v1228_v20, %v1224_v18  ;;  %v1233_v37 = vrot.slane %v1231_v39, 1  ;;  %v7654_v44 = vcombine.low %v933_v48, %v7646_v24  ;;  %v788_v18 = vld [vmem:[#allocation2 + $0x48] sm:$0xf] }
  0x4b   : > { %2406 = vrot.lane.b32.xlu1 %v2235_v11, %s7335_s30  ;;  %v494_v46 = vrot.slane %v489_v22, 4  ;;  %v1222_v49 = vsel %vm10275_vm4, %v1217_v21, %v1221_v17  ;;  %v1466_v51 = vrot.slane %v6404_v16, 1  ;;  %v775_v32 = vsel %vm7522_vm8, %v484_v40, %v774_v34  ;;  %v792_v21 = vld [vmem:[#allocation2 + $0x50] sm:$0x1] }
  0x4c   : > { %v493_v14 = vsel %vm7515_vm7, %v485_v42, %v492_v31  ;;  %v2223_v53 = vsel %vm10275_vm4, %v2218_v26, %v2222_v30  ;;  %v1467_v55 = vrot.slane %v7603_v27, 1  ;;  %776 = vst [vmem:[#allocation2 + $0x30] sm:$0xf] %v775_v32  ;;  %v496_v56 = vshrl.u32 %v7605_v29, 16 }
  0x4d   : > { %777 = vst.msk [vmem:[#allocation2 + $0x34] sm:$0xf] %vm240_vm0, %v493_v14  ;;  %v779_v54 = vsel %vm7540_vm9, %v494_v46, %v778_v35  ;;  %v1471_v57 = vsel %vm1459_vm6, %v1469_v38, %v1470_v33  ;;  %v499_v58 = vshll.u32 %v7605_v29, 16  ;;  %v504_v45 = vshrl.u32 %v7610_v36, 16 }
  0x4e   : > { %780 = vst [vmem:[#allocation2 + $0x38] sm:$0x1] %v779_v54  ;;  %v507_v61 = vshll.u32 %v7610_v36, 16  ;;  %1892 = vrot.lane.b32.xlu0 %v1711_v25, %s7334_s29  ;;  %v1234_v27 = vsel %vm10275_vm4, %v1229_v19, %v1233_v37  ;;  %v1727_v41 = vshll.u32 %v7654_v44, 16  ;;  %v498_v62 = vrot.slane %v496_v56, 7 }
  0x4f   : > { %1383 = vrot.lane.b32.xlu1 %v1222_v49, %s7329_s24  ;;  %v513_v2 = vshrl.u32 %v7625_v1, 16  ;;  %v506_v3 = vrot.slane %v504_v45, 7  ;;  %v516_v6 = vshll.u32 %v7625_v1, 16  ;;  %v521_v29 = vshrl.u32 %v7627_v43, 16  ;;  %v979_v1 = vld [vmem:[#allocation2 + $0x24] sm:$0xe] }
  0x50   : > { %v524_v7 = vshll.u32 %v7627_v43, 16  ;;  %v1725_v36 = vshrl.u32 %v7654_v44, 16  ;;  %v501_v8 = vor.u32 %v499_v58, %v498_v62  ;;  %v502_v9 = vrot.slane %v498_v62, 4 }
  0x51   : > { %v515_v11 = vrot.slane %v513_v2, 7  ;;  %v1732_v13 = vshll.u32 %v7661_v52, 16  ;;  %v509_v15 = vor.u32 %v507_v61, %v506_v3  ;;  %v511_v16 = vrot.slane %v506_v3, 4 }
  0x52   : > { %v523_v17 = vrot.slane %v521_v29, 7  ;;  %2404 = vrot.lane.b32.xlu0 %v2223_v53, %s7335_s30  ;;  %v1729_v20 = vrot.slane %v1727_v41, 1  ;;  %v782_v43 = vsel %vm7522_vm8, %v501_v8, %v781_v4  ;;  %v1468_v63 = vsel %vm1459_vm6, %v1466_v51, %v1467_v55  ;;  %v308_v41 = vld [vmem:[%s7503_s22 + $0x60] sm:$0xff] }
  0x53   : > { %1385 = vrot.lane.b32.xlu1 %v1234_v27, %s7329_s24  ;;  %v518_v39 = vor.u32 %v516_v6, %v515_v11  ;;  %v519_v48 = vrot.slane %v515_v11, 4  ;;  %v935_v22 = vld [vmem:[#allocation2 + $0x30] sm:$0xf]  ;;  %v510_v26 = vsel %vm7515_vm7, %v502_v9, %v509_v15  ;;  %783 = vst [vmem:[#allocation2 + $0x3c] sm:$0xf] %v782_v43  ;;  %v786_v30 = vsel %vm7540_vm9, %v511_v16, %v785_v10 }
  0x54   : > { %v936_v47 = vld [vmem:[#allocation2 + $0x34] sm:$0xf]  ;;  %v980_v25 = vld [vmem:[#allocation2 + $0x30] sm:$0xe]  ;;  %v526_v33 = vor.u32 %v524_v7, %v523_v17  ;;  %784 = vst.msk [vmem:[#allocation2 + $0x40] sm:$0xf] %vm240_vm0, %v510_v26  ;;  %v6452_v31 = vcombine.low %v979_v1, %v7646_v24  ;;  %v1730_v32 = vor.u32 %v1729_v20, %v1725_v36  ;;  %v6795_v16 = vpack.c.bf16 %v308_v41, %v308_v41 }
  0x55   : > { %v6421_v34 = vcombine.low %v935_v22, %v936_v47  ;;  %v7034_v35 = vld [vmem:[#allocation2 + $0x38] ss:$0 sps:$4 sm:$0x11]   ;;  %787 = vst [vmem:[#allocation2 + $0x44] sm:$0x1] %v786_v30  ;;  %v789_v38 = vsel %vm7522_vm8, %v518_v39, %v788_v18  ;;  %v528_v40 = vrot.slane %v523_v17, 4  ;;  %v6453_v42 = vcombine.low %v980_v25, %v936_v47 }
  0x56   : > { %v998_v19 = vld [vmem:[#allocation2 + $0x30] sm:$0xf]  ;;  %v7696_v37 = vld [vmem:[#allocation2 + $0x34] sm:$0xf]  ;;  %v527_v46 = vsel %vm7515_vm7, %v519_v48, %v526_v33  ;;  %790 = vst [vmem:[#allocation2 + $0x48] sm:$0xf] %v789_v38  ;;  %1512 = vrot.lane.b32.xlu0 %v1468_v63, %s7328_s23 }
  0x57   : > { %1514 = vrot.lane.b32.xlu1 %v1471_v57, %s7328_s23  ;;  %v1739_v49 = vshll.u32 %v6421_v34, 16  ;;  %v1737_v51 = vshrl.u32 %v6421_v34, 16  ;;  %v1744_v14 = vshll.u32 %v7034_v35, 16  ;;  %791 = vst.msk [vmem:[#allocation2 + $0x4c] sm:$0xf] %vm240_vm0, %v527_v46  ;;  %v1734_v53 = vrot.slane %v1732_v13, 1 }
  0x58   : > { %v7704_v24 = vcombine.low %v998_v19, %v7696_v37  ;;  %v873_v55 = vld [vmem:[#allocation2 + $0x30] sm:$0xf]  ;;  %v793_v54 = vsel %vm7540_vm9, %v528_v40, %v792_v21  ;;  %v7708_v57 = vld [vmem:[#allocation2 + $0x34] sm:$0xf]  ;;  %v1981_v45 = vrot.slane %v6453_v42, 1  ;;  %v1978_v61 = vrot.slane %v6452_v31, 1 }
  0x59   : > { %v1741_v56 = vrot.slane %v1739_v49, 1  ;;  %v1746_v58 = vrot.slane %v1744_v14, 1  ;;  %794 = vst [vmem:[#allocation2 + $0x50] sm:$0x1] %v793_v54  ;;  %v1979_v27 = vrot.slane %v7661_v52, 1  ;;  %v1982_v2 = vrot.slane %v7034_v35, 1 }
  0x5a   : > { %1624 = vrot.lane.b32.xlu0 %v7654_v44, %s7330_s25  ;;  %v1000_v3 = vld [vmem:[#allocation2 + $0x3c] sm:$0xf]  ;;  %v7715_v4 = vld [vmem:[#allocation2 + $0x38] ss:$0 sps:$4 sm:$0x11]   ;;  %v7718_v6 = vcombine.low %v873_v55, %v7708_v57  ;;  %v1735_v29 = vsel %vm10275_vm4, %v1730_v32, %v1734_v53  ;;  %v2239_v52 = vshll.u32 %v7704_v24, 16 }
  0x5b   : > { %1626 = vrot.lane.b32.xlu1 %v6421_v34, %s7330_s25  ;;  %v1742_v62 = vor.u32 %v1741_v56, %v1737_v51  ;;  %v7721_v7 = vld [vmem:[#allocation2 + $0x40] sm:$0xf]  ;;  %v1044_v9 = vld [vmem:[#allocation2 + $0x30] sm:$0xe]  ;;  %v875_v10 = vld [vmem:[#allocation2 + $0x3c] sm:$0xf]  ;;  %v1980_v11 = vsel %vm1459_vm6, %v1978_v61, %v1979_v27  ;;  %v1983_v17 = vsel %vm1459_vm6, %v1981_v45, %v1982_v2 }
  0x5c   : > { %v6469_v8 = vcombine.low %v1000_v3, %v7721_v7  ;;  %v7726_v44 = vld [vmem:[#allocation2 + $0x44] ss:$0 sps:$4 sm:$0x11]   ;;  %v2237_v13 = vshrl.u32 %v7704_v24, 16  ;;  %v7730_v15 = vld [vmem:[#allocation2 + $0x40] sm:$0xf]  ;;  %v6500_v47 = vcombine.low %v1044_v9, %v7696_v37 }
  0x5d   : > { %v1747_v36 = vsel %vm10275_vm4, %v1742_v62, %v1746_v58  ;;  %v2244_v1 = vshll.u32 %v7715_v4, 16  ;;  %v7736_v20 = vld [vmem:[#allocation2 + $0x38] ss:$0 sps:$4 sm:$0x11]   ;;  %v1238_v43 = vshll.u32 %v7718_v6, 16  ;;  %v2256_v48 = vshll.u32 %v7726_v44, 16 }
  0x5e   : > { %1896 = vrot.lane.b32.xlu0 %v1735_v29, %s7334_s29  ;;  %v2251_v18 = vshll.u32 %v6469_v8, 16  ;;  %v2249_v39 = vshrl.u32 %v6469_v8, 16  ;;  %v2241_v21 = vrot.slane %v2239_v52, 1  ;;  %v7741_v63 = vcombine.low %v875_v10, %v7730_v15  ;;  %v309_v25 = vld [vmem:[%s7503_s22 + $0x68] sm:$0xff]  ;;  %v1045_v30 = vld [vmem:[#allocation2 + $0x3c] sm:$0xe] }
  0x5f   : > { %1898 = vrot.lane.b32.xlu1 %v1747_v36, %s7334_s29  ;;  %v530_v26 = vshrl.u32 %v6795_v16, 16  ;;  %v2246_v33 = vrot.slane %v2244_v1, 1  ;;  %v1236_v34 = vshrl.u32 %v7718_v6, 16  ;;  %v1240_v35 = vrot.slane %v1238_v43, 1  ;;  %v918_v32 = vld [vmem:[#allocation2 + $0x3c] sm:$0xe] }
  0x60   : > { %v2253_v22 = vrot.slane %v2251_v18, 1  ;;  %v1243_v38 = vshll.u32 %v7736_v20, 16  ;;  %v2258_v42 = vrot.slane %v2256_v48, 1  ;;  %v2242_v31 = vor.u32 %v2241_v21, %v2237_v13  ;;  %v7749_v19 = vld [vmem:[#allocation2 + $0x44] ss:$0 sps:$4 sm:$0x11]  }
  0x61   : > { %v1250_v37 = vshll.u32 %v7741_v63, 16  ;;  %v533_v46 = vshll.u32 %v6795_v16, 16  ;;  %v6501_v49 = vcombine.low %v1045_v30, %v7721_v7  ;;  %v2490_v51 = vrot.slane %v6500_v47, 1  ;;  %v917_v53 = vld [vmem:[#allocation2 + $0x30] sm:$0xe]  ;;  %v311_v1 = vld [vmem:[%s7503_s22 + $0x78] sm:$0xff] }
  0x62   : > { %2024 = vrot.lane.b32.xlu0 %v1980_v11, %s7332_s27  ;;  %v2254_v40 = vor.u32 %v2253_v22, %v2249_v39  ;;  %v2491_v14 = vrot.slane %v7715_v4, 1  ;;  %v6796_v55 = vpack.c.bf16 %v309_v25, %v309_v25  ;;  %v1241_v54 = vor.u32 %v1240_v35, %v1236_v34  ;;  %v939_v2 = vld [vmem:[#allocation2 + $0x48] sm:$0xf]  ;;  %v7761_v3 = vld [vmem:[#allocation2 + $0x4c] sm:$0xf]  ;;  %v310_v18 = vld [vmem:[%s7503_s22 + $0x70] sm:$0xff] }
  0x63   : > { %2026 = vrot.lane.b32.xlu1 %v1983_v17, %s7332_s27  ;;  %v1245_v56 = vrot.slane %v1243_v38, 1  ;;  %v1248_v58 = vshrl.u32 %v7741_v63, 16  ;;  %v532_v45 = vrot.slane %v530_v26, 7  ;;  %v2247_v27 = vsel %vm10275_vm4, %v2242_v31, %v2246_v33  ;;  %v7765_v7 = vld [vmem:[#allocation2 + $0x40] sm:$0xf] }
  0x64   : > { %v2259_v61 = vsel %vm10275_vm4, %v2254_v40, %v2258_v42  ;;  %v1252_v41 = vrot.slane %v1250_v37, 1  ;;  %v1255_v62 = vshll.u32 %v7749_v19, 16  ;;  %v6407_v4 = vcombine.low %v918_v32, %v7730_v15  ;;  %v795_v9 = vld [vmem:[#allocation2 + $0x54] sm:$0xf]  ;;  %v982_v48 = vld [vmem:[#allocation2 + $0x48] sm:$0xe] }
  0x65   : > { %v6406_v29 = vcombine.low %v917_v53, %v7708_v57  ;;  %v2492_v52 = vsel %vm1459_vm6, %v2490_v51, %v2491_v14  ;;  %v2493_v36 = vrot.slane %v6501_v49, 1  ;;  %v1246_v10 = vsel %vm10275_vm4, %v1241_v54, %v1245_v56  ;;  %v312_v47 = vld [vmem:[%s7503_s22 + $0x80] sm:$0xff]  ;;  %v7785_v26 = vld [vmem:[#allocation2 + $0x50] ss:$0 sps:$4 sm:$0x11]  }
  0x66   : > { %2136 = vrot.lane.b32.xlu0 %v7704_v24, %s7331_s26  ;;  %v937_v24 = vld [vmem:[#allocation2 + $0x3c] sm:$0xf]  ;;  %v1476_v57 = vrot.slane %v7749_v19, 1  ;;  %v7774_v11 = vcombine.low %v939_v2, %v7761_v3  ;;  %v535_v13 = vor.u32 %v533_v46, %v532_v45  ;;  %v1253_v15 = vor.u32 %v1252_v41, %v1248_v58  ;;  %v7791_v38 = vld [vmem:[#allocation2 + $0x44] ss:$0 sps:$4 sm:$0x11]  }
  0x67   : > { %2138 = vrot.lane.b32.xlu1 %v6469_v8, %s7331_s26  ;;  %v2494_v8 = vrot.slane %v7726_v44, 1  ;;  %v1257_v16 = vrot.slane %v1255_v62, 1  ;;  %v7777_v17 = vcombine.low %v937_v24, %v7765_v7  ;;  %v538_v44 = vshrl.u32 %v6796_v55, 16  ;;  %v799_v40 = vld [vmem:[#allocation2 + $0x5c] sm:$0x1]  ;;  %v313_v58 = vld [vmem:[%s7503_s22 + $0x88] sm:$0xff] }
  0x68   : > { %v1475_v43 = vrot.slane %v6407_v4, 1  ;;  %v1472_v39 = vrot.slane %v6406_v29, 1  ;;  %v541_v21 = vshll.u32 %v6796_v55, 16  ;;  %v796_v22 = vsel %vm7522_vm8, %v535_v13, %v795_v9  ;;  %v981_v53 = vld [vmem:[#allocation2 + $0x3c] sm:$0xe] }
  0x69   : > { %v1473_v25 = vrot.slane %v7736_v20, 1  ;;  %v536_v30 = vrot.slane %v532_v45, 4  ;;  %v540_v33 = vrot.slane %v538_v44, 7  ;;  %797 = vst [vmem:[#allocation2 + $0x54] sm:$0xf] %v796_v22  ;;  %v2495_v34 = vsel %vm1459_vm6, %v2493_v36, %v2494_v8 }
  0x6a   : > { %2408 = vrot.lane.b32.xlu0 %v2247_v27, %s7335_s30  ;;  %v1763_v35 = vshll.u32 %v7774_v11, 16  ;;  %v6797_v42 = vpack.c.bf16 %v310_v18, %v310_v18  ;;  %v6798_v31 = vpack.c.bf16 %v311_v1, %v311_v1  ;;  %v1258_v20 = vsel %vm10275_vm4, %v1253_v15, %v1257_v16  ;;  %v1002_v62 = vld [vmem:[#allocation2 + $0x48] sm:$0xf]  ;;  %v7818_v13 = vld [vmem:[#allocation2 + $0x4c] sm:$0xf] }
  0x6b   : > { %2410 = vrot.lane.b32.xlu1 %v2259_v61, %s7335_s30  ;;  %v1751_v19 = vshll.u32 %v7777_v17, 16  ;;  %v543_v37 = vor.u32 %v541_v21, %v540_v33  ;;  %v545_v46 = vrot.slane %v540_v33, 4  ;;  %v1477_v49 = vsel %vm1459_vm6, %v1475_v43, %v1476_v57  ;;  %v877_v9 = vld [vmem:[#allocation2 + $0x48] sm:$0xf]  ;;  %v802_v43 = vld [vmem:[#allocation2 + $0x60] sm:$0xf] }
  0x6c   : > { %v6455_v51 = vcombine.low %v982_v48, %v7761_v3  ;;  %v7797_v14 = vpack.c.bf16 %v312_v47, %v312_v47  ;;  %v1474_v32 = vsel %vm1459_vm6, %v1472_v39, %v1473_v25  ;;  %v1768_v55 = vshll.u32 %v7785_v26, 16  ;;  %v7812_v3 = vld [vmem:[#allocation2 + $0x4c] sm:$0xf] }
  0x6d   : > { %v544_v54 = vsel %vm7515_vm7, %v536_v30, %v543_v37  ;;  %v800_v56 = vsel %vm7540_vm9, %v545_v46, %v799_v40  ;;  %v1761_v45 = vshrl.u32 %v7774_v11, 16  ;;  %v1765_v61 = vrot.slane %v1763_v35, 1 }
  0x6e   : > { %2536 = vrot.lane.b32.xlu0 %v2492_v52, %s7333_s28  ;;  %v1749_v27 = vshrl.u32 %v7777_v17, 16  ;;  %v1756_v41 = vshll.u32 %v7791_v38, 16  ;;  %798 = vst.msk [vmem:[#allocation2 + $0x58] sm:$0xf] %vm240_vm0, %v544_v54  ;;  %801 = vst [vmem:[#allocation2 + $0x5c] sm:$0x1] %v800_v56  ;;  %v6454_v52 = vcombine.low %v981_v53, %v7765_v7  ;;  %v7823_v7 = vcombine.low %v1002_v62, %v7812_v3 }
  0x6f   : > { %1387 = vrot.lane.b32.xlu1 %v1246_v10, %s7329_s24  ;;  %v1753_v2 = vrot.slane %v1751_v19, 1  ;;  %v547_v4 = vshrl.u32 %v6797_v42, 16  ;;  %v550_v29 = vshll.u32 %v6797_v42, 16  ;;  %v555_v24 = vshrl.u32 %v6798_v31, 16 }
  0x70   : > { %v1987_v36 = vrot.slane %v6455_v51, 1  ;;  %v1988_v8 = vrot.slane %v7785_v26, 1  ;;  %v7816_v10 = vpack.c.bf16 %v313_v58, %v313_v58  ;;  %v1770_v57 = vrot.slane %v1768_v55, 1  ;;  %v1004_v21 = vld [vmem:[#allocation2 + $0x54] sm:$0xf] }
  0x71   : > { %v549_v15 = vrot.slane %v547_v4, 7  ;;  %v557_v16 = vrot.slane %v555_v24, 7  ;;  %v558_v44 = vshll.u32 %v6798_v31, 16  ;;  %v1766_v18 = vor.u32 %v1765_v61, %v1761_v45  ;;  %v806_v26 = vld [vmem:[#allocation2 + $0x68] sm:$0x1] }
  0x72   : > { %2538 = vrot.lane.b32.xlu0 %v2495_v34, %s7333_s28  ;;  %v1758_v1 = vrot.slane %v1756_v41, 1  ;;  %v564_v39 = vshrl.u32 %v7797_v14, 16  ;;  %v1754_v48 = vor.u32 %v1753_v2, %v1749_v27  ;;  %v1984_v30 = vrot.slane %v6454_v52, 1  ;;  %v7827_v34 = vld [vmem:[#allocation2 + $0x50] ss:$0 sps:$4 sm:$0x11]  }
  0x73   : > { %1389 = vrot.lane.b32.xlu1 %v1258_v20, %s7329_s24  ;;  %v552_v22 = vor.u32 %v550_v29, %v549_v15  ;;  %v553_v47 = vrot.slane %v549_v15, 4  ;;  %v560_v25 = vor.u32 %v558_v44, %v557_v16  ;;  %v1985_v33 = vrot.slane %v7791_v38, 1  ;;  %v1046_v58 = vld [vmem:[#allocation2 + $0x48] sm:$0xe]  ;;  %v809_v29 = vld [vmem:[#allocation2 + $0x6c] sm:$0xf] }
  0x74   : > { %v7830_v35 = vcombine.low %v877_v9, %v7818_v13  ;;  %v562_v40 = vrot.slane %v557_v16, 4  ;;  %v7838_v19 = vrot.slane %v564_v39, 7  ;;  %v567_v37 = vshll.u32 %v7797_v14, 16  ;;  %v7859_v45 = vld [vmem:[#allocation2 + $0x50] ss:$0 sps:$4 sm:$0x11]  }
  0x75   : > { %v7832_v42 = vld [vmem:[#allocation2 + $0x58] sm:$0xf]  ;;  %v561_v31 = vsel %vm7515_vm7, %v553_v47, %v560_v25  ;;  %v803_v20 = vsel %vm7522_vm8, %v552_v22, %v802_v43  ;;  %v2263_v46 = vshll.u32 %v7823_v7, 16  ;;  %v1771_v51 = vsel %vm10275_vm4, %v1766_v18, %v1770_v57  ;;  %v7850_v53 = vld [vmem:[#allocation2 + $0x5c] ss:$0 sps:$4 sm:$0x11]  }
  0x76   : > { %1516 = vrot.lane.b32.xlu0 %v1474_v32, %s7328_s23  ;;  %v6471_v38 = vcombine.low %v1004_v21, %v7832_v42  ;;  %804 = vst [vmem:[#allocation2 + $0x60] sm:$0xf] %v803_v20  ;;  %805 = vst.msk [vmem:[#allocation2 + $0x64] sm:$0xf] %vm240_vm0, %v561_v31  ;;  %v1759_v32 = vsel %vm10275_vm4, %v1754_v48, %v1758_v1  ;;  %v7852_v14 = vld [vmem:[#allocation2 + $0x58] sm:$0xf]  ;;  %v1989_v54 = vsel %vm1459_vm6, %v1987_v36, %v1988_v8 }
  0x77   : > { %1518 = vrot.lane.b32.xlu1 %v1477_v49, %s7328_s23  ;;  %v879_v49 = vld [vmem:[#allocation2 + $0x54] sm:$0xf]  ;;  %v1986_v56 = vsel %vm1459_vm6, %v1984_v30, %v1985_v33  ;;  %v1262_v61 = vshll.u32 %v7830_v35, 16  ;;  %v569_v27 = vor.u32 %v567_v37, %v7838_v19  ;;  %v2261_v41 = vshrl.u32 %v7823_v7, 16  ;;  %v919_v37 = vld [vmem:[#allocation2 + $0x48] sm:$0xe] }
  0x78   : > { %v2275_v55 = vshll.u32 %v6471_v38, 16  ;;  %v2265_v62 = vrot.slane %v2263_v46, 1  ;;  %v2268_v2 = vshll.u32 %v7827_v34, 16  ;;  %v7868_v4 = vcombine.low %v879_v49, %v7852_v14  ;;  %v7879_v39 = vld [vmem:[#allocation2 + $0x5c] ss:$0 sps:$4 sm:$0x11]  }
  0x79   : > { %v2273_v24 = vshrl.u32 %v6471_v38, 16  ;;  %v2280_v36 = vshll.u32 %v7850_v53, 16  ;;  %v6502_v9 = vcombine.low %v1046_v58, %v7812_v3  ;;  %v575_v57 = vshll.u32 %v7816_v10, 16  ;;  %v314_v46 = vld [vmem:[%s7503_s22 + $0x90] sm:$0xff]  ;;  %v315_v58 = vld [vmem:[%s7503_s22 + $0x98] sm:$0xff] }
  0x7a   : > { %1628 = vrot.lane.b32.xlu0 %v7777_v17, %s7330_s25  ;;  %v572_v17 = vshrl.u32 %v7816_v10, 16  ;;  %v2277_v52 = vrot.slane %v2275_v55, 1  ;;  %v1260_v15 = vshrl.u32 %v7830_v35, 16  ;;  %v1264_v16 = vrot.slane %v1262_v61, 1  ;;  %v1047_v10 = vld [vmem:[#allocation2 + $0x54] sm:$0xe] }
  0x7b   : > { %1630 = vrot.lane.b32.xlu1 %v7774_v11, %s7330_s25  ;;  %v807_v11 = vsel %vm7540_vm9, %v562_v40, %v806_v26  ;;  %v1267_v44 = vshll.u32 %v7859_v45, 16  ;;  %v810_v18 = vsel %vm7522_vm8, %v569_v27, %v809_v29  ;;  %v2266_v1 = vor.u32 %v2265_v62, %v2261_v41 }
  0x7c   : > { %808 = vst [vmem:[#allocation2 + $0x68] sm:$0x1] %v807_v11  ;;  %v574_v8 = vrot.slane %v572_v17, 7  ;;  %v2270_v43 = vrot.slane %v2268_v2, 1  ;;  %v570_v3 = vrot.slane %v7838_v19, 4  ;;  %v2278_v48 = vor.u32 %v2277_v52, %v2273_v24 }
  0x7d   : > { %811 = vst [vmem:[#allocation2 + $0x6c] sm:$0xf] %v810_v18  ;;  %v2282_v21 = vrot.slane %v2280_v36, 1  ;;  %v1274_v22 = vshll.u32 %v7868_v4, 16  ;;  %v1265_v25 = vor.u32 %v1264_v16, %v1260_v15  ;;  %v1269_v26 = vrot.slane %v1267_v44, 1 }
  0x7e   : > { %1900 = vrot.lane.b32.xlu0 %v1759_v32, %s7334_s29  ;;  %v577_v47 = vor.u32 %v575_v57, %v574_v8  ;;  %v2496_v30 = vrot.slane %v6502_v9, 1  ;;  %v2497_v33 = vrot.slane %v7827_v34, 1  ;;  %v6503_v40 = vcombine.low %v1047_v10, %v7832_v42  ;;  %v920_v19 = vld [vmem:[#allocation2 + $0x54] sm:$0xe]  ;;  %v7893_v42 = vld [vmem:[#allocation2 + $0x58] sm:$0xf] }
  0x7f   : > { %1902 = vrot.lane.b32.xlu1 %v1771_v51, %s7334_s29  ;;  %v2271_v31 = vsel %vm10275_vm4, %v2266_v1, %v2270_v43  ;;  %v1272_v20 = vshrl.u32 %v7868_v4, 16  ;;  %v2283_v49 = vsel %vm10275_vm4, %v2278_v48, %v2282_v21  ;;  %v1276_v51 = vrot.slane %v1274_v22, 1  ;;  %v941_v32 = vld [vmem:[#allocation2 + $0x54] sm:$0xf]  ;;  %v944_v11 = vld [vmem:[#allocation2 + $0x64] sm:$0xf] }
  0x80   : > { %v1279_v34 = vshll.u32 %v7879_v39, 16  ;;  %v1270_v17 = vsel %vm10275_vm4, %v1265_v25, %v1269_v26  ;;  %v2498_v55 = vsel %vm1459_vm6, %v2496_v30, %v2497_v33  ;;  %v6801_v61 = vpack.c.bf16 %v314_v46, %v314_v46  ;;  %v7916_v16 = vld [vmem:[#allocation2 + $0x5c] ss:$0 sps:$4 sm:$0x11]   ;;  %v816_v21 = vld [vmem:[#allocation2 + $0x78] sm:$0xf] }
  0x81   : > { %v2499_v27 = vrot.slane %v6503_v40, 1  ;;  %v6409_v41 = vcombine.low %v920_v19, %v7852_v14  ;;  %v7906_v62 = vcombine.low %v941_v32, %v7893_v42  ;;  %v579_v2 = vrot.slane %v574_v8, 4  ;;  %v984_v8 = vld [vmem:[#allocation2 + $0x60] sm:$0xe] }
  0x82   : > { %2028 = vrot.lane.b32.xlu0 %v1986_v56, %s7332_s27  ;;  %v813_v56 = vld [vmem:[#allocation2 + $0x74] sm:$0x1]  ;;  %v1277_v29 = vor.u32 %v1276_v51, %v1272_v20  ;;  %v1281_v24 = vrot.slane %v1279_v34, 1  ;;  %v2500_v52 = vrot.slane %v7850_v53, 1  ;;  %v7913_v9 = vpack.c.bf16 %v315_v58, %v315_v58  ;;  %v1006_v25 = vld [vmem:[#allocation2 + $0x60] sm:$0xf] }
  0x83   : > { %2030 = vrot.lane.b32.xlu1 %v1989_v54, %s7332_s27  ;;  %v6408_v54 = vcombine.low %v919_v37, %v7818_v13  ;;  %v814_v13 = vsel %vm7540_vm9, %v579_v2, %v813_v56  ;;  %v1479_v15 = vrot.slane %v7859_v45, 1  ;;  %v1481_v14 = vrot.slane %v6409_v41, 1  ;;  %v7934_v20 = vld [vmem:[#allocation2 + $0x64] sm:$0xf] }
  0x84   : > { %815 = vst [vmem:[#allocation2 + $0x74] sm:$0x1] %v814_v13  ;;  %v1482_v53 = vrot.slane %v7879_v39, 1  ;;  %v1775_v44 = vshll.u32 %v7906_v62, 16  ;;  %v581_v18 = vshrl.u32 %v6801_v61, 16  ;;  %v1282_v1 = vsel %vm10275_vm4, %v1277_v29, %v1281_v24  ;;  %v7091_v13 = vld [vmem:[%s10268_s1 + $0x8] sm:$0xff]  }
  0x85   : > { %v1478_v57 = vrot.slane %v6408_v54, 1  ;;  %v2501_v43 = vsel %vm1459_vm6, %v2499_v27, %v2500_v52  ;;  %v584_v10 = vshll.u32 %v6801_v61, 16  ;;  %v589_v48 = vshrl.u32 %v7913_v9, 16  ;;  %v983_v39 = vld [vmem:[#allocation2 + $0x54] sm:$0xe] }
  0x86   : > { %2140 = vrot.lane.b32.xlu0 %v7823_v7, %s7331_s26  ;;  %v943_v7 = vld [vmem:[#allocation2 + $0x60] sm:$0xf]  ;;  %v583_v26 = vrot.slane %v581_v18, 7  ;;  %v1483_v30 = vsel %vm1459_vm6, %v1481_v14, %v1482_v53  ;;  %v1773_v40 = vshrl.u32 %v7906_v62, 16  ;;  %v1780_v46 = vshll.u32 %v7916_v16, 16 }
  0x87   : > { %2142 = vrot.lane.b32.xlu1 %v6471_v38, %s7331_s26  ;;  %v578_v38 = vsel %vm7515_vm7, %v570_v3, %v577_v47  ;;  %v7909_v36 = vcombine.low %v943_v7, %v944_v11  ;;  %v7925_v3 = vld [vmem:[#allocation2 + $0x68] ss:$0 sps:$4 sm:$0x11]   ;;  %v1480_v22 = vsel %vm1459_vm6, %v1478_v57, %v1479_v15  ;;  %v6457_v47 = vcombine.low %v984_v8, %v944_v11  ;;  %v7088_v34 = vld [vmem:[%s10268_s1 + $0x10] ss:$0 sps:$4 sm:$0x33]  }
  0x88   : > { %812 = vst.msk [vmem:[#allocation2 + $0x70] sm:$0xf] %vm240_vm0, %v578_v38  ;;  %v1792_v37 = vshll.u32 %v7925_v3, 16  ;;  %v586_v51 = vor.u32 %v584_v10, %v583_v26  ;;  %v6456_v32 = vcombine.low %v983_v39, %v7893_v42  ;;  %v591_v7 = vrot.slane %v589_v48, 7  ;;  %v881_v54 = vld [vmem:[#allocation2 + $0x60] sm:$0xf]  ;;  %6967 = vmatprep.subr.msk.bf16.mxu0 %vm2881_vm10, %v7088_v34 }
  0x89   : > { %v1787_v45 = vshll.u32 %v7909_v36, 16  ;;  %v1785_v33 = vshrl.u32 %v7909_v36, 16  ;;  %v1993_v11 = vrot.slane %v6457_v47, 1  ;;  %v7952_v42 = vld [vmem:[#allocation2 + $0x64] sm:$0xf]  ;;  %v587_v61 = vrot.slane %v583_v26, 4 }
  0x8a   : > { %2412 = vrot.lane.b32.xlu0 %v2271_v31, %s7335_s30  ;;  %v1777_v31 = vrot.slane %v1775_v44, 1  ;;  %v817_v56 = vsel %vm7522_vm8, %v586_v51, %v816_v21  ;;  %v592_v27 = vshll.u32 %v7913_v9, 16  ;;  %v1794_v2 = vrot.slane %v1792_v37, 1  ;;  %v820_v52 = vld [vmem:[#allocation2 + $0x80] sm:$0x1]  ;;  %v317_v9 = vld [vmem:[%s7503_s22 + $0xa8] sm:$0xff] }
  0x8b   : > { %2414 = vrot.lane.b32.xlu1 %v2283_v49, %s7335_s30  ;;  %v1789_v19 = vrot.slane %v1787_v45, 1  ;;  %v1008_v49 = vld [vmem:[#allocation2 + $0x6c] sm:$0xf]  ;;  %818 = vst [vmem:[#allocation2 + $0x78] sm:$0xf] %v817_v56  ;;  %v1782_v29 = vrot.slane %v1780_v46, 1 }
  0x8c   : > { %v1778_v58 = vor.u32 %v1777_v31, %v1773_v40  ;;  %v316_v57 = vld [vmem:[%s7503_s22 + $0xa0] sm:$0xff]  ;;  %v1990_v15 = vrot.slane %v6456_v32, 1  ;;  %v1991_v14 = vrot.slane %v7916_v16, 1  ;;  %v594_v8 = vor.u32 %v592_v27, %v591_v7  ;;  %v7967_v18 = vld [vmem:[#allocation2 + $0x68] ss:$0 sps:$4 sm:$0x11]  }
  0x8d   : > { %v1790_v41 = vor.u32 %v1789_v19, %v1785_v33  ;;  %v7963_v53 = vld [vmem:[#allocation2 + $0x60] sm:$0xe]  ;;  %v883_v16 = vld [vmem:[#allocation2 + $0x6c] sm:$0xf]  ;;  %v6803_v10 = vpack.c.bf16 %v316_v57, %v316_v57  ;;  %v2292_v37 = vshll.u32 %v7967_v18, 16 }
  0x8e   : > { %2540 = vrot.lane.b32.xlu0 %v2498_v55, %s7333_s28  ;;  %v7946_v55 = vcombine.low %v1006_v25, %v7934_v20  ;;  %v595_v45 = vsel %vm7515_vm7, %v587_v61, %v594_v8  ;;  %v1783_v21 = vsel %vm10275_vm4, %v1778_v58, %v1782_v29  ;;  %v7981_v47 = vld [vmem:[#allocation2 + $0x74] ss:$0 sps:$4 sm:$0x11]   ;;  %v1992_v25 = vsel %vm1459_vm6, %v1990_v15, %v1991_v14  ;;  %v7092_v40 = vld [vmem:[%s10268_s1] sm:$0xff]   ;;  %v922_v15 = vld [vmem:[#allocation2 + $0x6c] sm:$0xe] }
  0x8f   : > { %1391 = vrot.lane.b32.xlu1 %v1270_v17, %s7329_s24  ;;  %v7942_v38 = vld [vmem:[#allocation2 + $0x70] sm:$0xf]  ;;  %v1994_v17 = vrot.slane %v7925_v3, 1  ;;  %v596_v3 = vrot.slane %v591_v7, 4  ;;  %v1795_v48 = vsel %vm10275_vm4, %v1790_v41, %v1794_v2  ;;  %819 = vst.msk [vmem:[#allocation2 + $0x7c] sm:$0xf] %vm240_vm0, %v595_v45  ;;  %v6504_v26 = vcombine.low %v7963_v53, %v7934_v20 }
  0x90   : > { %v7956_v24 = vcombine.low %v1008_v49, %v7942_v38  ;;  %v2287_v44 = vshll.u32 %v7946_v55, 16  ;;  %v7983_v39 = vld [vmem:[#allocation2 + $0x70] sm:$0xf]  ;;  %v2285_v31 = vshrl.u32 %v7946_v55, 16  ;;  %v598_v51 = vshrl.u32 %v6803_v10, 16 }
  0x91   : > { %v821_v33 = vsel %vm7540_vm9, %v596_v3, %v820_v52  ;;  %v8004_v49 = vcombine.low %v883_v16, %v7983_v39  ;;  %v2304_v7 = vshll.u32 %v7981_v47, 16  ;;  %v823_v41 = vld [vmem:[#allocation2 + $0x84] sm:$0xf]  ;;  %v8012_v2 = vld [vmem:[#allocation2 + $0x6c] sm:$0xe]  ;;  %v2294_v52 = vrot.slane %v2292_v37, 1 }
  0x92   : > { %2542 = vrot.lane.b32.xlu0 %v2501_v43, %s7333_s28  ;;  %v2883_v43 = vsel %vm2881_vm10, %v7088_v34, 0  ;;  %v2289_v19 = vrot.slane %v2287_v44, 1  ;;  %822 = vst [vmem:[#allocation2 + $0x80] sm:$0x1] %v821_v33  ;;  %v2297_v20 = vshrl.u32 %v7956_v24, 16  ;;  %v601_v34 = vshll.u32 %v6803_v10, 16 }
  0x93   : > { %1393 = vrot.lane.b32.xlu1 %v1282_v1, %s7329_s24  ;;  %v7970_v1 = vcombine.low %v881_v54, %v7952_v42  ;;  %6888 = vmatpush3.bf16.msra.mxu0 %v2883_v43  ;;  %v318_v54 = vld [vmem:[%s7503_s22 + $0xb0] sm:$0xff]  ;;  %v600_v27 = vrot.slane %v598_v51, 7  ;;  %v921_v14 = vld [vmem:[#allocation2 + $0x60] sm:$0xe]  ;;  %v827_v53 = vld [vmem:[#allocation2 + $0x8c] sm:$0x1]  ;;  %v6411_v51 = vcombine.low %v922_v15, %v7983_v39 }
  0x94   : > { %6889 = vmatprep.subr.bf16.mxu0 %v7091_v13  ;;  %v2290_v29 = vor.u32 %v2289_v19, %v2285_v31  ;;  %v945_v44 = vld [vmem:[#allocation2 + $0x6c] sm:$0xf]  ;;  %v8018_v43 = vld [vmem:[#allocation2 + $0x70] sm:$0xf]  ;;  %v8020_v3 = vpack.c.bf16 %v318_v54, %v318_v54  ;;  %vm2795_vm10 = vcmask 261120  }
  0x95   : > { %v1286_v46 = vshll.u32 %v7970_v1, 16  ;;  %v1284_v58 = vshrl.u32 %v7970_v1, 16  ;;  %v603_v16 = vor.u32 %v601_v34, %v600_v27  ;;  %v604_v45 = vrot.slane %v600_v27, 4  ;;  %v985_v34 = vld [vmem:[#allocation2 + $0x6c] sm:$0xe] }
  0x96   : > { %1520 = vrot.lane.b32.xlu0 %v1480_v22, %s7328_s23  ;;  %v2299_v22 = vshll.u32 %v7956_v24, 16  ;;  %v2295_v31 = vsel %vm10275_vm4, %v2290_v29, %v2294_v52  ;;  %v8031_v37 = vcombine.low %v945_v44, %v8018_v43  ;;  %v8053_v54 = vld [vmem:[#allocation2 + $0x7c] sm:$0xf]  ;;  %v8062_v29 = vld [vmem:[#allocation2 + $0x74] ss:$0 sps:$4 sm:$0x11]  }
  0x97   : > { %1522 = vrot.lane.b32.xlu1 %v1483_v30, %s7328_s23  ;;  %v7990_v30 = vld [vmem:[#allocation2 + $0x68] ss:$0 sps:$4 sm:$0x11]   ;;  %6890 = vmatpush3.bf16.msra.mxu0 %v7091_v13  ;;  %v1288_v57 = vrot.slane %v1286_v46, 1  ;;  %v1487_v15 = vrot.slane %v6411_v51, 1  ;;  %v320_v44 = vld [vmem:[%s7503_s22 + $0xc0] sm:$0xff] }
  0x98   : > { %v2301_v32 = vrot.slane %v2299_v22, 1  ;;  %v1291_v61 = vshll.u32 %v7990_v30, 16  ;;  %6891 = vmatprep.subr.bf16.mxu0 %v7092_v40  ;;  %v1298_v22 = vshll.u32 %v8004_v49, 16  ;;  %v1485_v27 = vrot.slane %v7990_v30, 1 }
  0x99   : > { %v1289_v19 = vor.u32 %v1288_v57, %v1284_v58  ;;  %v615_v58 = vshrl.u32 %v8020_v3, 16  ;;  %v2506_v30 = vrot.slane %v7981_v47, 1  ;;  %v986_v47 = vld [vmem:[#allocation2 + $0x78] sm:$0xe] }
  0x9a   : > { %1632 = vrot.lane.b32.xlu0 %v7906_v62, %s7330_s25  ;;  %v6804_v62 = vpack.c.bf16 %v317_v9, %v317_v9  ;;  %v2502_v9 = vrot.slane %v6504_v26, 1  ;;  %v2302_v10 = vor.u32 %v2301_v32, %v2297_v20  ;;  %v824_v26 = vsel %vm7522_vm8, %v603_v16, %v823_v41 }
  0x9b   : > { %1634 = vrot.lane.b32.xlu1 %v7909_v36, %s7330_s25  ;;  %v1995_v36 = vsel %vm1459_vm6, %v1993_v11, %v1994_v17  ;;  %6892 = vmatpush3.bf16.msra.mxu0 %v7092_v40  ;;  %825 = vst [vmem:[#allocation2 + $0x84] sm:$0xf] %v824_v26  ;;  %v319_v40 = vld [vmem:[%s7503_s22 + $0xb8] sm:$0xff]  ;;  %v1293_v20 = vrot.slane %v1291_v61, 1  ;;  %v1799_v41 = vshll.u32 %v8031_v37, 16 }
  0x9c   : > { %v606_v11 = vshrl.u32 %v6804_v62, 16  ;;  %v609_v17 = vshll.u32 %v6804_v62, 16  ;;  %v8055_v39 = vpack.c.bf16 %v319_v40, %v319_v40  ;;  %v8090_v40 = vpack.c.bf16 %v320_v44, %v320_v44 }
  0x9d   : > { %v1294_v52 = vsel %vm10275_vm4, %v1289_v19, %v1293_v20  ;;  %v1801_v26 = vrot.slane %v1799_v41, 1  ;;  %v1997_v19 = vrot.slane %v8062_v29, 1 }
  0x9e   : > { %1904 = vrot.lane.b32.xlu0 %v1783_v21, %s7334_s29  ;;  %v8008_v56 = vpop.permute.xlu1 %1508  ;;  %v608_v13 = vrot.slane %v606_v11, 7  ;;  %v8022_v21 = vld [vmem:[#allocation2 + $0x74] ss:$0 sps:$4 sm:$0x11]   ;;  %v1300_v11 = vrot.slane %v1298_v22, 1  ;;  %v8079_v22 = vrot.slane %v615_v58, 7 }
  0x9f   : > { %1906 = vrot.lane.b32.xlu1 %v1795_v48, %s7334_s29  ;;  %v2306_v48 = vrot.slane %v2304_v7, 1 }
  0xa0   : > { %v8016_v8 = vpop.permute.xlu0 %1379  ;;  %v611_v62 = vor.u32 %v609_v17, %v608_v13  ;;  %v613_v33 = vrot.slane %v608_v13, 4  ;;  %v947_v17 = vld [vmem:[#allocation2 + $0x78] sm:$0xf] }
  0xa1   : > { %v2307_v7 = vsel %vm10275_vm4, %v2302_v10, %v2306_v48  ;;  %v1488_v10 = vrot.slane %v8022_v21, 1  ;;  %v1797_v48 = vshrl.u32 %v8031_v37, 16 }
  0xa2   : > { %2032 = vrot.lane.b32.xlu0 %v1992_v25, %s7332_s27  ;;  %v6410_v25 = vcombine.low %v921_v14, %v7952_v42  ;;  %v612_v46 = vsel %vm7515_vm7, %v604_v45, %v611_v62  ;;  %v828_v32 = vsel %vm7540_vm9, %v613_v33, %v827_v53  ;;  %v618_v62 = vshll.u32 %v8020_v3, 16 }
  0xa3   : > { %2034 = vrot.lane.b32.xlu1 %v1995_v36, %s7332_s27  ;;  %v2503_v36 = vrot.slane %v7967_v18, 1  ;;  %v6505_v18 = vcombine.low %v8012_v2, %v7942_v38  ;;  %826 = vst.msk [vmem:[#allocation2 + $0x88] sm:$0xf] %vm240_vm0, %v612_v46  ;;  %v1296_v38 = vshrl.u32 %v8004_v49, 16  ;;  %829 = vst [vmem:[#allocation2 + $0x8c] sm:$0x1] %v828_v32  ;;  %v6458_v2 = vcombine.low %v985_v34, %v8018_v43 }
  0xa4   : > { %v1484_v14 = vrot.slane %v6410_v25, 1  ;;  %v321_v43 = vld [vmem:[%s7503_s22 + $0xc8] sm:$0xff]  ;;  %v323_v25 = vld [vmem:[%s7503_s22 + $0xd8] sm:$0xff]  ;;  %v1804_v33 = vshll.u32 %v8062_v29, 16  ;;  %v2566_v3 = vsel %vm2564_vm11, %v7508_v12, %v8016_v8  ;;  %v1489_v12 = vsel %vm1459_vm6, %v1487_v15, %v1488_v10  ;;  %v1012_v10 = vld [vmem:[#allocation2 + $0x84] sm:$0xf] }
  0xa5   : > { %v2504_v61 = vsel %vm1459_vm6, %v2502_v9, %v2503_v36  ;;  %v2505_v57 = vrot.slane %v6505_v18, 1  ;;  %v1301_v13 = vor.u32 %v1300_v11, %v1296_v38  ;;  %v8069_v9 = vcombine.low %v947_v17, %v8053_v54  ;;  %v322_v36 = vld [vmem:[%s7503_s22 + $0xd0] sm:$0xff]  ;;  %v8088_v46 = vld [vmem:[#allocation2 + $0x7c] sm:$0xf] }
  0xa6   : > { %2144 = vrot.lane.b32.xlu0 %v7946_v55, %s7331_s26  ;;  %v8092_v18 = vpack.c.bf16 %v321_v43, %v321_v43  ;;  %v8100_v32 = vld [vmem:[#allocation2 + $0x80] ss:$0 sps:$4 sm:$0x11]   ;;  %v620_v11 = vor.u32 %v618_v62, %v8079_v22  ;;  %v8108_v17 = vpack.c.bf16 %v322_v36, %v322_v36  ;;  %v8110_v58 = vpack.c.bf16 %v323_v25, %v323_v25  ;;  %v8118_v29 = vld [vmem:[#allocation2 + $0x7c] sm:$0xf] }
  0xa7   : > { %2146 = vrot.lane.b32.xlu1 %v7956_v24, %s7331_s26  ;;  %v8042_v42 = vpop.permute.xlu1 %1622  ;;  %v1303_v24 = vshll.u32 %v8022_v21, 16  ;;  %v1010_v21 = vld [vmem:[#allocation2 + $0x78] sm:$0xf]  ;;  %v2507_v51 = vsel %vm1459_vm6, %v2505_v57, %v2506_v30  ;;  %v1811_v34 = vshll.u32 %v8069_v9, 16  ;;  %v1486_v8 = vsel %vm1459_vm6, %v1484_v14, %v1485_v27 }
  0xa8   : > { %v8051_v55 = vpop.permute.xlu0 %1620  ;;  %v8116_v41 = vcombine.low %v1010_v21, %v8088_v46  ;;  %v8122_v57 = vsel %vm2597_vm12, %v2566_v3, %v8008_v56  ;;  %v1802_v15 = vor.u32 %v1801_v26, %v1797_v48  ;;  %v8126_v27 = vld [vmem:[#allocation2 + $0x78] sm:$0xe]  ;;  %v1809_v14 = vshrl.u32 %v8069_v9, 16  ;;  %v8154_v3 = vld [vmem:[#allocation2 + $0x80] ss:$0 sps:$4 sm:$0x11]  }
  0xa9   : > { %v1305_v53 = vrot.slane %v1303_v24, 1  ;;  %v623_v24 = vshrl.u32 %v8055_v39, 16  ;;  %v1816_v30 = vshll.u32 %v8100_v32, 16  ;;  %v2000_v26 = vrot.slane %v8100_v32, 1 }
  0xaa   : > { %2416 = vrot.lane.b32.xlu0 %v2295_v31, %s7335_s30  ;;  %v1996_v31 = vrot.slane %v6458_v2, 1  ;;  %v885_v2 = vld [vmem:[#allocation2 + $0x78] sm:$0xf]  ;;  %v8138_v62 = vld [vmem:[#allocation2 + $0x88] sm:$0xf]  ;;  %v6506_v21 = vcombine.low %v8126_v27, %v8088_v46 }
  0xab   : > { %2418 = vrot.lane.b32.xlu1 %v2307_v7, %s7335_s30  ;;  %v1306_v20 = vsel %vm10275_vm4, %v1301_v13, %v1305_v53  ;;  %v1806_v13 = vrot.slane %v1804_v33, 1  ;;  %v1813_v53 = vrot.slane %v1811_v34, 1  ;;  %v8141_v48 = vcombine.low %v885_v2, %v8118_v29 }
  0xac   : > { %v8075_v45 = vpop.permute.xlu0 %2132  ;;  %v8132_v44 = vsel %vm1459_vm6, %v1996_v31, %v1997_v19  ;;  %v625_v36 = vrot.slane %v623_v24, 7  ;;  %v2311_v33 = vshll.u32 %v8116_v41, 16  ;;  %v834_v31 = vld [vmem:[#allocation2 + $0x98] sm:$0x1]  ;;  %v632_v19 = vshrl.u32 %v8090_v40, 16 }
  0xad   : > { %v8073_v16 = vpop.permute.xlu1 %2134  ;;  %v1814_v34 = vor.u32 %v1813_v53, %v1809_v14  ;;  %v1818_v32 = vrot.slane %v1816_v30, 1  ;;  %v2309_v24 = vshrl.u32 %v8116_v41, 16  ;;  %v1310_v2 = vshll.u32 %v8141_v48, 16  ;;  %v887_v53 = vld [vmem:[#allocation2 + $0x84] sm:$0xf] }
  0xae   : > { %2544 = vrot.lane.b32.xlu0 %v2504_v61, %s7333_s28  ;;  %v6459_v61 = vcombine.low %v986_v47, %v8053_v54  ;;  %v626_v54 = vshll.u32 %v8055_v39, 16  ;;  %v621_v39 = vrot.slane %v8079_v22, 4  ;;  %v1807_v22 = vsel %vm10275_vm4, %v1802_v15, %v1806_v13  ;;  %v837_v13 = vld [vmem:[#allocation2 + $0x9c] sm:$0xf] }
  0xaf   : > { %1395 = vrot.lane.b32.xlu1 %v1294_v52, %s7329_s24  ;;  %v830_v52 = vld [vmem:[#allocation2 + $0x90] sm:$0xf]  ;;  %v2313_v14 = vrot.slane %v2311_v33, 1  ;;  %v634_v30 = vrot.slane %v632_v19, 7  ;;  %v1819_v33 = vsel %vm10275_vm4, %v1814_v34, %v1818_v32  ;;  %v652_v19 = vshll.u32 %v8108_v17, 16 }
  0xb0   : > { %v8102_v7 = vpop.permute.xlu0 %2020  ;;  %v831_v25 = vsel %vm7522_vm8, %v620_v11, %v830_v52  ;;  %v1999_v47 = vrot.slane %v6459_v61, 1  ;;  %v8157_v11 = vcombine.low %v1012_v10, %v8138_v62  ;;  %v635_v10 = vshll.u32 %v8090_v40, 16  ;;  %v844_v61 = vld [vmem:[#allocation2 + $0xa8] sm:$0xf] }
  0xb1   : > { %v8104_v38 = vpop.permute.xlu1 %1510  ;;  %832 = vst [vmem:[#allocation2 + $0x90] sm:$0xf] %v831_v25  ;;  %v640_v25 = vshrl.u32 %v8092_v18, 16  ;;  %v1312_v32 = vrot.slane %v1310_v2, 1 }
  0xb2   : > { %2546 = vrot.lane.b32.xlu0 %v2507_v51, %s7333_s28  ;;  %v630_v51 = vrot.slane %v625_v36, 4  ;;  %v2323_v40 = vshll.u32 %v8157_v11, 16 }
  0xb3   : > { %1397 = vrot.lane.b32.xlu1 %v1306_v20, %s7329_s24  ;;  %v628_v20 = vor.u32 %v626_v54, %v625_v36  ;;  %v2001_v54 = vsel %vm1459_vm6, %v1999_v47, %v2000_v26  ;;  %v8176_v36 = vld [vmem:[#allocation2 + $0x88] sm:$0xf]  ;;  %v643_v47 = vshll.u32 %v8092_v18, 16  ;;  %v649_v26 = vshrl.u32 %v8108_v17, 16 }
  0xb4   : > { %v8134_v56 = vpop.permute.xlu0 %2532  ;;  %v835_v15 = vsel %vm7540_vm9, %v630_v51, %v834_v31  ;;  %v8183_v31 = vld [vmem:[#allocation2 + $0x8c] ss:$0 sps:$4 sm:$0x11]   ;;  %v8194_v0 = vcombine.low %v887_v53, %v8176_v36 }
  0xb5   : > { %v8136_v43 = vpop.permute.xlu1 %2022  ;;  %v629_v52 = vsel %vm7515_vm7, %v621_v39, %v628_v20  ;;  %836 = vst [vmem:[#allocation2 + $0x98] sm:$0x1] %v835_v15  ;;  %v2316_v39 = vshll.u32 %v8154_v3, 16  ;;  %v642_v15 = vrot.slane %v640_v25, 7  ;;  %v8189_v18 = vrot.slane %v649_v26, 7 }
  0xb6   : > { %1524 = vrot.lane.b32.xlu0 %v1486_v8, %s7328_s23  ;;  %833 = vst.msk [vmem:[#allocation2 + $0x94] sm:$0xf] %vm240_vm0, %v629_v52  ;;  %v638_v52 = vrot.slane %v634_v30, 4  ;;  %v2325_v25 = vrot.slane %v2323_v40, 1  ;;  %v2328_v26 = vshll.u32 %v8183_v31, 16 }
  0xb7   : > { %1526 = vrot.lane.b32.xlu1 %v1489_v12, %s7328_s23  ;;  %v654_v2 = vor.u32 %v652_v19, %v8189_v18 }
  0xb8   : > { %v8160_v12 = vpop.permute.xlu0 %2534 }
  0xb9   : > { %v1895_v8 = vpop.permute.xlu1 %1894  ;;  %v845_v19 = vsel %vm7522_vm8, %v654_v2, %v844_v61  ;;  %v949_v61 = vld [vmem:[#allocation2 + $0x84] sm:$0xf] }
  0xba   : > { %1636 = vrot.lane.b32.xlu0 %v8031_v37, %s7330_s25  ;;  %v2632_v37 = vsel %vm2630_vm13, %v8122_v57, %v8051_v55  ;;  %v8202_v57 = vld [vmem:[#allocation2 + $0x80] ss:$0 sps:$4 sm:$0x11]   ;;  %846 = vst [vmem:[#allocation2 + $0xa8] sm:$0xf] %v845_v19 }
  0xbb   : > { %1638 = vrot.lane.b32.xlu1 %v8069_v9, %s7330_s25  ;;  %v637_v9 = vor.u32 %v635_v10, %v634_v30  ;;  %v841_v10 = vld [vmem:[#allocation2 + $0xa4] sm:$0x1]  ;;  %v645_v30 = vor.u32 %v643_v47, %v642_v15  ;;  %v7110_v19 = vld [vmem:[#allocation2 + $0x8c] ss:$0 sps:$4 sm:$0x11]  }
  0xbc   : > { %v1382_v51 = vpop.permute.xlu0 %1381 }
  0xbd   : > { %v2407_v20 = vpop.permute.xlu1 %2406  ;;  %v2568_v34 = vsel %vm2564_vm11, %v7581_v50, %v1382_v51  ;;  %v838_v17 = vsel %vm7522_vm8, %v637_v9, %v837_v13  ;;  %v647_v50 = vrot.slane %v642_v15, 4  ;;  %v2321_v13 = vshrl.u32 %v8157_v11, 16 }
  0xbe   : > { %v2601_v55 = vsel %vm2597_vm12, %v2568_v34, %v8104_v38  ;;  %1908 = vrot.lane.b32.xlu0 %v1807_v22, %s7334_s29  ;;  %839 = vst [vmem:[#allocation2 + $0x9c] sm:$0xf] %v838_v17  ;;  %v646_v47 = vsel %vm7515_vm7, %v638_v52, %v645_v30  ;;  %v2314_v51 = vor.u32 %v2313_v14, %v2309_v24  ;;  %v2318_v15 = vrot.slane %v2316_v39, 1  ;;  %v8232_v14 = vld [vmem:[#allocation2 + $0x88] sm:$0xf] }
  0xbf   : > { %1910 = vrot.lane.b32.xlu1 %v1819_v33, %s7334_s29  ;;  %v2634_v53 = vsel %vm2630_vm13, %v2601_v55, %v8042_v42  ;;  %v842_v9 = vsel %vm7540_vm9, %v647_v50, %v841_v10  ;;  %840 = vst.msk [vmem:[#allocation2 + $0xa0] sm:$0xf] %vm240_vm0, %v646_v47  ;;  %v1315_v24 = vshll.u32 %v8202_v57, 16  ;;  %v2326_v34 = vor.u32 %v2325_v25, %v2321_v13  ;;  %v951_v25 = vld [vmem:[#allocation2 + $0x90] sm:$0xf] }
  0xc0   : > { %v2667_v38 = vsel %vm10277_vm14, %v2634_v53, %v1895_v8  ;;  %v1893_v22 = vpop.permute.xlu0 %1892  ;;  %v8221_v8 = vld [vmem:[#allocation2 + $0x8c] ss:$0 sps:$4 sm:$0x11]   ;;  %843 = vst [vmem:[#allocation2 + $0xa4] sm:$0x1] %v842_v9  ;;  %v2509_v55 = vrot.slane %v8154_v3, 1  ;;  %v8249_v53 = vcombine.low %v949_v61, %v8232_v14 }
  0xc1   : > { %v8210_v33 = vpop.permute.xlu1 %1383  ;;  %v2665_v42 = vsel %vm10277_vm14, %v2632_v37, %v1893_v22  ;;  %v2700_v40 = vsel %vm2696_vm15, %v2667_v38, %v8136_v43  ;;  %v1051_v37 = vld [vmem:[#allocation2 + $0x84] sm:$0xe]  ;;  %v10284_v50 = vshrl.u32 %v8141_v48, 16  ;;  %v1317_v27 = vrot.slane %v1315_v24, 1  ;;  %v923_v3 = vld [vmem:[#allocation2 + $0x78] sm:$0xe] }
  0xc2   : > { %v2698_v52 = vsel %vm2696_vm15, %v2665_v42, %v8102_v7  ;;  %2036 = vrot.lane.b32.xlu0 %v8132_v44, %s7332_s27  ;;  %v2733_v43 = vsel %vm10276_vm1, %v2700_v40, %v8073_v16  ;;  %v2330_v7 = vrot.slane %v2328_v26, 1  ;;  %v2508_v16 = vrot.slane %v6506_v21, 1  ;;  %v952_v26 = vld [vmem:[#allocation2 + $0x94] sm:$0xf]  ;;  %v924_v38 = vld [vmem:[#allocation2 + $0x84] sm:$0xe] }
  0xc3   : > { %2038 = vrot.lane.b32.xlu1 %v2001_v54, %s7332_s27  ;;  %v2731_v39 = vsel %vm10276_vm1, %v2698_v52, %v8075_v45  ;;  %v1322_v54 = vshll.u32 %v8194_v0, 16  ;;  %v2766_v10 = vsel %vm2762_vm3, %v2733_v43, %v2407_v20  ;;  %v2319_v45 = vsel %vm10275_vm4, %v2314_v51, %v2318_v15  ;;  %v987_v9 = vld [vmem:[#allocation2 + $0x84] sm:$0xe]  ;;  %v988_v15 = vld [vmem:[#allocation2 + $0x90] sm:$0xe] }
  0xc4   : > { %v2405_v44 = vpop.permute.xlu0 %2404  ;;  %v1313_v2 = vor.u32 %v1312_v32, %v10284_v50  ;;  %v6507_v13 = vcombine.low %v1051_v37, %v8138_v62  ;;  %v1320_v21 = vshrl.u32 %v8194_v0, 16  ;;  %v2799_v20 = vsel %vm2795_vm10, %v2766_v10, %v8160_v12  ;;  %v893_v60 = vld [vmem:[#allocation2 + $0xa8] sm:$0xf] }
  0xc5   : > { %v8237_v17 = vpop.permute.xlu1 %1385  ;;  %v2764_v30 = vsel %vm2762_vm3, %v2731_v39, %v2405_v44  ;;  %v2331_v62 = vsel %vm10275_vm4, %v2326_v34, %v2330_v7  ;;  %v1324_v32 = vrot.slane %v1322_v54, 1  ;;  %v2510_v22 = vsel %vm1459_vm6, %v2508_v16, %v2509_v55  ;;  %v324_v16 = vld [vmem:[%s7503_s22 + $0xe0] sm:$0xff]  ;;  %v1053_v28 = vld [vmem:[#allocation2 + $0x9c] sm:$0xe] }
  0xc6   : > { %2148 = vrot.lane.b32.xlu0 %v8116_v41, %s7331_s26  ;;  %v2797_v46 = vsel %vm2795_vm10, %v2764_v30, %v8134_v56  ;;  %v6412_v47 = vcombine.low %v923_v3, %v8118_v29  ;;  %v1823_v12 = vshll.u32 %v8249_v53, 16  ;;  %v1318_v42 = vsel %vm10275_vm4, %v1313_v2, %v1317_v27 }
  0xc7   : > { %2150 = vrot.lane.b32.xlu1 %v8157_v11, %s7331_s26  ;;  %6893 = vmatprep.mubr.msk.bf16.mxu0 %vm2848_vm2, %v2797_v46  ;;  %v1327_v11 = vshll.u32 %v8221_v8, 16  ;;  %v2511_v40 = vrot.slane %v6507_v13, 1  ;;  %v2512_v51 = vrot.slane %v8183_v31, 1  ;;  %v8276_v52 = vcombine.low %v951_v25, %v952_v26 }
  0xc8   : > { %6894 = vmatmul.mubr.msk.bf16.vlgmr.msra.gmra.mxu0 %vm2848_vm2, %v2799_v20  ;;  %v8267_v56 = vpop.permute.xlu0 %1512  ;;  %v1325_v43 = vor.u32 %v1324_v32, %v1320_v21  ;;  %v6413_v29 = vcombine.low %v924_v38, %v8176_v36  ;;  %v657_v61 = vshrl.u32 %v8110_v58, 16  ;;  %v1491_v34 = vrot.slane %v8202_v57, 1  ;;  %v7109_v57 = vld [vmem:[#allocation2 + $0x98] ss:$0 sps:$4 sm:$0x11]   ;;  %v325_v38 = vld [vmem:[%s7503_s22 + $0xe8] sm:$0xff] }
  0xc9   : > { %v8264_v41 = vpop.permute.xlu1 %1514  ;;  %v1329_v24 = vrot.slane %v1327_v11, 1  ;;  %v6460_v7 = vcombine.low %v987_v9, %v8232_v14  ;;  %v6461_v54 = vcombine.low %v988_v15, %v952_v26  ;;  %v1821_v31 = vshrl.u32 %v8249_v53, 16  ;;  %v1014_v20 = vld [vmem:[#allocation2 + $0x90] sm:$0xf] }
  0xca   : > { %2420 = vrot.lane.b32.xlu0 %v2319_v45, %s7335_s30  ;;  %v1825_v44 = vrot.slane %v1823_v12, 1  ;;  %v1828_v10 = vshll.u32 %v7110_v19, 16  ;;  %v2513_v36 = vsel %vm1459_vm6, %v2511_v40, %v2512_v51  ;;  %v1494_v55 = vrot.slane %v8221_v8, 1  ;;  %v8299_v8 = vld [vmem:[#allocation2 + $0x94] sm:$0xf] }
  0xcb   : > { %2422 = vrot.lane.b32.xlu1 %v2331_v62, %s7335_s30  ;;  %v1490_v30 = vrot.slane %v6412_v47, 1  ;;  %v1835_v45 = vshll.u32 %v8276_v52, 16  ;;  %v1330_v14 = vsel %vm10275_vm4, %v1325_v43, %v1329_v24  ;;  %v1493_v50 = vrot.slane %v6413_v29, 1  ;;  %v8314_v51 = vld [vmem:[#allocation2 + $0x98] ss:$0 sps:$4 sm:$0x11]  }
  0xcc   : > { %v8282_v37 = vpop.permute.xlu0 %1624  ;;  %v659_v2 = vrot.slane %v657_v61, 7  ;;  %v660_v13 = vshll.u32 %v8110_v58, 16  ;;  %v2002_v21 = vrot.slane %v6460_v7, 1  ;;  %v2003_v3 = vrot.slane %v7110_v19, 1  ;;  %v848_v43 = vld [vmem:[#allocation2 + $0xb0] sm:$0x1] }
  0xcd   : > { %v8280_v39 = vpop.permute.xlu1 %1626  ;;  %v8301_v62 = vpack.c.bf16 %v324_v16, %v324_v16  ;;  %v1826_v32 = vor.u32 %v1825_v44, %v1821_v31  ;;  %v1830_v11 = vrot.slane %v1828_v10, 1  ;;  %v2005_v25 = vrot.slane %v6461_v54, 1  ;;  %v1016_v7 = vld [vmem:[#allocation2 + $0x9c] sm:$0xf]  ;;  %v8321_v54 = vld [vmem:[#allocation2 + $0xa0] sm:$0xf] }
  0xce   : > { %2548 = vrot.lane.b32.xlu0 %v2510_v22, %s7333_s28  ;;  %v2006_v26 = vrot.slane %v7109_v57, 1  ;;  %v326_v22 = vld [vmem:[%s7503_s22 + $0xf0] sm:$0xff]  ;;  %v1833_v58 = vshrl.u32 %v8276_v52, 16  ;;  %v1837_v47 = vrot.slane %v1835_v45, 1  ;;  %v1840_v9 = vshll.u32 %v7109_v57, 16 }
  0xcf   : > { %1399 = vrot.lane.b32.xlu1 %v1318_v42, %s7329_s24  ;;  %v655_v12 = vrot.slane %v8189_v18, 4  ;;  %v1495_v19 = vsel %vm1459_vm6, %v1493_v50, %v1494_v55  ;;  %v1492_v42 = vsel %vm1459_vm6, %v1490_v30, %v1491_v34  ;;  %v8312_v40 = vcombine.low %v1014_v20, %v8299_v8  ;;  %v889_v45 = vld [vmem:[#allocation2 + $0x90] sm:$0xf]  ;;  %v8337_v57 = vld [vmem:[#allocation2 + $0x94] sm:$0xf] }
  0xd0   : > { %v8297_v27 = vpop.permute.xlu0 %1896  ;;  %v662_v15 = vor.u32 %v660_v13, %v659_v2  ;;  %v8319_v61 = vsel %vm1459_vm6, %v2002_v21, %v2003_v3  ;;  %v664_v18 = vrot.slane %v659_v2, 4  ;;  %v6812_v31 = vpack.c.bf16 %v325_v38, %v325_v38 }
  0xd1   : > { %v8295_v46 = vpop.permute.xlu1 %1898  ;;  %v8323_v44 = vpack.c.bf16 %v326_v22, %v326_v22  ;;  %v2570_v34 = vsel %vm2564_vm11, %v7592_v5, %v8210_v33  ;;  %v2572_v10 = vsel %vm2564_vm11, %v7619_v59, %v8237_v17  ;;  %v1831_v16 = vsel %vm10275_vm4, %v1826_v32, %v1830_v11  ;;  %v851_v22 = vld [vmem:[#allocation2 + $0xb4] sm:$0xf] }
  0xd2   : > { %2550 = vrot.lane.b32.xlu0 %v2513_v36, %s7333_s28  ;;  %v8333_v36 = vsel %vm1459_vm6, %v2005_v25, %v2006_v26  ;;  %v1838_v55 = vor.u32 %v1837_v47, %v1833_v58  ;;  %v1842_v30 = vrot.slane %v1840_v9, 1  ;;  %v663_v5 = vsel %vm7515_vm7, %v655_v12, %v662_v15  ;;  %v855_v58 = vld [vmem:[#allocation2 + $0xbc] sm:$0x1]  ;;  %v8366_v47 = vld [vmem:[#allocation2 + $0xa4] ss:$0 sps:$4 sm:$0x11]  }
  0xd3   : > { %1401 = vrot.lane.b32.xlu1 %v1330_v14, %s7329_s24  ;;  %v849_v59 = vsel %vm7540_vm9, %v664_v18, %v848_v43  ;;  %v8344_v33 = vcombine.low %v1016_v7, %v8321_v54  ;;  %v2335_v17 = vshll.u32 %v8312_v40, 16  ;;  %v2333_v14 = vshrl.u32 %v8312_v40, 16  ;;  %847 = vst.msk [vmem:[#allocation2 + $0xac] sm:$0xf] %vm240_vm0, %v663_v5  ;;  %v858_v43 = vld [vmem:[#allocation2 + $0xc0] sm:$0xf] }
  0xd4   : > { %v2025_v29 = vpop.permute.xlu0 %2024  ;;  %850 = vst [vmem:[#allocation2 + $0xb0] sm:$0x1] %v849_v59  ;;  %v666_v50 = vshrl.u32 %v8301_v62, 16  ;;  %v2340_v21 = vshll.u32 %v8314_v51, 16  ;;  %v669_v3 = vshll.u32 %v8301_v62, 16  ;;  %v674_v20 = vshrl.u32 %v6812_v31, 16 }
  0xd5   : > { %v8316_v24 = vpop.permute.xlu1 %2026  ;;  %v677_v32 = vshll.u32 %v6812_v31, 16  ;;  %v2605_v11 = vsel %vm2597_vm12, %v2572_v10, %v8264_v41  ;;  %v2603_v25 = vsel %vm2597_vm12, %v2570_v34, %v8267_v56  ;;  %v8359_v26 = vcombine.low %v889_v45, %v8337_v57  ;;  %v891_v31 = vld [vmem:[#allocation2 + $0x9c] sm:$0xf]  ;;  %v8375_v34 = vld [vmem:[#allocation2 + $0xa0] sm:$0xf] }
  0xd6   : > { %1528 = vrot.lane.b32.xlu0 %v1492_v42, %s7328_s23  ;;  %v668_v38 = vrot.slane %v666_v50, 7  ;;  %v1843_v62 = vsel %vm10275_vm4, %v1838_v55, %v1842_v30  ;;  %v676_v41 = vrot.slane %v674_v20, 7  ;;  %v683_v9 = vshrl.u32 %v8323_v44, 16  ;;  %v1052_v42 = vld [vmem:[#allocation2 + $0x90] sm:$0xe] }
  0xd7   : > { %1530 = vrot.lane.b32.xlu1 %v1495_v19, %s7328_s23  ;;  %v686_v56 = vshll.u32 %v8323_v44, 16  ;;  %v2636_v12 = vsel %vm2630_vm13, %v2603_v25, %v8282_v37  ;;  %v2347_v19 = vshll.u32 %v8344_v33, 16  ;;  %v2345_v30 = vshrl.u32 %v8344_v33, 16  ;;  %v8381_v5 = vld [vmem:[#allocation2 + $0x98] ss:$0 sps:$4 sm:$0x11]  }
  0xd8   : > { %v2137_v13 = vpop.permute.xlu0 %2136  ;;  %v671_v15 = vor.u32 %v669_v3, %v668_v38  ;;  %v679_v10 = vor.u32 %v677_v32, %v676_v41  ;;  %v681_v55 = vrot.slane %v676_v41, 4  ;;  %v8377_v44 = vrot.slane %v683_v9, 7 }
  0xd9   : > { %v8350_v2 = vpop.permute.xlu1 %2138  ;;  %v2337_v45 = vrot.slane %v2335_v17, 1  ;;  %v2349_v20 = vrot.slane %v2347_v19, 1  ;;  %v1334_v32 = vshll.u32 %v8359_v26, 16  ;;  %v8396_v25 = vcombine.low %v891_v31, %v8375_v34  ;;  %v925_v31 = vld [vmem:[#allocation2 + $0x90] sm:$0xe] }
  0xda   : > { %1640 = vrot.lane.b32.xlu0 %v8249_v53, %s7330_s25  ;;  %v2669_v53 = vsel %vm10277_vm14, %v2636_v12, %v8297_v27  ;;  %v852_v59 = vsel %vm7522_vm8, %v671_v15, %v851_v22  ;;  %v2352_v27 = vshll.u32 %v8366_v47, 16  ;;  %v688_v17 = vor.u32 %v686_v56, %v8377_v44  ;;  %v8424_v15 = vld [vmem:[#allocation2 + $0xa4] ss:$0 sps:$4 sm:$0x11]  }
  0xdb   : > { %1642 = vrot.lane.b32.xlu1 %v8276_v52, %s7330_s25  ;;  %v672_v52 = vrot.slane %v668_v38, 4  ;;  %v2702_v37 = vsel %vm2696_vm15, %v2669_v53, %v2025_v29  ;;  %853 = vst [vmem:[#allocation2 + $0xb4] sm:$0xf] %v852_v59  ;;  %v856_v29 = vsel %vm7540_vm9, %v681_v55, %v855_v58  ;;  %v2342_v56 = vrot.slane %v2340_v21, 1  ;;  %v327_v21 = vld [vmem:[%s7503_s22 + $0xf8] sm:$0xff] }
  0xdc   : > { %v2409_v18 = vpop.permute.xlu0 %2408  ;;  %v2735_v3 = vsel %vm10276_vm1, %v2702_v37, %v2137_v13  ;;  %857 = vst [vmem:[#allocation2 + $0xbc] sm:$0x1] %v856_v29  ;;  %v6508_v13 = vcombine.low %v1052_v42, %v8299_v8  ;;  %v1339_v12 = vshll.u32 %v8381_v5, 16  ;;  %v2354_v8 = vrot.slane %v2352_v27, 1  ;;  %v953_v27 = vld [vmem:[#allocation2 + $0x9c] sm:$0xf] }
  0xdd   : > { %v2411_v7 = vpop.permute.xlu1 %2410  ;;  %v680_v50 = vsel %vm7515_vm7, %v672_v52, %v679_v10  ;;  %v2768_v38 = vsel %vm2762_vm3, %v2735_v3, %v2409_v18  ;;  %v1336_v42 = vrot.slane %v1334_v32, 1  ;;  %v2515_v18 = vrot.slane %v8314_v51, 1  ;;  %v955_v29 = vld [vmem:[#allocation2 + $0xa8] sm:$0xf] }
  0xde   : > { %1912 = vrot.lane.b32.xlu0 %v1831_v16, %s7334_s29  ;;  %854 = vst.msk [vmem:[#allocation2 + $0xb8] sm:$0xf] %vm240_vm0, %v680_v50  ;;  %v2638_v16 = vsel %vm2630_vm13, %v2605_v11, %v8280_v39  ;;  %v1332_v11 = vshrl.u32 %v8359_v26, 16  ;;  %v2514_v53 = vrot.slane %v6508_v13, 1  ;;  %v6509_v10 = vcombine.low %v1053_v28, %v8321_v54  ;;  %v8444_v50 = vld [vmem:[#allocation2 + $0xa0] sm:$0xf] }
  0xdf   : > { %1914 = vrot.lane.b32.xlu1 %v1843_v62, %s7334_s29  ;;  %v859_v62 = vsel %vm7522_vm8, %v688_v17, %v858_v43  ;;  %v2671_v41 = vsel %vm10277_vm14, %v2638_v16, %v8295_v46  ;;  %v2338_v46 = vor.u32 %v2337_v45, %v2333_v14  ;;  %v1341_v55 = vrot.slane %v1339_v12, 1  ;;  %v8450_v17 = vld [vmem:[#allocation2 + $0xac] sm:$0xf] }
  0xe0   : > { %v2537_v58 = vpop.permute.xlu0 %2536  ;;  %860 = vst [vmem:[#allocation2 + $0xc0] sm:$0xf] %v859_v62  ;;  %v2704_v39 = vsel %vm2696_vm15, %v2671_v41, %v8316_v24  ;;  %v2350_v24 = vor.u32 %v2349_v20, %v2345_v30  ;;  %v1344_v37 = vshrl.u32 %v8396_v25, 16  ;;  %v926_v30 = vld [vmem:[#allocation2 + $0x9c] sm:$0xe]  ;;  %v1337_v45 = vor.u32 %v1336_v42, %v1332_v11 }
  0xe1   : > { %v8402_v22 = vpop.permute.xlu1 %1387  ;;  %v2801_v9 = vsel %vm2795_vm10, %v2768_v38, %v2537_v58  ;;  %v2737_v19 = vsel %vm10276_vm1, %v2704_v39, %v8350_v2  ;;  %v8432_v2 = vpack.c.bf16 %v327_v21, %v327_v21  ;;  %v1351_v54 = vshll.u32 %v8424_v15, 16 }
  0xe2   : > { %2040 = vrot.lane.b32.xlu0 %v8319_v61, %s7332_s27  ;;  %6897 = vmatprep.mubr.msk.bf16.mxu0 %vm2848_vm2, %v2801_v9  ;;  %v2770_v61 = vsel %vm2762_vm3, %v2737_v19, %v2411_v7  ;;  %v2343_v7 = vsel %vm10275_vm4, %v2338_v46, %v2342_v56  ;;  %v2355_v51 = vsel %vm10275_vm4, %v2350_v24, %v2354_v8  ;;  %v2517_v16 = vrot.slane %v6509_v10, 1  ;;  %v8479_v24 = vld [vmem:[#allocation2 + $0xb0] ss:$0 sps:$4 sm:$0x11]   ;;  %v989_v10 = vld [vmem:[#allocation2 + $0x9c] sm:$0xe] }
  0xe3   : > { %2042 = vrot.lane.b32.xlu1 %v8333_v36, %s7332_s27  ;;  %v1346_v36 = vshll.u32 %v8396_v25, 16  ;;  %v2516_v3 = vsel %vm1459_vm6, %v2514_v53, %v2515_v18  ;;  %v6415_v20 = vcombine.low %v926_v30, %v8375_v34  ;;  %v6414_v32 = vcombine.low %v925_v31, %v8337_v57  ;;  %v862_v53 = vld [vmem:[#allocation2 + $0xc8] sm:$0x1] }
  0xe4   : > { %v2539_v43 = vpop.permute.xlu0 %2538  ;;  %v2518_v38 = vrot.slane %v8366_v47, 1  ;;  %v8459_v58 = vcombine.low %v953_v27, %v8444_v50  ;;  %v691_v13 = vshrl.u32 %v8432_v2, 16  ;;  %v1342_v62 = vsel %vm10275_vm4, %v1337_v45, %v1341_v55  ;;  %v8471_v47 = vld [vmem:[#allocation2 + $0xa4] ss:$0 sps:$4 sm:$0x11]  }
  0xe5   : > { %v8428_v52 = vpop.permute.xlu1 %1389  ;;  %v2803_v14 = vsel %vm2795_vm10, %v2770_v61, %v2539_v43  ;;  %v1348_v59 = vrot.slane %v1346_v36, 1  ;;  %v1353_v9 = vrot.slane %v1351_v54, 1  ;;  %v8464_v34 = vcombine.low %v955_v29, %v8450_v17  ;;  %v990_v61 = vld [vmem:[#allocation2 + $0xa8] sm:$0xe] }
  0xe6   : > { %2152 = vrot.lane.b32.xlu0 %v8312_v40, %s7331_s26  ;;  %6898 = vmatmul.mubr.msk.bf16.gmra.mxu0 %vm2848_vm2, %v2803_v14  ;;  %v1499_v12 = vrot.slane %v6415_v20, 1  ;;  %v1500_v39 = vrot.slane %v8424_v15, 1  ;;  %v2519_v28 = vsel %vm1459_vm6, %v2517_v16, %v2518_v38  ;;  %v1847_v8 = vshll.u32 %v8459_v58, 16  ;;  %v8501_v20 = vld [vmem:[#allocation2 + $0xb8] sm:$0xf] }
  0xe7   : > { %2154 = vrot.lane.b32.xlu1 %v8344_v33, %s7331_s26  ;;  %v1349_v41 = vor.u32 %v1348_v59, %v1344_v37  ;;  %v693_v46 = vrot.slane %v691_v13, 7  ;;  %v1496_v21 = vrot.slane %v6414_v32, 1  ;;  %v1497_v19 = vrot.slane %v8381_v5, 1  ;;  %v1018_v5 = vld [vmem:[#allocation2 + $0xa8] sm:$0xf] }
  0xe8   : > { %v8448_v40 = vpop.permute.xlu0 %1516  ;;  %v1859_v42 = vshll.u32 %v8464_v34, 16  ;;  %v689_v43 = vrot.slane %v8377_v44, 4  ;;  %v694_v14 = vshll.u32 %v8432_v2, 16  ;;  %v1501_v18 = vsel %vm1459_vm6, %v1499_v12, %v1500_v39  ;;  %v8493_v37 = vld [vmem:[#allocation2 + $0xac] sm:$0xf] }
  0xe9   : > { %v8446_v33 = vpop.permute.xlu1 %1518  ;;  %v1354_v11 = vsel %vm10275_vm4, %v1349_v41, %v1353_v9  ;;  %v1852_v31 = vshll.u32 %v8471_v47, 16  ;;  %v1849_v55 = vrot.slane %v1847_v8, 1  ;;  %v698_v44 = vrot.slane %v693_v46, 4  ;;  %v8517_v39 = vld [vmem:[#allocation2 + $0xac] sm:$0xf] }
  0xea   : > { %2424 = vrot.lane.b32.xlu0 %v2343_v7, %s7335_s30  ;;  %v1845_v7 = vshrl.u32 %v8459_v58, 16  ;;  %v696_v30 = vor.u32 %v694_v14, %v693_v46  ;;  %v1498_v2 = vsel %vm1459_vm6, %v1496_v21, %v1497_v19  ;;  %v1861_v45 = vrot.slane %v1859_v42, 1  ;;  %v8521_v19 = vld [vmem:[#allocation2 + $0xb0] ss:$0 sps:$4 sm:$0x11]  }
  0xeb   : > { %2426 = vrot.lane.b32.xlu1 %v2355_v51, %s7335_s30  ;;  %v1857_v51 = vshrl.u32 %v8464_v34, 16  ;;  %v1864_v59 = vshll.u32 %v8479_v24, 16  ;;  %v6462_v29 = vcombine.low %v989_v10, %v8444_v50  ;;  %v863_v16 = vsel %vm7540_vm9, %v698_v44, %v862_v53 }
  0xec   : > { %v8468_v56 = vpop.permute.xlu0 %1628  ;;  %v697_v32 = vsel %vm7515_vm7, %v689_v43, %v696_v30  ;;  %v6463_v38 = vcombine.low %v990_v61, %v8450_v17  ;;  %v8509_v13 = vcombine.low %v1018_v5, %v8493_v37  ;;  %864 = vst [vmem:[#allocation2 + $0xc8] sm:$0x1] %v863_v16  ;;  %v1850_v50 = vor.u32 %v1849_v55, %v1845_v7  ;;  %v1054_v30 = vld [vmem:[#allocation2 + $0xa8] sm:$0xe] }
  0xed   : > { %v8466_v57 = vpop.permute.xlu1 %1630  ;;  %861 = vst.msk [vmem:[#allocation2 + $0xc4] sm:$0xf] %vm240_vm0, %v697_v32  ;;  %v1862_v41 = vor.u32 %v1861_v45, %v1857_v51  ;;  %v1866_v9 = vrot.slane %v1864_v59, 1  ;;  %v2008_v8 = vrot.slane %v6462_v29, 1  ;;  %v2009_v46 = vrot.slane %v8471_v47, 1 }
  0xee   : > { %2552 = vrot.lane.b32.xlu0 %v2516_v3, %s7333_s28  ;;  %v1020_v3 = vld [vmem:[#allocation2 + $0xb4] sm:$0xf]  ;;  %v2012_v21 = vrot.slane %v8479_v24, 1  ;;  %v2359_v42 = vshll.u32 %v8509_v13, 16  ;;  %v2574_v61 = vsel %vm2564_vm11, %v7718_v6, %v8402_v22  ;;  %v8533_v47 = vcombine.low %v893_v60, %v8517_v39 }
  0xef   : > { %1403 = vrot.lane.b32.xlu1 %v1342_v62, %s7329_s24  ;;  %v1854_v62 = vrot.slane %v1852_v31, 1  ;;  %v8515_v12 = vcombine.low %v1020_v3, %v8501_v20  ;;  %v895_v24 = vld [vmem:[#allocation2 + $0xb4] sm:$0xf]  ;;  %v2576_v14 = vsel %vm2564_vm11, %v7741_v63, %v8428_v52  ;;  %v2607_v53 = vsel %vm2597_vm12, %v2574_v61, %v8448_v40  ;;  %v8541_v22 = vld [vmem:[#allocation2 + $0xbc] ss:$0 sps:$4 sm:$0x11]  }
  0xf0   : > { %v8484_v36 = vpop.permute.xlu0 %1900  ;;  %v1867_v6 = vsel %vm10275_vm4, %v1862_v41, %v1866_v9  ;;  %v2010_v5 = vsel %vm1459_vm6, %v2008_v8, %v2009_v46  ;;  %v2357_v63 = vshrl.u32 %v8509_v13, 16  ;;  %v2361_v7 = vrot.slane %v2359_v42, 1 }
  0xf1   : > { %v8482_v15 = vpop.permute.xlu1 %1902  ;;  %v1855_v43 = vsel %vm10275_vm4, %v1850_v50, %v1854_v62  ;;  %v2364_v55 = vshll.u32 %v8521_v19, 16  ;;  %v2609_v44 = vsel %vm2597_vm12, %v2576_v14, %v8446_v33  ;;  %v1358_v51 = vshll.u32 %v8533_v47, 16 }
  0xf2   : > { %2554 = vrot.lane.b32.xlu0 %v2519_v28, %s7333_s28  ;;  %v2369_v59 = vshrl.u32 %v8515_v12, 16  ;;  %v2376_v33 = vshll.u32 %v8541_v22, 16  ;;  %v1356_v9 = vshrl.u32 %v8533_v47, 16  ;;  %vm3149_vm0 = vcmask 60416  }
  0xf3   : > { %1405 = vrot.lane.b32.xlu1 %v1354_v11, %s7329_s24  ;;  %v2011_v11 = vrot.slane %v6463_v38, 1  ;;  %v6510_v38 = vcombine.low %v1054_v30, %v8493_v37  ;;  %v2366_v41 = vrot.slane %v2364_v55, 1  ;;  %v8583_v37 = vld [vmem:[#allocation2 + $0xbc] ss:$0 sps:$4 sm:$0x11]   ;;  %vm3152_vm8 = vcmask 57344   ;;  %vm8940_vm9 = vmand %vm3149_vm0, %vm749_vm5 }
  0xf4   : > { %v2029_v27 = vpop.permute.xlu0 %2028  ;;  %v957_v55 = vld [vmem:[#allocation2 + $0xb4] sm:$0xf]  ;;  %v8609_v30 = vld [vmem:[#allocation2 + $0xb8] sm:$0xf]  ;;  %vm10288_vm5 = vsmask.f32 256 }
  0xf5   : > { %v8498_v54 = vpop.permute.xlu1 %2030  ;;  %v2013_v40 = vsel %vm1459_vm6, %v2011_v11, %v2012_v21  ;;  %v2378_v11 = vrot.slane %v2376_v33, 1  ;;  %v2520_v14 = vrot.slane %v6510_v38, 1  ;;  %v8628_v38 = vld [vmem:[#allocation2 + $0xbc] ss:$0 sps:$4 sm:$0x11]  }
  0xf6   : > { %1532 = vrot.lane.b32.xlu0 %v1498_v2, %s7328_s23  ;;  %v8559_v2 = vld [vmem:[#allocation2 + $0xb0] ss:$0 sps:$4 sm:$0x11]  }
  0xf7   : > { %1534 = vrot.lane.b32.xlu1 %v1501_v18, %s7328_s23  ;;  %v2640_v18 = vsel %vm2630_vm13, %v2607_v53, %v8468_v56  ;;  %v1363_v8 = vshll.u32 %v8559_v2, 16  ;;  %v2521_v53 = vrot.slane %v8521_v19, 1 }
  0xf8   : > { %v2141_v28 = vpop.permute.xlu0 %2140  ;;  %v2673_v52 = vsel %vm10277_vm14, %v2640_v18, %v8484_v36  ;;  %v1375_v18 = vshll.u32 %v8583_v37, 16 }
  0xf9   : > { %v2143_v17 = vpop.permute.xlu1 %2142  ;;  %v2706_v56 = vsel %vm2696_vm15, %v2673_v52, %v2029_v27  ;;  %v2642_v27 = vsel %vm2630_vm13, %v2609_v44, %v8466_v57  ;;  %v2362_v57 = vor.u32 %v2361_v7, %v2357_v63  ;;  %v959_v52 = vld [vmem:[#allocation2 + $0xc0] sm:$0xf]  ;;  %v8607_v7 = vld [vmem:[#allocation2 + $0xc4] sm:$0xf]  ;;  %v2522_v44 = vsel %vm1459_vm6, %v2520_v14, %v2521_v53  ;;  %v8768_v14 = vld [vmem:[#allocation2 + $0xd0] sm:$0xf] }
  0xfa   : > { %1644 = vrot.lane.b32.xlu0 %v8459_v58, %s7330_s25  ;;  %v8544_v58 = vld [vmem:[#allocation2 + $0xb8] sm:$0xf]  ;;  %v2739_v45 = vsel %vm10276_vm1, %v2706_v56, %v2141_v28  ;;  %v2675_v50 = vsel %vm10277_vm14, %v2642_v27, %v8482_v15  ;;  %v1360_v28 = vrot.slane %v1358_v51, 1  ;;  %v1377_v51 = vrot.slane %v1375_v18, 1 }
  0xfb   : > { %1646 = vrot.lane.b32.xlu1 %v8464_v34, %s7330_s25  ;;  %v2371_v34 = vshll.u32 %v8515_v12, 16  ;;  %v8563_v36 = vcombine.low %v895_v24, %v8544_v58  ;;  %v2708_v60 = vsel %vm2696_vm15, %v2675_v50, %v8498_v54  ;;  %v8619_v27 = vcombine.low %v959_v52, %v8607_v7 }
  0xfc   : > { %v2413_v10 = vpop.permute.xlu0 %2412  ;;  %v2741_v15 = vsel %vm10276_vm1, %v2708_v60, %v2143_v17  ;;  %v2367_v17 = vsel %vm10275_vm4, %v2362_v57, %v2366_v41  ;;  %v10285_v41 = vmov 0   ;;  %v8712_v57 = vld [vmem:[#allocation2 + $0xc8] ss:$0 sps:$4 sm:$0x11]  }
  0xfd   : > { %v2415_v31 = vpop.permute.xlu1 %2414  ;;  %v2373_v29 = vrot.slane %v2371_v34, 1  ;;  %v2772_v3 = vsel %vm2762_vm3, %v2739_v45, %v2413_v10  ;;  %v1370_v21 = vshll.u32 %v8563_v36, 16  ;;  %v1365_v34 = vrot.slane %v1363_v8, 1  ;;  %3157 = vst.msk [vmem:[#allocation3 + $0x18] sm:$0xf] %vm3149_vm0, %v10285_v41 }
  0xfe   : > { %1916 = vrot.lane.b32.xlu0 %v1855_v43, %s7334_s29  ;;  %v2774_v54 = vsel %vm2762_vm3, %v2741_v15, %v2415_v31  ;;  %v1055_v43 = vld [vmem:[#allocation2 + $0xb4] sm:$0xe]  ;;  %v927_v31 = vld [vmem:[#allocation2 + $0xa8] sm:$0xe]  ;;  %v2524_v45 = vrot.slane %v8541_v22, 1  ;;  %v1881_v53 = vshrl.u32 %v8619_v27, 16 }
  0xff   : > { %1918 = vrot.lane.b32.xlu1 %v1867_v6, %s7334_s29  ;;  %v2374_v46 = vor.u32 %v2373_v29, %v2369_v59  ;;  %v1361_v6 = vor.u32 %v1360_v28, %v1356_v9  ;;  %v1372_v19 = vrot.slane %v1370_v21, 1  ;;  %v6511_v63 = vcombine.low %v1055_v43, %v8501_v20  ;;  %3150 = vst.msk [vmem:[#allocation3] sm:$0xf] %vm3149_vm0, %v10285_v41 }
 0x100   : > { %v2541_v16 = vpop.permute.xlu0 %2540  ;;  %v6416_v56 = vcombine.low %v927_v31, %v8517_v39  ;;  %3151 = vst.msk [vmem:[#allocation3 + $0x4] sm:$0xf] %vm3149_vm0, %v10285_v41  ;;  %3154 = vst.msk [vmem:[#allocation3 + $0xc] sm:$0xf] %vm3149_vm0, %v10285_v41  ;;  %v1883_v28 = vshll.u32 %v8619_v27, 16  ;;  %v1876_v43 = vshll.u32 %v8628_v38, 16 }
 0x101   : > { %v8571_v32 = vpop.permute.xlu1 %1391  ;;  %v2805_v62 = vsel %vm2795_vm10, %v2772_v3, %v2541_v16  ;;  %v2379_v10 = vsel %vm10275_vm4, %v2374_v46, %v2378_v11  ;;  %v1366_v20 = vsel %vm10275_vm4, %v1361_v6, %v1365_v34  ;;  %v2523_v33 = vrot.slane %v6511_v63, 1  ;;  %3155 = vst.msk [vmem:[#allocation3 + $0x10] sm:$0xf] %vm3149_vm0, %v10285_v41  ;;  %3158 = vst.msk [vmem:[#allocation3 + $0x1c] sm:$0xf] %vm3149_vm0, %v10285_v41 }
 0x102   : > { %2044 = vrot.lane.b32.xlu0 %v2010_v5, %s7332_s27  ;;  %6901 = vmatprep.mubr.msk.bf16.mxu0 %vm2848_vm2, %v2805_v62  ;;  %v1368_v5 = vshrl.u32 %v8563_v36, 16  ;;  %v8622_v3 = vcombine.low %v957_v55, %v8609_v30  ;;  %v8635_v50 = vrot.slane %v6416_v56, 1  ;;  %v1503_v62 = vrot.slane %v8559_v2, 1  ;;  %3160 = vst.msk [vmem:[#allocation3 + $0x24] sm:$0xf] %vm3149_vm0, %v10285_v41 }
 0x103   : > { %2046 = vrot.lane.b32.xlu1 %v2013_v40, %s7332_s27  ;;  %3161 = vst.msk [vmem:[#allocation3 + $0x28] sm:$0xf] %vm3149_vm0, %v10285_v41  ;;  %3163 = vst.msk [vmem:[#allocation3 + $0x30] sm:$0xf] %vm3149_vm0, %v10285_v41  ;;  %v2525_v60 = vsel %vm1459_vm6, %v2523_v33, %v2524_v45  ;;  %v1024_v11 = vld [vmem:[#allocation2 + $0xcc] sm:$0xf]  ;;  %v2578_v33 = vsel %vm2564_vm11, %v7830_v35, %v8571_v32 }
 0x104   : > { %v2543_v61 = vpop.permute.xlu0 %2542  ;;  %v1373_v29 = vor.u32 %v1372_v19, %v1368_v5  ;;  %3164 = vst.msk [vmem:[#allocation3 + $0x34] sm:$0xf] %vm3149_vm0, %v10285_v41  ;;  %3166 = vst.msk [vmem:[#allocation3 + $0x3c] sm:$0xf] %vm3149_vm0, %v10285_v41  ;;  %v1871_v8 = vshll.u32 %v8622_v3, 16  ;;  %v8776_v19 = vcombine.low %v1024_v11, %v8768_v14  ;;  %v1878_v63 = vrot.slane %v1876_v43, 1 }
 0x105   : > { %v8589_v42 = vpop.permute.xlu1 %1393  ;;  %v2807_v24 = vsel %vm2795_vm10, %v2774_v54, %v2543_v61  ;;  %3167 = vst.msk [vmem:[#allocation3 + $0x40] sm:$0xf] %vm3149_vm0, %v10285_v41  ;;  %3169 = vst.msk [vmem:[#allocation3 + $0x48] sm:$0xf] %vm3149_vm0, %v10285_v41  ;;  %v1504_v54 = vsel %vm1459_vm6, %v8635_v50, %v1503_v62  ;;  %v1869_v61 = vshrl.u32 %v8622_v3, 16 }
 0x106   : > { %2156 = vrot.lane.b32.xlu0 %v8509_v13, %s7331_s26  ;;  %6902 = vmatmul.mubr.msk.bf16.gmra.mxu0 %vm2848_vm2, %v2807_v24  ;;  %3170 = vst.msk [vmem:[#allocation3 + $0x4c] sm:$0xf] %vm3149_vm0, %v10285_v41  ;;  %3172 = vst.msk [vmem:[#allocation3 + $0x54] sm:$0xf] %vm3149_vm0, %v10285_v41  ;;  %v1378_v9 = vsel %vm10275_vm4, %v1373_v29, %v1377_v51  ;;  %v991_v24 = vld [vmem:[#allocation2 + $0xb4] sm:$0xe]  ;;  %v2580_v32 = vsel %vm2564_vm11, %v7868_v4, %v8589_v42 }
 0x107   : > { %2158 = vrot.lane.b32.xlu1 %v8515_v12, %s7331_s26  ;;  %v928_v12 = vld [vmem:[#allocation2 + $0xb4] sm:$0xe]  ;;  %3173 = vst.msk [vmem:[#allocation3 + $0x58] sm:$0xf] %vm3149_vm0, %v10285_v41  ;;  %3175 = vst.msk [vmem:[#allocation3 + $0x60] sm:$0xf] %vm3149_vm0, %v10285_v41  ;;  %v6464_v5 = vcombine.low %v991_v24, %v8609_v30 }
 0x108   : > { %v8605_v13 = vpop.permute.xlu0 %1520  ;;  %v6417_v59 = vcombine.low %v928_v12, %v8544_v58  ;;  %v1506_v58 = vrot.slane %v8583_v37, 1  ;;  %3176 = vst.msk [vmem:[#allocation3 + $0x64] sm:$0xf] %vm3149_vm0, %v10285_v41  ;;  %3178 = vst.msk [vmem:[#allocation3 + $0x6c] sm:$0xf] %vm3149_vm0, %v10285_v41  ;;  %v1888_v37 = vshll.u32 %v8712_v57, 16 }
 0x109   : > { %v8603_v40 = vpop.permute.xlu1 %1522  ;;  %3179 = vst.msk [vmem:[#allocation3 + $0x70] sm:$0xf] %vm3149_vm0, %v10285_v41  ;;  %3181 = vst.msk [vmem:[#allocation3 + $0x78] sm:$0xf] %vm3149_vm0, %v10285_v41  ;;  %v1873_v6 = vrot.slane %v1871_v8, 1  ;;  %v2014_v45 = vrot.slane %v6464_v5, 1 }
 0x10a   : > { %2428 = vrot.lane.b32.xlu0 %v2367_v17, %s7335_s30  ;;  %v8632_v22 = vrot.slane %v6417_v59, 1  ;;  %3182 = vst.msk [vmem:[#allocation3 + $0x7c] sm:$0xf] %vm3149_vm0, %v10285_v41  ;;  %3184 = vst.msk [vmem:[#allocation3 + $0x84] sm:$0xf] %vm3149_vm0, %v10285_v41  ;;  %v1885_v17 = vrot.slane %v1883_v28, 1 }
 0x10b   : > { %2430 = vrot.lane.b32.xlu1 %v2379_v10, %s7335_s30  ;;  %3185 = vst.msk [vmem:[#allocation3 + $0x88] sm:$0xf] %vm3149_vm0, %v10285_v41  ;;  %3187 = vst.msk [vmem:[#allocation3 + $0x90] sm:$0xf] %vm3149_vm0, %v10285_v41  ;;  %v992_v34 = vld [vmem:[#allocation2 + $0xc0] sm:$0xe] }
 0x10c   : > { %v8626_v16 = vpop.permute.xlu0 %1632  ;;  %3188 = vst.msk [vmem:[#allocation3 + $0x94] sm:$0xf] %vm3149_vm0, %v10285_v41  ;;  %3190 = vst.msk [vmem:[#allocation3 + $0x9c] sm:$0xf] %vm3149_vm0, %v10285_v41  ;;  %v1507_v21 = vsel %vm1459_vm6, %v8632_v22, %v1506_v58  ;;  %v1022_v2 = vld [vmem:[#allocation2 + $0xc0] sm:$0xf]  ;;  %v6465_v12 = vcombine.low %v992_v34, %v8607_v7  ;;  %v1886_v52 = vor.u32 %v1885_v17, %v1881_v53 }
 0x10d   : > { %v8624_v39 = vpop.permute.xlu1 %1634  ;;  %3191 = vst.msk [vmem:[#allocation3 + $0xa0] sm:$0xf] %vm3149_vm0, %v10285_v41  ;;  %3193 = vst.msk [vmem:[#allocation3 + $0xa8] sm:$0xf] %vm3149_vm0, %v10285_v41  ;;  %v8772_v10 = vld [vmem:[#allocation2 + $0xc4] sm:$0xf] }
 0x10e   : > { %2556 = vrot.lane.b32.xlu0 %v2522_v44, %s7333_s28  ;;  %3194 = vst.msk [vmem:[#allocation3 + $0xac] sm:$0xf] %vm3149_vm0, %v10285_v41  ;;  %3196 = vst.msk [vmem:[#allocation3 + $0xb4] sm:$0xf] %vm3149_vm0, %v10285_v41  ;;  %v1890_v55 = vrot.slane %v1888_v37, 1  ;;  %v1874_v44 = vor.u32 %v1873_v6, %v1869_v61  ;;  %v8782_v56 = vcombine.low %v1022_v2, %v8772_v10  ;;  %v2015_v30 = vrot.slane %v8628_v38, 1 }
 0x10f   : > { %1407 = vrot.lane.b32.xlu1 %v1366_v20, %s7329_s24  ;;  %3197 = vst.msk [vmem:[#allocation3 + $0xb8] sm:$0xf] %vm3149_vm0, %v10285_v41  ;;  %3199 = vst.msk [vmem:[#allocation3 + $0xc0] sm:$0xf] %vm3149_vm0, %v10285_v41  ;;  %v2395_v29 = vshll.u32 %v8776_v19, 16  ;;  %v2017_v7 = vrot.slane %v6465_v12, 1  ;;  %v2611_v38 = vsel %vm2597_vm12, %v2578_v33, %v8605_v13 }
 0x110   : > { %3200 = vst.msk [vmem:[#allocation3 + $0xc4] sm:$0xf] %vm3149_vm0, %v10285_v41  ;;  %3202 = vst.msk [vmem:[#allocation3 + $0xcc] sm:$0xf] %vm3149_vm0, %v10285_v41  ;;  %v8718_v46 = vpop.permute.xlu0 %1904  ;;  %v2018_v22 = vrot.slane %v8712_v57, 1  ;;  %v1891_v50 = vsel %vm10275_vm4, %v1886_v52, %v1890_v55  ;;  %v1879_v62 = vsel %vm10275_vm4, %v1874_v44, %v1878_v63  ;;  %v2383_v35 = vshll.u32 %v8782_v56, 16 }
 0x111   : > { %3203 = vst.msk [vmem:[#allocation3 + $0xd0] sm:$0xf] %vm3149_vm0, %v10285_v41  ;;  %v8716_v15 = vpop.permute.xlu1 %1906  ;;  %v8785_v59 = vld [vmem:[#allocation2 + $0xd4] ss:$0 sps:$4 sm:$0x11]   ;;  %v2016_v28 = vsel %vm1459_vm6, %v2014_v45, %v2015_v30  ;;  %v2397_v8 = vrot.slane %v2395_v29, 1 }
 0x112   : > { %3159 = vst.msk [vmem:[#allocation3 + $0x20] sm:$0x1] %vm3152_vm8, %v10285_v41  ;;  %3153 = vst.msk [vmem:[#allocation3 + $0x8] sm:$0x1] %vm3152_vm8, %v10285_v41  ;;  %2558 = vrot.lane.b32.xlu0 %v2525_v60, %s7333_s28  ;;  %v3738_v60 = vld [vmem:[#allocation3] sm:$0xf]  ;;  %v2019_v42 = vsel %vm1459_vm6, %v2017_v7, %v2018_v22 }
 0x113   : > { %3156 = vst.msk [vmem:[#allocation3 + $0x14] sm:$0x1] %vm3152_vm8, %v10285_v41  ;;  %3162 = vst.msk [vmem:[#allocation3 + $0x2c] sm:$0x1] %vm3152_vm8, %v10285_v41  ;;  %1409 = vrot.lane.b32.xlu1 %v1378_v9, %s7329_s24  ;;  %v2393_v9 = vshrl.u32 %v8776_v19, 16  ;;  %v2400_v11 = vshll.u32 %v8785_v59, 16 }
 0x114   : > { %3165 = vst.msk [vmem:[#allocation3 + $0x38] sm:$0x1] %vm3152_vm8, %v10285_v41  ;;  %3168 = vst.msk [vmem:[#allocation3 + $0x44] sm:$0x1] %vm3152_vm8, %v10285_v41  ;;  %v2033_v31 = vpop.permute.xlu0 %2032  ;;  %v8809_v57 = vld [vmem:[#allocation3 + $0x4] sm:$0xf] }
 0x115   : > { %3171 = vst.msk [vmem:[#allocation3 + $0x50] sm:$0x1] %vm3152_vm8, %v10285_v41  ;;  %3174 = vst.msk [vmem:[#allocation3 + $0x5c] sm:$0x1] %vm3152_vm8, %v10285_v41  ;;  %v2035_v18 = vpop.permute.xlu1 %2034  ;;  %v2385_v43 = vrot.slane %v2383_v35, 1  ;;  %v8825_v53 = vcombine.low %v3738_v60, %v8809_v57  ;;  %v2398_v63 = vor.u32 %v2397_v8, %v2393_v9  ;;  %v2402_v12 = vrot.slane %v2400_v11, 1 }
 0x116   : > { %3177 = vst.msk [vmem:[#allocation3 + $0x68] sm:$0x1] %vm3152_vm8, %v10285_v41  ;;  %3180 = vst.msk [vmem:[#allocation3 + $0x74] sm:$0x1] %vm3152_vm8, %v10285_v41  ;;  %1536 = vrot.lane.b32.xlu0 %v1504_v54, %s7328_s23  ;;  %v1057_v54 = vld [vmem:[#allocation2 + $0xcc] sm:$0xe] }
 0x117   : > { %3183 = vst.msk [vmem:[#allocation3 + $0x80] sm:$0x1] %vm3152_vm8, %v10285_v41  ;;  %3186 = vst.msk [vmem:[#allocation3 + $0x8c] sm:$0x1] %vm3152_vm8, %v10285_v41  ;;  %1538 = vrot.lane.b32.xlu1 %v1507_v21, %s7328_s23  ;;  %v1056_v24 = vld [vmem:[#allocation2 + $0xc0] sm:$0xe] }
 0x118   : > { %3189 = vst.msk [vmem:[#allocation3 + $0x98] sm:$0x1] %vm3152_vm8, %v10285_v41  ;;  %3192 = vst.msk [vmem:[#allocation3 + $0xa4] sm:$0x1] %vm3152_vm8, %v10285_v41  ;;  %v2145_v51 = vpop.permute.xlu0 %2144 }
 0x119   : > { %3195 = vst.msk [vmem:[#allocation3 + $0xb0] sm:$0x1] %vm3152_vm8, %v10285_v41  ;;  %3198 = vst.msk [vmem:[#allocation3 + $0xbc] sm:$0x1] %vm3152_vm8, %v10285_v41  ;;  %v2147_v20 = vpop.permute.xlu1 %2146 }
 0x11a   : > { %3201 = vst.msk [vmem:[#allocation3 + $0xc8] sm:$0x1] %vm3152_vm8, %v10285_v41  ;;  %3204 = vst.msk [vmem:[#allocation3 + $0xd4] sm:$0x1] %vm3152_vm8, %v10285_v41  ;;  %1648 = vrot.lane.b32.xlu0 %v8622_v3, %s7330_s25 }
 0x11b   : > { %1650 = vrot.lane.b32.xlu1 %v8619_v27, %s7330_s25  ;;  %v8796_v58 = vld [vmem:[#allocation2 + $0xc8] ss:$0 sps:$4 sm:$0x11]   ;;  %v2644_v27 = vsel %vm2630_vm13, %v2611_v38, %v8626_v16  ;;  %v2381_v16 = vshrl.u32 %v8782_v56, 16  ;;  %v4060_v38 = vshrl.u32 %v8825_v53, 16 }
 0x11c   : > { %v2417_v41 = vpop.permute.xlu0 %2416  ;;  %v2677_v13 = vsel %vm10277_vm14, %v2644_v27, %v8718_v46  ;;  %v2388_v21 = vshll.u32 %v8796_v58, 16  ;;  %v2613_v46 = vsel %vm2597_vm12, %v2580_v32, %v8603_v40  ;;  %v6513_v40 = vcombine.low %v1057_v54, %v8768_v14  ;;  %v7153_v44 = vld [vmem:[#allocation3 + $0x8] ss:$0 sps:$4 sm:$0x11]   ;;  %v3786_v32 = vld [vmem:[#allocation3] sm:$0xe] }
 0x11d   : > { %v2419_v3 = vpop.permute.xlu1 %2418  ;;  %v2710_v4 = vsel %vm2696_vm15, %v2677_v13, %v2033_v31  ;;  %v2646_v17 = vsel %vm2630_vm13, %v2613_v46, %v8624_v39  ;;  %v6512_v39 = vcombine.low %v1056_v24, %v8772_v10  ;;  %v2386_v55 = vor.u32 %v2385_v43, %v2381_v16 }
 0x11e   : > { %1920 = vrot.lane.b32.xlu0 %v1879_v62, %s7334_s29  ;;  %v2743_v61 = vsel %vm10276_vm1, %v2710_v4, %v2145_v51  ;;  %v2679_v31 = vsel %vm10277_vm14, %v2646_v17, %v8716_v15  ;;  %v2390_v15 = vrot.slane %v2388_v21, 1  ;;  %v4062_v51 = vshll.u32 %v8825_v53, 16 }
 0x11f   : > { %1922 = vrot.lane.b32.xlu1 %v1891_v50, %s7334_s29  ;;  %v2776_v37 = vsel %vm2762_vm3, %v2743_v61, %v2417_v41  ;;  %v2712_v5 = vsel %vm2696_vm15, %v2679_v31, %v2035_v18  ;;  %v2529_v29 = vrot.slane %v6513_v40, 1  ;;  %v2403_v10 = vsel %vm10275_vm4, %v2398_v63, %v2402_v12 }
 0x120   : > { %v2545_v34 = vpop.permute.xlu0 %2544  ;;  %v2745_v52 = vsel %vm10276_vm1, %v2712_v5, %v2147_v20  ;;  %v2530_v20 = vrot.slane %v8785_v59, 1  ;;  %v2526_v33 = vrot.slane %v6512_v39, 1  ;;  %v2527_v7 = vrot.slane %v8796_v58, 1 }
 0x121   : > { %v1396_v6 = vpop.permute.xlu1 %1395  ;;  %v2809_v2 = vsel %vm2795_vm10, %v2776_v37, %v2545_v34  ;;  %v2778_v14 = vsel %vm2762_vm3, %v2745_v52, %v2419_v3  ;;  %v2391_v22 = vsel %vm10275_vm4, %v2386_v55, %v2390_v15  ;;  %v4064_v50 = vrot.slane %v4062_v51, 1 }
 0x122   : > { %2048 = vrot.lane.b32.xlu0 %v2016_v28, %s7332_s27  ;;  %6905 = vmatprep.mubr.msk.bf16.mxu0 %vm2848_vm2, %v2809_v2  ;;  %v4067_v62 = vshll.u32 %v7153_v44, 16  ;;  %v2528_v59 = vsel %vm1459_vm6, %v2526_v33, %v2527_v7  ;;  %v6598_v3 = vcombine.low %v3786_v32, %v8809_v57  ;;  %v4332_v28 = vrot.slane %v7153_v44, 1 }
 0x123   : > { %2050 = vrot.lane.b32.xlu1 %v2019_v42, %s7332_s27  ;;  %v4065_v58 = vor.u32 %v4064_v50, %v4060_v38  ;;  %v2582_v54 = vsel %vm2564_vm11, %v7970_v1, %v1396_v6 }
 0x124   : > { %v2547_v45 = vpop.permute.xlu0 %2546  ;;  %v4069_v27 = vrot.slane %v4067_v62, 1  ;;  %v4331_v13 = vrot.slane %v6598_v3, 1 }
 0x125   : > { %v1398_v18 = vpop.permute.xlu1 %1397  ;;  %v2811_v30 = vsel %vm2795_vm10, %v2778_v14, %v2547_v45 }
 0x126   : > { %2160 = vrot.lane.b32.xlu0 %v8782_v56, %s7331_s26  ;;  %6906 = vmatmul.mubr.msk.bf16.gmra.mxu0 %vm2848_vm2, %v2811_v30  ;;  %v2531_v56 = vsel %vm1459_vm6, %v2529_v29, %v2530_v20  ;;  %v4070_v60 = vsel %vm10275_vm4, %v4065_v58, %v4069_v27  ;;  %v4333_v4 = vsel %vm1459_vm6, %v4331_v13, %v4332_v28  ;;  %vm8951_vm4 = vmand %vm3152_vm8, %vm10288_vm5 }
 0x127   : > { %2162 = vrot.lane.b32.xlu1 %v8776_v19, %s7331_s26  ;;  %v2584_v61 = vsel %vm2564_vm11, %v8004_v49, %v1398_v18 }
 0x128   : > { %v1525_v19 = vpop.permute.xlu0 %1524 }
 0x129   : > { %v1527_v35 = vpop.permute.xlu1 %1526  ;;  %v2615_v46 = vsel %vm2597_vm12, %v2582_v54, %v1525_v19 }
 0x12a   : > { %2432 = vrot.lane.b32.xlu0 %v2391_v22, %s7335_s30  ;;  %v2617_v31 = vsel %vm2597_vm12, %v2584_v61, %v1527_v35 }
 0x12b   : > { %2434 = vrot.lane.b32.xlu1 %v2403_v10, %s7335_s30 }
 0x12c   : > { %v1637_v9 = vpop.permute.xlu0 %1636 }
 0x12d   : > { %v1639_v41 = vpop.permute.xlu1 %1638  ;;  %v2648_v43 = vsel %vm2630_vm13, %v2615_v46, %v1637_v9 }
 0x12e   : > { %2560 = vrot.lane.b32.xlu0 %v2528_v59, %s7333_s28  ;;  %v2650_v40 = vsel %vm2630_vm13, %v2617_v31, %v1639_v41 }
 0x12f   : > { %2562 = vrot.lane.b32.xlu1 %v2531_v56, %s7333_s28 }
 0x130   : > { %v1909_v11 = vpop.permute.xlu0 %1908 }
 0x131   : > { %v1911_v8 = vpop.permute.xlu1 %1910  ;;  %v2681_v37 = vsel %vm10277_vm14, %v2648_v43, %v1909_v11 }
 0x132   : > { %4251 = vrot.lane.b32.xlu0 %v4070_v60, %s7328_s23  ;;  %v2683_v49 = vsel %vm10277_vm14, %v2650_v40, %v1911_v8 }
 0x134   : > { %v2037_v16 = vpop.permute.xlu0 %2036 }
 0x135   : > { %v2039_v42 = vpop.permute.xlu1 %2038  ;;  %v2714_v34 = vsel %vm2696_vm15, %v2681_v37, %v2037_v16 }
 0x136   : > { %4379 = vrot.lane.b32.xlu0 %v4333_v4, %s7334_s29  ;;  %v2716_v12 = vsel %vm2696_vm15, %v2683_v49, %v2039_v42 }
 0x138   : > { %v2149_v21 = vpop.permute.xlu0 %2148 }
 0x139   : > { %v2151_v57 = vpop.permute.xlu1 %2150  ;;  %v2747_v2 = vsel %vm10276_vm1, %v2714_v34, %v2149_v21 }
 0x13a   : > { %v2749_v39 = vsel %vm10276_vm1, %v2716_v12, %v2151_v57 }
 0x13c   : > { %v2421_v17 = vpop.permute.xlu0 %2420 }
 0x13d   : > { %v2423_v24 = vpop.permute.xlu1 %2422  ;;  %v2780_v1 = vsel %vm2762_vm3, %v2747_v2, %v2421_v17 }
 0x13e   : > { %v2782_v52 = vsel %vm2762_vm3, %v2749_v39, %v2423_v24 }
 0x140   : > { %v2549_v5 = vpop.permute.xlu0 %2548 }
 0x141   : > { %v1400_v6 = vpop.permute.xlu1 %1399  ;;  %v2813_v63 = vsel %vm2795_vm10, %v2780_v1, %v2549_v5 }
 0x142   : > { %6909 = vmatprep.mubr.msk.bf16.mxu0 %vm2848_vm2, %v2813_v63  ;;  %v2586_v22 = vsel %vm2564_vm11, %v8141_v48, %v1400_v6 }
 0x144   : > { %v2551_v15 = vpop.permute.xlu0 %2550 }
 0x145   : > { %v1402_v55 = vpop.permute.xlu1 %1401  ;;  %v2815_v44 = vsel %vm2795_vm10, %v2782_v52, %v2551_v15 }
 0x146   : > { %6910 = vmatmul.mubr.msk.bf16.gmra.mxu0 %vm2848_vm2, %v2815_v44  ;;  %v2588_v50 = vsel %vm2564_vm11, %v8194_v0, %v1402_v55 }
 0x148   : > { %v1529_v14 = vpop.permute.xlu0 %1528 }
 0x149   : > { %v1531_v51 = vpop.permute.xlu1 %1530  ;;  %v2619_v38 = vsel %vm2597_vm12, %v2586_v22, %v1529_v14 }
 0x14a   : > { %v2621_v59 = vsel %vm2597_vm12, %v2588_v50, %v1531_v51 }
 0x14c   : > { %v1641_v45 = vpop.permute.xlu0 %1640 }
 0x14d   : > { %v1643_v18 = vpop.permute.xlu1 %1642  ;;  %v2652_v62 = vsel %vm2630_vm13, %v2619_v38, %v1641_v45 }
 0x14e   : > { %v2654_v27 = vsel %vm2630_vm13, %v2621_v59, %v1643_v18 }
 0x150   : > { %v1913_v29 = vpop.permute.xlu0 %1912 }
 0x151   : > { %v1915_v30 = vpop.permute.xlu1 %1914  ;;  %v2685_v32 = vsel %vm10277_vm14, %v2652_v62, %v1913_v29 }
 0x152   : > { %v2687_v0 = vsel %vm10277_vm14, %v2654_v27, %v1915_v30  ;;  %v8929_v30 = vld [vmem:[%s10270_s3] ss:$0 sm:$0xff] }
 0x154   : > { %v2041_v20 = vpop.permute.xlu0 %2040 }
 0x155   : > { %v2043_v10 = vpop.permute.xlu1 %2042  ;;  %v2718_v56 = vsel %vm2696_vm15, %v2685_v32, %v2041_v20 }
 0x156   : > { %v2720_v60 = vsel %vm2696_vm15, %v2687_v0, %v2043_v10 }
 0x158   : > { %v2153_v7 = vpop.permute.xlu0 %2152 }
 0x159   : > { %v2155_v33 = vpop.permute.xlu1 %2154  ;;  %v2751_v58 = vsel %vm10276_vm1, %v2718_v56, %v2153_v7 }
 0x15a   : > { %v2753_v13 = vsel %vm10276_vm1, %v2720_v60, %v2155_v33 }
 0x15c   : > { %v2425_v19 = vpop.permute.xlu0 %2424 }
 0x15d   : > { %v2427_v35 = vpop.permute.xlu1 %2426  ;;  %v2784_v48 = vsel %vm2762_vm3, %v2751_v58, %v2425_v19 }
 0x15e   : > { %v2786_v28 = vsel %vm2762_vm3, %v2753_v13, %v2427_v35 }
 0x160   : > { %v2553_v41 = vpop.permute.xlu0 %2552 }
 0x161   : > { %v1404_v3 = vpop.permute.xlu1 %1403  ;;  %v2817_v9 = vsel %vm2795_vm10, %v2784_v48, %v2553_v41 }
 0x162   : > { %6913 = vmatprep.mubr.msk.bf16.mxu0 %vm2848_vm2, %v2817_v9  ;;  %v2590_v37 = vsel %vm2564_vm11, %v8359_v26, %v1404_v3 }
 0x164   : > { %v2555_v11 = vpop.permute.xlu0 %2554 }
 0x165   : > { %v1406_v8 = vpop.permute.xlu1 %1405  ;;  %v2819_v4 = vsel %vm2795_vm10, %v2786_v28, %v2555_v11 }
 0x166   : > { %6914 = vmatmul.mubr.msk.bf16.gmra.mxu0 %vm2848_vm2, %v2819_v4  ;;  %v2592_v31 = vsel %vm2564_vm11, %v8396_v25, %v1406_v8 }
 0x168   : > { %v1533_v16 = vpop.permute.xlu0 %1532 }
 0x169   : > { %v1535_v42 = vpop.permute.xlu1 %1534  ;;  %v2623_v34 = vsel %vm2597_vm12, %v2590_v37, %v1533_v16  ;;  %v3624_v37 = vld [vmem:[#allocation3 + $0xc] sm:$0xf] }
 0x16a   : > { %v2625_v49 = vsel %vm2597_vm12, %v2592_v31, %v1535_v42 }
 0x16c   : > { %v1645_v21 = vpop.permute.xlu0 %1644 }
 0x16d   : > { %v1647_v57 = vpop.permute.xlu1 %1646  ;;  %v2656_v2 = vsel %vm2630_vm13, %v2623_v34, %v1645_v21 }
 0x16e   : > { %v2658_v12 = vsel %vm2630_vm13, %v2625_v49, %v1647_v57  ;;  %v3633_v57 = vld [vmem:[#allocation3 + $0x18] sm:$0xf]  ;;  %v3637_v49 = vld [vmem:[#allocation3 + $0x20] sm:$0x1] }
 0x170   : > { %v1917_v46 = vpop.permute.xlu0 %1916 }
 0x171   : > { %v1919_v54 = vpop.permute.xlu1 %1918  ;;  %v2689_v6 = vsel %vm10277_vm14, %v2656_v2, %v1917_v46 }
 0x172   : > { %v2691_v25 = vsel %vm10277_vm14, %v2658_v12, %v1919_v54 }
 0x174   : > { %v2045_v43 = vpop.permute.xlu0 %2044 }
 0x175   : > { %v2047_v61 = vpop.permute.xlu1 %2046  ;;  %v2722_v5 = vsel %vm2696_vm15, %v2689_v6, %v2045_v43 }
 0x176   : > { %v2724_v15 = vsel %vm2696_vm15, %v2691_v25, %v2047_v61 }
 0x178   : > { %v2157_v17 = vpop.permute.xlu0 %2156 }
 0x179   : > { %v2159_v24 = vpop.permute.xlu1 %2158  ;;  %v2755_v63 = vsel %vm10276_vm1, %v2722_v5, %v2157_v17 }
 0x17a   : > { %v2757_v44 = vsel %vm10276_vm1, %v2724_v15, %v2159_v24 }
 0x17c   : > { %v2429_v1 = vpop.permute.xlu0 %2428 }
 0x17d   : > { %v2431_v40 = vpop.permute.xlu1 %2430  ;;  %v2788_v26 = vsel %vm2762_vm3, %v2755_v63, %v2429_v1 }
 0x17e   : > { %v2790_v51 = vsel %vm2762_vm3, %v2757_v44, %v2431_v40 }
 0x180   : > { %v2557_v52 = vpop.permute.xlu0 %2556 }
 0x181   : > { %v8916_v39 = vpop.permute.xlu1 %1407  ;;  %v2821_v55 = vsel %vm2795_vm10, %v2788_v26, %v2557_v52 }
 0x182   : > { %6917 = vmatprep.mubr.msk.bf16.mxu0 %vm2848_vm2, %v2821_v55 }
 0x184   : > { %v2559_v18 = vpop.permute.xlu0 %2558 }
 0x185   : > { %v1410_v14 = vpop.permute.xlu1 %1409  ;;  %v2823_v45 = vsel %vm2795_vm10, %v2790_v51, %v2559_v18 }
 0x186   : > { %6918 = vmatmul.mubr.msk.bf16.gmra.mxu0 %vm2848_vm2, %v2823_v45  ;;  %v2596_v6 = vsel %vm2564_vm11, %v8563_v36, %v1410_v14  ;;  %v2594_v36 = vsel %vm2564_vm11, %v8533_v47, %v8916_v39 }
 0x188   : > { %v6895_v10 = vpop.f32.mrf.mxu0  ;;  %v1537_v33 = vpop.permute.xlu0 %1536 }
 0x189   : > { %v1539_v29 = vpop.permute.xlu1 %1538  ;;  %v3055_v20 = vsub.f32 %v6895_v10, %v8929_v30  ;;  %v2627_v18 = vsel %vm2597_vm12, %v2594_v36, %v1537_v33 }
 0x18a   : > { %v2919_v7 = vpop.f32.mrf.mxu0  ;;  %v2629_v14 = vsel %vm2597_vm12, %v2596_v6, %v1539_v29 }
 0x18b   : > { %v3087_v22 = vmax.f32 %v3055_v20, 0.0  ;;  %v3053_v38 = vsub.f32 %v2919_v7, %v8929_v30  ;;  %v3630_v20 = vld [vmem:[#allocation3 + $0x14] sm:$0x1] }
 0x18c   : > { %v6896_v62 = vpop.f32.mrf.mxu0  ;;  %v1649_v56 = vpop.permute.xlu0 %1648 }
 0x18d   : > { %v1651_v50 = vpop.permute.xlu1 %1650  ;;  %v3119_v35 = vadd.f32 %v8929_v30, %v3087_v22  ;;  %v3085_v19 = vmax.f32 %v3053_v38, 0.0  ;;  %v3056_v32 = vsub.f32 %v6896_v62, %v8929_v30  ;;  %v2660_v29 = vsel %vm2630_vm13, %v2627_v18, %v1649_v56 }
 0x18e   : > { %v2922_v59 = vpop.f32.mrf.mxu0  ;;  %v2662_v22 = vsel %vm2630_vm13, %v2629_v14, %v1651_v50 }
 0x18f   : > { %v6817_v58 = vpack.c.bf16 %v3119_v35, %v3119_v35  ;;  %v3117_v27 = vadd.f32 %v8929_v30, %v3085_v19  ;;  %v3088_v48 = vmax.f32 %v3056_v32, 0.0  ;;  %v3054_v3 = vsub.f32 %v2922_v59, %v8929_v30 }
 0x190   : > { %v1921_v13 = vpop.permute.xlu0 %1920 }
 0x191   : > { %v1923_v41 = vpop.permute.xlu1 %1922  ;;  %v3319_v0 = vshrl.u32 %v6817_v58, 16  ;;  %v6815_v9 = vpack.c.bf16 %v3117_v27, %v3117_v27  ;;  %v3120_v60 = vadd.f32 %v8929_v30, %v3088_v48  ;;  %v3086_v28 = vmax.f32 %v3054_v3, 0.0 }
 0x192   : > { %v3322_v11 = vshll.u32 %v6817_v58, 16  ;;  %v2695_v33 = vsel %vm10277_vm14, %v2662_v22, %v1923_v41  ;;  %v2693_v32 = vsel %vm10277_vm14, %v2660_v29, %v1921_v13 }
 0x193   : > { %v3321_v8 = vrot.slane %v3319_v0, 7  ;;  %v3302_v4 = vshrl.u32 %v6815_v9, 16  ;;  %v6818_v42 = vpack.c.bf16 %v3120_v60, %v3120_v60  ;;  %v3118_v21 = vadd.f32 %v8929_v30, %v3086_v28 }
 0x194   : > { %v3305_v43 = vshll.u32 %v6815_v9, 16  ;;  %v2049_v17 = vpop.permute.xlu0 %2048 }
 0x195   : > { %v2051_v54 = vpop.permute.xlu1 %2050  ;;  %v3324_v46 = vor.u32 %v3322_v11, %v3321_v8  ;;  %v3304_v61 = vrot.slane %v3302_v4, 7  ;;  %v3327_v24 = vshrl.u32 %v6818_v42, 16  ;;  %v6816_v34 = vpack.c.bf16 %v3118_v21, %v3118_v21 }
 0x196   : > { %v3330_v1 = vshll.u32 %v6818_v42, 16  ;;  %v3325_v26 = vrot.slane %v3321_v8, 4  ;;  %v2728_v50 = vsel %vm2696_vm15, %v2695_v33, %v2051_v54  ;;  %v2726_v59 = vsel %vm2696_vm15, %v2693_v32, %v2049_v17 }
 0x197   : > { %v3634_v31 = vsel %vm8940_vm9, %v3324_v46, %v3633_v57  ;;  %v3307_v2 = vor.u32 %v3305_v43, %v3304_v61  ;;  %v3329_v40 = vrot.slane %v3327_v24, 7  ;;  %v3310_v63 = vshrl.u32 %v6816_v34, 16 }
 0x198   : > { %3635 = vst [vmem:[#allocation3 + $0x18] sm:$0xf] %v3634_v31  ;;  %v2161_v15 = vpop.permute.xlu0 %2160  ;;  %v3313_v51 = vshll.u32 %v6816_v34, 16  ;;  %v3308_v7 = vrot.slane %v3304_v61, 4 }
 0x199   : > { %v2163_v12 = vpop.permute.xlu1 %2162  ;;  %v3625_v52 = vsel %vm8940_vm9, %v3307_v2, %v3624_v37  ;;  %v3332_v25 = vor.u32 %v3330_v1, %v3329_v40  ;;  %v3334_v55 = vrot.slane %v3329_v40, 4  ;;  %v3312_v44 = vrot.slane %v3310_v63, 7 }
 0x19a   : > { %3626 = vst [vmem:[#allocation3 + $0xc] sm:$0xf] %v3625_v52  ;;  %v2761_v56 = vsel %vm10276_vm1, %v2728_v50, %v2163_v12  ;;  %v2759_v58 = vsel %vm10276_vm1, %v2726_v59, %v2161_v15 }
 0x19b   : > { %v3333_v45 = vsel %vm7515_vm7, %v3325_v26, %v3332_v25  ;;  %v3638_v10 = vsel %vm8951_vm4, %v3334_v55, %v3637_v49  ;;  %v3315_v47 = vor.u32 %v3313_v51, %v3312_v44  ;;  %v3317_v39 = vrot.slane %v3312_v44, 4 }
 0x19c   : > { %3636 = vst.msk [vmem:[#allocation3 + $0x1c] sm:$0xf] %vm3149_vm0, %v3333_v45  ;;  %3639 = vst [vmem:[#allocation3 + $0x20] sm:$0x1] %v3638_v10  ;;  %v2433_v62 = vpop.permute.xlu0 %2432 }
 0x19d   : > { %v2435_v38 = vpop.permute.xlu1 %2434  ;;  %v3316_v35 = vsel %vm7515_vm7, %v3308_v7, %v3315_v47  ;;  %v3631_v19 = vsel %vm8951_vm4, %v3317_v39, %v3630_v20  ;;  %v2792_v3 = vsel %vm2762_vm3, %v2759_v58, %v2433_v62 }
 0x19e   : > { %3627 = vst.msk [vmem:[#allocation3 + $0x10] sm:$0xf] %vm3149_vm0, %v3316_v35  ;;  %3632 = vst [vmem:[#allocation3 + $0x14] sm:$0x1] %v3631_v19  ;;  %v2794_v27 = vsel %vm2762_vm3, %v2761_v56, %v2435_v38 }
 0x19f   : > { %v3804_v9 = vld [vmem:[#allocation3 + $0x18] sm:$0xf] }
 0x1a0   : > { %v2561_v0 = vpop.permute.xlu0 %2560  ;;  %v3867_v13 = vld [vmem:[#allocation3 + $0x18] sm:$0xf] }
 0x1a1   : > { %v2563_v48 = vpop.permute.xlu1 %2562  ;;  %v2825_v60 = vsel %vm2795_vm10, %v2792_v3, %v2561_v0  ;;  %v3851_v28 = vld [vmem:[#allocation3 + $0x18] sm:$0xe]  ;;  %v3787_v46 = vld [vmem:[#allocation3 + $0xc] sm:$0xe] }
 0x1a2   : > { %v2827_v41 = vsel %vm2795_vm10, %v2794_v27, %v2563_v48  ;;  %v3915_v8 = vld [vmem:[#allocation3 + $0x18] sm:$0xe]  ;;  %6921 = vmatprep.mubr.msk.bf16.mxu0 %vm2848_vm2, %v2825_v60  ;;  %v3802_v17 = vld [vmem:[#allocation3 + $0xc] sm:$0xf] }
 0x1a3   : > { %v3805_v11 = vld [vmem:[#allocation3 + $0x1c] sm:$0xf]  ;;  %6922 = vmatmul.mubr.msk.bf16.gmra.mxu0 %vm2848_vm2, %v2827_v41  ;;  %v7157_v21 = vld [vmem:[#allocation3 + $0x20] ss:$0 sps:$4 sm:$0x11]  }
 0x1a4   : > { %v3868_v4 = vld [vmem:[#allocation3 + $0x1c] sm:$0xf]  ;;  %v6615_v42 = vcombine.low %v3804_v9, %v3805_v11  ;;  %v6647_v54 = vcombine.low %v3851_v28, %v3805_v11  ;;  %v3742_v43 = vld [vmem:[#allocation3 + $0x18] sm:$0xf]  ;;  %v4847_v2 = vrot.slane %v7157_v21, 1  ;;  %v4591_v45 = vshll.u32 %v7157_v21, 16 }
 0x1a5   : > { %v8986_v57 = vcombine.low %v3867_v13, %v3868_v4  ;;  %v6694_v61 = vcombine.low %v3915_v8, %v3868_v4  ;;  %v3788_v24 = vld [vmem:[#allocation3 + $0x18] sm:$0xe]  ;;  %v8988_v37 = vld [vmem:[#allocation3 + $0x20] ss:$0 sps:$4 sm:$0x11]  }
 0x1a6   : > { %v3743_v34 = vld [vmem:[#allocation3 + $0x1c] sm:$0xf]  ;;  %4493 = vrot.lane.b32.xlu1 %v6615_v42, %s7331_s26  ;;  %v4846_v31 = vrot.slane %v6647_v54, 1  ;;  %v3803_v40 = vld [vmem:[#allocation3 + $0x10] sm:$0xf]  ;;  %v6899_v6 = vpop.f32.mrf.mxu0  ;;  %v5356_v36 = vrot.slane %v8988_v37, 1 }
 0x1a7   : > { %5003 = vrot.lane.b32.xlu0 %v8986_v57, %s7336_s13  ;;  %v8993_v1 = vld [vmem:[#allocation3 + $0x10] sm:$0xf]  ;;  %v8995_v49 = vld [vmem:[#allocation3 + $0x14] ss:$0 sps:$4 sm:$0x11]   ;;  %v5355_v12 = vrot.slane %v6694_v61, 1  ;;  %v8998_v26 = vcombine.low %v3742_v43, %v3743_v34  ;;  %v6600_v52 = vcombine.low %v3788_v24, %v3743_v34  ;;  %v3059_v25 = vsub.f32 %v6899_v6, %v8929_v30 }
 0x1a8   : > { %v6599_v63 = vcombine.low %v3787_v46, %v8993_v1  ;;  %v4848_v55 = vsel %vm1459_vm6, %v4846_v31, %v4847_v2  ;;  %v9002_v15 = vcombine.low %v3802_v17, %v3803_v40  ;;  %v2935_v44 = vpop.f32.mrf.mxu0  ;;  %v4335_v14 = vrot.slane %v8995_v49, 1  ;;  %v7165_v47 = vld [vmem:[#allocation3 + $0x20] ss:$0 sps:$4 sm:$0x11]   ;;  %v3850_v59 = vld [vmem:[#allocation3 + $0xc] sm:$0xe] }
 0x1a9   : > { %v4586_v18 = vshll.u32 %v6615_v42, 16  ;;  %v3091_v10 = vmax.f32 %v3059_v25, 0.0  ;;  %v3057_v20 = vsub.f32 %v2935_v44, %v8929_v30  ;;  %v5357_v7 = vsel %vm1459_vm6, %v5355_v12, %v5356_v36  ;;  %v9015_v3 = vld [vmem:[#allocation3 + $0x14] ss:$0 sps:$4 sm:$0x11]  }
 0x1aa   : > { %v4334_v51 = vrot.slane %v6599_v63, 1  ;;  %4893 = vrot.lane.b32.xlu1 %v4848_v55, %s7337_s14  ;;  %v4584_v22 = vshrl.u32 %v6615_v42, 16  ;;  %v6900_v39 = vpop.f32.mrf.mxu0  ;;  %v4593_v33 = vrot.slane %v4591_v45, 1  ;;  %v4337_v62 = vrot.slane %v6600_v52, 1  ;;  %v3740_v6 = vld [vmem:[#allocation3 + $0xc] sm:$0xf] }
 0x1ab   : > { %4491 = vrot.lane.b32.xlu0 %v9002_v15, %s7331_s26  ;;  %v4588_v29 = vrot.slane %v4586_v18, 1  ;;  %v3123_v35 = vadd.f32 %v8929_v30, %v3091_v10  ;;  %v3089_v19 = vmax.f32 %v3057_v20, 0.0  ;;  %v3060_v32 = vsub.f32 %v6900_v39, %v8929_v30  ;;  %v3647_v63 = vld [vmem:[#allocation3 + $0x30] sm:$0xf]  ;;  %v3651_v39 = vld [vmem:[#allocation3 + $0x38] sm:$0x1] }
 0x1ac   : > { %v4336_v38 = vsel %vm1459_vm6, %v4334_v51, %v4335_v14  ;;  %v4338_v50 = vrot.slane %v7165_v47, 1  ;;  %v2938_v56 = vpop.f32.mrf.mxu0  ;;  %v4086_v27 = vshll.u32 %v8998_v26, 16  ;;  %v4091_v48 = vshll.u32 %v7165_v47, 16  ;;  %v3640_v14 = vld [vmem:[#allocation3 + $0x24] sm:$0xf] }
 0x1ad   : > { %v4589_v58 = vor.u32 %v4588_v29, %v4584_v22  ;;  %v6646_v41 = vcombine.low %v3850_v59, %v3803_v40  ;;  %v6821_v0 = vpack.c.bf16 %v3123_v35, %v3123_v35  ;;  %v3121_v9 = vadd.f32 %v8929_v30, %v3089_v19 }
 0x1ae   : > { %v3092_v60 = vmax.f32 %v3060_v32, 0.0  ;;  %v3058_v13 = vsub.f32 %v2938_v56, %v8929_v30  ;;  %4381 = vrot.lane.b32.xlu1 %v4336_v38, %s7334_s29  ;;  %vm10291_vm2 = vsmask.f32 7424  ;;  %v4339_v8 = vsel %vm1459_vm6, %v4337_v62, %v4338_v50 }
 0x1af   : > { %5403 = vrot.lane.b32.xlu0 %v5357_v7, %s7338_s20  ;;  %v4594_v28 = vsel %vm10291_vm2, %v4589_v58, %v4593_v33  ;;  %v4084_v11 = vshrl.u32 %v8998_v26, 16  ;;  %v4088_v4 = vrot.slane %v4086_v27, 1  ;;  %v3353_v42 = vshrl.u32 %v6821_v0, 16  ;;  %vm10292_vm11 = vmmov %vm10291_vm2 }
 0x1b0   : > { %v6819_v21 = vpack.c.bf16 %v3121_v9, %v3121_v9  ;;  %v3124_v54 = vadd.f32 %v8929_v30, %v3092_v60  ;;  %v4093_v46 = vrot.slane %v4091_v48, 1  ;;  %v3090_v61 = vmax.f32 %v3058_v13, 0.0  ;;  %vm10293_vm13 = vmmov %vm10291_vm2 }
 0x1b1   : > { %v4089_v43 = vor.u32 %v4088_v4, %v4084_v11  ;;  %v4843_v24 = vrot.slane %v6646_v41, 1  ;;  %v4844_v17 = vrot.slane %v9015_v3, 1  ;;  %v3355_v34 = vrot.slane %v3353_v42, 7  ;;  %vm10294_vm15 = vmmov %vm10291_vm2 }
 0x1b2   : > { %v3356_v31 = vshll.u32 %v6821_v0, 16  ;;  %v3336_v2 = vshrl.u32 %v6819_v21, 16  ;;  %v6822_v40 = vpack.c.bf16 %v3124_v54, %v3124_v54  ;;  %4765 = vrot.lane.b32.xlu1 %v4594_v28, %s7333_s28  ;;  %v3339_v12 = vshll.u32 %v6819_v21, 16  ;;  %vm10295_vm3 = vmmov %vm10291_vm2 }
 0x1b3   : > { %4383 = vrot.lane.b32.xlu0 %v4339_v8, %s7334_s29  ;;  %v3122_v52 = vadd.f32 %v8929_v30, %v3090_v61  ;;  %v9030_v25 = vcombine.low %v3740_v6, %v8993_v1  ;;  %v4094_v51 = vsel %vm10292_vm11, %v4089_v43, %v4093_v46  ;;  %v4845_v45 = vsel %vm1459_vm6, %v4843_v24, %v4844_v17  ;;  %vm10296_vm8 = vmmov %vm10291_vm2 }
 0x1b4   : > { %v3358_v55 = vor.u32 %v3356_v31, %v3355_v34  ;;  %v3338_v36 = vrot.slane %v3336_v2, 7  ;;  %v3361_v44 = vshrl.u32 %v6822_v40, 16  ;;  %v5086_v10 = vshll.u32 %v8986_v57, 16  ;;  %vm10297_vm5 = vmmov %vm10291_vm2 }
 0x1b5   : > { %v6820_v18 = vpack.c.bf16 %v3122_v52, %v3122_v52  ;;  %v5091_v20 = vshll.u32 %v8988_v37, 16  ;;  %v3364_v1 = vshll.u32 %v6822_v40, 16  ;;  %v5084_v29 = vshrl.u32 %v8986_v57, 16  ;;  %v3644_v57 = vld [vmem:[#allocation3 + $0x2c] sm:$0x1]  ;;  %vm10298_vm11 = vmmov %vm10291_vm2 }
 0x1b6   : > { %v3648_v7 = vsel %vm8940_vm9, %v3358_v55, %v3647_v63  ;;  %v3341_v22 = vor.u32 %v3339_v12, %v3338_v36  ;;  %v3363_v47 = vrot.slane %v3361_v44, 7  ;;  %4255 = vrot.lane.b32.xlu1 %v4094_v51, %s7328_s23  ;;  %v5088_v33 = vrot.slane %v5086_v10, 1 }
 0x1b7   : > { %4891 = vrot.lane.b32.xlu0 %v4845_v45, %s7337_s14  ;;  %3649 = vst [vmem:[#allocation3 + $0x30] sm:$0xf] %v3648_v7  ;;  %v3344_v38 = vshrl.u32 %v6820_v18, 16  ;;  %v3359_v62 = vrot.slane %v3355_v34, 4  ;;  %v3347_v50 = vshll.u32 %v6820_v18, 16  ;;  %v5093_v56 = vrot.slane %v5091_v20, 1 }
 0x1b8   : > { %v3641_v37 = vsel %vm8940_vm9, %v3341_v22, %v3640_v14  ;;  %v3366_v35 = vor.u32 %v3364_v1, %v3363_v47  ;;  %v3368_v19 = vrot.slane %v3363_v47, 4  ;;  %v5089_v59 = vor.u32 %v5088_v33, %v5084_v29 }
 0x1b9   : > { %3642 = vst [vmem:[#allocation3 + $0x24] sm:$0xf] %v3641_v37  ;;  %v3346_v32 = vrot.slane %v3344_v38, 7  ;;  %v3342_v58 = vrot.slane %v3338_v36, 4  ;;  %v4074_v41 = vshll.u32 %v9030_v25, 16  ;;  %v4574_v13 = vshll.u32 %v9002_v15, 16 }
 0x1ba   : > { %v3367_v27 = vsel %vm7515_vm7, %v3359_v62, %v3366_v35  ;;  %v3652_v48 = vsel %vm8951_vm4, %v3368_v19, %v3651_v39  ;;  %v5094_v60 = vsel %vm10293_vm13, %v5089_v59, %v5093_v56  ;;  %v4079_v28 = vshll.u32 %v8995_v49, 16  ;;  %vm10299_vm13 = vmmov %vm10291_vm2 }
 0x1bb   : > { %3650 = vst.msk [vmem:[#allocation3 + $0x34] sm:$0xf] %vm3149_vm0, %v3367_v27  ;;  %3653 = vst [vmem:[#allocation3 + $0x38] sm:$0x1] %v3652_v48  ;;  %v3349_v0 = vor.u32 %v3347_v50, %v3346_v32  ;;  %v3351_v9 = vrot.slane %v3346_v32, 4  ;;  %5275 = vrot.lane.b32.xlu0 %v5094_v60, %s7339_s21  ;;  %v4076_v4 = vrot.slane %v4074_v41, 1 }
 0x1bc   : > { %v4576_v42 = vrot.slane %v4574_v13, 1  ;;  %v4072_v54 = vshrl.u32 %v9030_v25, 16  ;;  %v4081_v46 = vrot.slane %v4079_v28, 1  ;;  %v4572_v61 = vshrl.u32 %v9002_v15, 16 }
 0x1bd   : > { %v3350_v8 = vsel %vm7515_vm7, %v3342_v58, %v3349_v0  ;;  %v3645_v11 = vsel %vm8951_vm4, %v3351_v9, %v3644_v57  ;;  %v4579_v43 = vshll.u32 %v9015_v3, 16 }
 0x1be   : > { %3643 = vst.msk [vmem:[#allocation3 + $0x28] sm:$0xf] %vm3149_vm0, %v3350_v8  ;;  %3646 = vst [vmem:[#allocation3 + $0x2c] sm:$0x1] %v3645_v11  ;;  %v3808_v21 = vld [vmem:[#allocation3 + $0x30] sm:$0xf]  ;;  %v4077_v2 = vor.u32 %v4076_v4, %v4072_v54  ;;  %v4577_v63 = vor.u32 %v4576_v42, %v4572_v61 }
 0x1bf   : > { %v3871_v49 = vld [vmem:[#allocation3 + $0x30] sm:$0xf]  ;;  %v4581_v55 = vrot.slane %v4579_v43, 1 }
 0x1c0   : > { %v3853_v24 = vld [vmem:[#allocation3 + $0x30] sm:$0xe]  ;;  %v3789_v44 = vld [vmem:[#allocation3 + $0x24] sm:$0xe]  ;;  %v4082_v1 = vsel %vm10294_vm15, %v4077_v2, %v4081_v46  ;;  %vm10300_vm15 = vmmov %vm10291_vm2 }
 0x1c1   : > { %v3917_v17 = vld [vmem:[#allocation3 + $0x30] sm:$0xe]  ;;  %v3869_v20 = vld [vmem:[#allocation3 + $0x24] sm:$0xf]  ;;  %v4582_v39 = vsel %vm10295_vm3, %v4577_v63, %v4581_v55  ;;  %vm10301_vm3 = vmmov %vm10291_vm2 }
 0x1c2   : > { %v3809_v34 = vld [vmem:[#allocation3 + $0x34] sm:$0xf]  ;;  %v9065_v12 = vld [vmem:[#allocation3 + $0x38] ss:$0 sps:$4 sm:$0x11]  }
 0x1c3   : > { %v3872_v31 = vld [vmem:[#allocation3 + $0x34] sm:$0xf]  ;;  %v9061_v40 = vcombine.low %v3808_v21, %v3809_v34  ;;  %v6649_v52 = vcombine.low %v3853_v24, %v3809_v34  ;;  %v9067_v36 = vld [vmem:[#allocation3 + $0x38] ss:$0 sps:$4 sm:$0x11]   ;;  %v4853_v45 = vrot.slane %v9065_v12, 1 }
 0x1c4   : > { %v9063_v6 = vcombine.low %v3871_v49, %v3872_v31  ;;  %v6696_v15 = vcombine.low %v3917_v17, %v3872_v31  ;;  %v3746_v3 = vld [vmem:[#allocation3 + $0x30] sm:$0xf]  ;;  %v3747_v51 = vld [vmem:[#allocation3 + $0x34] sm:$0xf]  ;;  %v3806_v37 = vld [vmem:[#allocation3 + $0x24] sm:$0xf] }
 0x1c5   : > { %4497 = vrot.lane.b32.xlu1 %v9061_v40, %s7331_s26  ;;  %v3870_v14 = vld [vmem:[#allocation3 + $0x28] sm:$0xf]  ;;  %v4852_v18 = vrot.slane %v6649_v52, 1  ;;  %v3790_v10 = vld [vmem:[#allocation3 + $0x30] sm:$0xe]  ;;  %v9080_v33 = vcombine.low %v3746_v3, %v3747_v51  ;;  %v4610_v50 = vshll.u32 %v9061_v40, 16 }
 0x1c6   : > { %5007 = vrot.lane.b32.xlu0 %v9063_v6, %s7336_s13  ;;  %v9074_v7 = vld [vmem:[#allocation3 + $0x28] sm:$0xf]  ;;  %v6903_v47 = vpop.f32.mrf.mxu0  ;;  %v9078_v38 = vld [vmem:[#allocation3 + $0x2c] ss:$0 sps:$4 sm:$0x11]   ;;  %v5361_v35 = vrot.slane %v6696_v15, 1  ;;  %v6602_v32 = vcombine.low %v3790_v10, %v3747_v51  ;;  %v9086_v56 = vcombine.low %v3869_v20, %v3870_v14 }
 0x1c7   : > { %v3745_v22 = vld [vmem:[#allocation3 + $0x28] sm:$0xf]  ;;  %v3063_v62 = vsub.f32 %v6903_v47, %v8929_v30  ;;  %v3744_v19 = vld [vmem:[#allocation3 + $0x24] sm:$0xf]  ;;  %v9089_v58 = vcombine.low %v3806_v37, %v9074_v7  ;;  %v4854_v27 = vsel %vm1459_vm6, %v4852_v18, %v4853_v45  ;;  %v5362_v48 = vrot.slane %v9067_v36, 1 }
 0x1c8   : > { %v6601_v29 = vcombine.low %v3789_v44, %v3745_v22  ;;  %v2951_v59 = vpop.f32.mrf.mxu0  ;;  %v9093_v57 = vld [vmem:[#allocation3 + $0x38] ss:$0 sps:$4 sm:$0x11]   ;;  %v9096_v60 = vcombine.low %v3744_v19, %v3745_v22  ;;  %v3916_v13 = vld [vmem:[#allocation3 + $0x24] sm:$0xe]  ;;  %v4341_v8 = vrot.slane %v9078_v38, 1 }
 0x1c9   : > { %4253 = vrot.lane.b32.xlu1 %v4082_v1, %s7328_s23  ;;  %v3095_v41 = vmax.f32 %v3063_v62, 0.0  ;;  %v3061_v0 = vsub.f32 %v2951_v59, %v8929_v30  ;;  %v4612_v11 = vrot.slane %v4610_v50, 1  ;;  %v4615_v4 = vshll.u32 %v9065_v12, 16  ;;  %v9109_v34 = vld [vmem:[#allocation3 + $0x2c] ss:$0 sps:$4 sm:$0x11]  }
 0x1ca   : > { %4763 = vrot.lane.b32.xlu0 %v4582_v39, %s7333_s28  ;;  %v4340_v9 = vrot.slane %v6601_v29, 1  ;;  %v6904_v28 = vpop.f32.mrf.mxu0  ;;  %v6695_v42 = vcombine.low %v3916_v13, %v3870_v14  ;;  %v4343_v61 = vrot.slane %v6602_v32, 1  ;;  %v5363_v49 = vsel %vm1459_vm6, %v5361_v35, %v5362_v48  ;;  %v3852_v62 = vld [vmem:[#allocation3 + $0x24] sm:$0xe]  ;;  %v3661_v37 = vld [vmem:[#allocation3 + $0x48] sm:$0xf] }
 0x1cb   : > { %v3127_v21 = vadd.f32 %v8929_v30, %v3095_v41  ;;  %v3093_v54 = vmax.f32 %v3061_v0, 0.0  ;;  %v3064_v46 = vsub.f32 %v6904_v28, %v8929_v30  ;;  %v4344_v24 = vrot.slane %v9093_v57, 1  ;;  %v9124_v50 = vld [vmem:[#allocation3 + $0x2c] ss:$0 sps:$4 sm:$0x11]  }
 0x1cc   : > { %v2954_v43 = vpop.f32.mrf.mxu0  ;;  %v4608_v17 = vshrl.u32 %v9061_v40, 16  ;;  %v4110_v31 = vshll.u32 %v9080_v33, 16  ;;  %v4342_v55 = vsel %vm1459_vm6, %v4340_v9, %v4341_v8  ;;  %v4617_v44 = vrot.slane %v4615_v4, 1  ;;  %v3654_v9 = vld [vmem:[#allocation3 + $0x3c] sm:$0xf] }
 0x1cd   : > { %5005 = vrot.lane.b32.xlu1 %v9086_v56, %s7336_s13  ;;  %v6825_v2 = vpack.c.bf16 %v3127_v21, %v3127_v21  ;;  %v3125_v63 = vadd.f32 %v8929_v30, %v3093_v54  ;;  %v3096_v12 = vmax.f32 %v3064_v46, 0.0  ;;  %v3062_v52 = vsub.f32 %v2954_v43, %v8929_v30  ;;  %v3665_v54 = vld [vmem:[#allocation3 + $0x50] sm:$0x1] }
 0x1ce   : > { %4495 = vrot.lane.b32.xlu0 %v9089_v58, %s7331_s26  ;;  %v4613_v15 = vor.u32 %v4612_v11, %v4608_v17  ;;  %v5358_v3 = vrot.slane %v6695_v42, 1  ;;  %v4108_v40 = vshrl.u32 %v9080_v33, 16  ;;  %v4345_v10 = vsel %vm1459_vm6, %v4343_v61, %v4344_v24 }
 0x1cf   : > { %v3387_v51 = vshrl.u32 %v6825_v2, 16  ;;  %v6823_v14 = vpack.c.bf16 %v3125_v63, %v3125_v63  ;;  %v3128_v18 = vadd.f32 %v8929_v30, %v3096_v12  ;;  %v3094_v45 = vmax.f32 %v3062_v52, 0.0 }
 0x1d0   : > { %v5359_v20 = vrot.slane %v9109_v34, 1  ;;  %v4112_v22 = vrot.slane %v4110_v31, 1  ;;  %v3390_v1 = vshll.u32 %v6825_v2, 16  ;;  %v4618_v19 = vsel %vm10296_vm8, %v4613_v15, %v4617_v44  ;;  %v3658_v44 = vld [vmem:[#allocation3 + $0x44] sm:$0x1]  ;;  %vm10302_vm8 = vmmov %vm10291_vm2 }
 0x1d1   : > { %4897 = vrot.lane.b32.xlu1 %v4854_v27, %s7337_s14  ;;  %v3389_v47 = vrot.slane %v3387_v51, 7  ;;  %v3370_v39 = vshrl.u32 %v6823_v14, 16  ;;  %v6826_v29 = vpack.c.bf16 %v3128_v18, %v3128_v18  ;;  %v3126_v35 = vadd.f32 %v8929_v30, %v3094_v45 }
 0x1d2   : > { %5407 = vrot.lane.b32.xlu0 %v5363_v49, %s7338_s20  ;;  %v4115_v32 = vshll.u32 %v9093_v57, 16  ;;  %v6648_v59 = vcombine.low %v3852_v62, %v9074_v7  ;;  %v3373_v41 = vshll.u32 %v6823_v14, 16  ;;  %v5360_v28 = vsel %vm1459_vm6, %v5358_v3, %v5359_v20 }
 0x1d3   : > { %v3392_v27 = vor.u32 %v3390_v1, %v3389_v47  ;;  %v3372_v48 = vrot.slane %v3370_v39, 7  ;;  %v3395_v0 = vshrl.u32 %v6826_v29, 16  ;;  %v6824_v13 = vpack.c.bf16 %v3126_v35, %v3126_v35 }
 0x1d4   : > { %v4113_v8 = vor.u32 %v4112_v22, %v4108_v40  ;;  %v5110_v11 = vshll.u32 %v9063_v6, 16  ;;  %v3398_v42 = vshll.u32 %v6826_v29, 16  ;;  %v3393_v21 = vrot.slane %v3389_v47, 4 }
 0x1d5   : > { %4385 = vrot.lane.b32.xlu1 %v4342_v55, %s7334_s29  ;;  %v3662_v57 = vsel %vm8940_vm9, %v3392_v27, %v3661_v37  ;;  %v3375_v4 = vor.u32 %v3373_v41, %v3372_v48  ;;  %v3397_v7 = vrot.slane %v3395_v0, 7  ;;  %v3378_v46 = vshrl.u32 %v6824_v13, 16 }
 0x1d6   : > { %4387 = vrot.lane.b32.xlu0 %v4345_v10, %s7334_s29  ;;  %3663 = vst [vmem:[#allocation3 + $0x48] sm:$0xf] %v3662_v57  ;;  %v4849_v61 = vrot.slane %v6648_v59, 1  ;;  %v4850_v43 = vrot.slane %v9124_v50, 1  ;;  %v5112_v31 = vrot.slane %v5110_v11, 1  ;;  %v3381_v63 = vshll.u32 %v6824_v13, 16 }
 0x1d7   : > { %v3655_v49 = vsel %vm8940_vm9, %v3375_v4, %v3654_v9  ;;  %v3400_v24 = vor.u32 %v3398_v42, %v3397_v7  ;;  %v3402_v17 = vrot.slane %v3397_v7, 4  ;;  %v3380_v2 = vrot.slane %v3378_v46, 7 }
 0x1d8   : > { %3656 = vst [vmem:[#allocation3 + $0x3c] sm:$0xf] %v3655_v49  ;;  %v4117_v12 = vrot.slane %v4115_v32, 1  ;;  %v5108_v52 = vshrl.u32 %v9063_v6, 16  ;;  %v5115_v3 = vshll.u32 %v9067_v36, 16  ;;  %v5098_v51 = vshll.u32 %v9086_v56, 16 }
 0x1d9   : > { %4769 = vrot.lane.b32.xlu1 %v4618_v19, %s7333_s28  ;;  %v3401_v55 = vsel %vm7515_vm7, %v3393_v21, %v3400_v24  ;;  %v3666_v15 = vsel %vm8951_vm4, %v3402_v17, %v3665_v54  ;;  %v3376_v14 = vrot.slane %v3372_v48, 4  ;;  %v3383_v18 = vor.u32 %v3381_v63, %v3380_v2 }
 0x1da   : > { %5405 = vrot.lane.b32.xlu0 %v5360_v28, %s7338_s20  ;;  %3664 = vst.msk [vmem:[#allocation3 + $0x4c] sm:$0xf] %vm3149_vm0, %v3401_v55  ;;  %3667 = vst [vmem:[#allocation3 + $0x50] sm:$0x1] %v3666_v15  ;;  %v3385_v40 = vrot.slane %v3380_v2, 4  ;;  %v4118_v45 = vsel %vm10297_vm5, %v4113_v8, %v4117_v12  ;;  %v4851_v6 = vsel %vm1459_vm6, %v4849_v61, %v4850_v43  ;;  %v4598_v20 = vshll.u32 %v9089_v58, 16 }
 0x1db   : > { %v5113_v10 = vor.u32 %v5112_v31, %v5108_v52  ;;  %v3384_v22 = vsel %vm7515_vm7, %v3376_v14, %v3383_v18  ;;  %v4098_v47 = vshll.u32 %v9096_v60, 16  ;;  %v5117_v1 = vrot.slane %v5115_v3, 1  ;;  %vm10303_vm5 = vmmov %vm10291_vm2 }
 0x1dc   : > { %v3659_v36 = vsel %vm8951_vm4, %v3385_v40, %v3658_v44  ;;  %3657 = vst.msk [vmem:[#allocation3 + $0x40] sm:$0xf] %vm3149_vm0, %v3384_v22  ;;  %v5100_v39 = vrot.slane %v5098_v51, 1  ;;  %v5096_v29 = vshrl.u32 %v9086_v56, 16  ;;  %v5103_v62 = vshll.u32 %v9109_v34, 16 }
 0x1dd   : > { %4259 = vrot.lane.b32.xlu1 %v4118_v45, %s7328_s23  ;;  %3660 = vst [vmem:[#allocation3 + $0x44] sm:$0x1] %v3659_v36  ;;  %v4596_v37 = vshrl.u32 %v9089_v58, 16  ;;  %v4600_v35 = vrot.slane %v4598_v20, 1  ;;  %v5118_v19 = vsel %vm10291_vm2, %v5113_v10, %v5117_v1  ;;  %v3812_v32 = vld [vmem:[#allocation3 + $0x48] sm:$0xf] }
 0x1de   : > { %4895 = vrot.lane.b32.xlu0 %v4851_v6, %s7337_s14  ;;  %v3875_v59 = vld [vmem:[#allocation3 + $0x48] sm:$0xf]  ;;  %v4603_v27 = vshll.u32 %v9124_v50, 16  ;;  %v4100_v48 = vrot.slane %v4098_v47, 1  ;;  %v4096_v41 = vshrl.u32 %v9096_v60, 16  ;;  %v4103_v0 = vshll.u32 %v9078_v38, 16 }
 0x1df   : > { %v3919_v9 = vld [vmem:[#allocation3 + $0x48] sm:$0xe]  ;;  %v5101_v28 = vor.u32 %v5100_v39, %v5096_v29  ;;  %v4601_v11 = vor.u32 %v4600_v35, %v4596_v37  ;;  %v5105_v4 = vrot.slane %v5103_v62, 1  ;;  %v3810_v49 = vld [vmem:[#allocation3 + $0x3c] sm:$0xf] }
 0x1e0   : > { %v3855_v56 = vld [vmem:[#allocation3 + $0x48] sm:$0xe]  ;;  %v4605_v7 = vrot.slane %v4603_v27, 1  ;;  %v4101_v42 = vor.u32 %v4100_v48, %v4096_v41  ;;  %v4105_v38 = vrot.slane %v4103_v0, 1  ;;  %v3873_v24 = vld [vmem:[#allocation3 + $0x3c] sm:$0xf] }
 0x1e1   : > { %v3813_v13 = vld [vmem:[#allocation3 + $0x4c] sm:$0xf]  ;;  %v9169_v57 = vld [vmem:[#allocation3 + $0x50] ss:$0 sps:$4 sm:$0x11]   ;;  %v5106_v12 = vsel %vm10298_vm11, %v5101_v28, %v5105_v4  ;;  %vm10304_vm11 = vmmov %vm10291_vm2 }
 0x1e2   : > { %5279 = vrot.lane.b32.xlu0 %v5118_v19, %s7339_s21  ;;  %v3876_v34 = vld [vmem:[#allocation3 + $0x4c] sm:$0xf]  ;;  %v9165_v58 = vcombine.low %v3812_v32, %v3813_v13  ;;  %v6651_v21 = vcombine.low %v3855_v56, %v3813_v13  ;;  %v3792_v46 = vld [vmem:[#allocation3 + $0x48] sm:$0xe]  ;;  %v4606_v52 = vsel %vm10299_vm13, %v4601_v11, %v4605_v7  ;;  %v5368_v15 = vrot.slane %v9169_v57, 1  ;;  %vm10305_vm13 = vmmov %vm10291_vm2 }
 0x1e3   : > { %v9167_v8 = vcombine.low %v3875_v59, %v3876_v34  ;;  %v6698_v50 = vcombine.low %v3919_v9, %v3876_v34  ;;  %v3751_v54 = vld [vmem:[#allocation3 + $0x4c] sm:$0xf]  ;;  %v9175_v61 = vld [vmem:[#allocation3 + $0x40] sm:$0xf]  ;;  %v3750_v44 = vld [vmem:[#allocation3 + $0x48] sm:$0xf]  ;;  %v4106_v51 = vsel %vm10300_vm15, %v4101_v42, %v4105_v38 }
 0x1e4   : > { %4501 = vrot.lane.b32.xlu1 %v9165_v58, %s7331_s26  ;;  %v9177_v43 = vld [vmem:[#allocation3 + $0x50] ss:$0 sps:$4 sm:$0x11]   ;;  %v3874_v17 = vld [vmem:[#allocation3 + $0x40] sm:$0xf]  ;;  %v6604_v31 = vcombine.low %v3792_v46, %v3751_v54  ;;  %v4858_v14 = vrot.slane %v6651_v21, 1  ;;  %v9184_v18 = vcombine.low %v3750_v44, %v3751_v54  ;;  %v9191_v20 = vcombine.low %v3810_v49, %v9175_v61  ;;  %vm10306_vm15 = vmmov %vm10291_vm2 }
 0x1e5   : > { %v3749_v2 = vld [vmem:[#allocation3 + $0x40] sm:$0xf]  ;;  %v5367_v55 = vrot.slane %v6698_v50, 1  ;;  %v9186_v40 = vld [vmem:[#allocation3 + $0x50] ss:$0 sps:$4 sm:$0x11]   ;;  %v9193_v22 = vcombine.low %v3873_v24, %v3874_v17 }
 0x1e6   : > { %5011 = vrot.lane.b32.xlu0 %v9167_v8, %s7336_s13  ;;  %v6907_v63 = vpop.f32.mrf.mxu0  ;;  %v3748_v45 = vld [vmem:[#allocation3 + $0x3c] sm:$0xf]  ;;  %v9195_v36 = vld [vmem:[#allocation3 + $0x44] ss:$0 sps:$4 sm:$0x11]   ;;  %v4634_v1 = vshll.u32 %v9165_v58, 16 }
 0x1e7   : > { %v3067_v3 = vsub.f32 %v6907_v63, %v8929_v30  ;;  %v3791_v6 = vld [vmem:[#allocation3 + $0x3c] sm:$0xe]  ;;  %v4859_v62 = vrot.slane %v9177_v43, 1  ;;  %v4349_v37 = vrot.slane %v6604_v31, 1  ;;  %v5369_v32 = vsel %vm1459_vm6, %v5367_v55, %v5368_v15 }
 0x1e8   : > { %5277 = vrot.lane.b32.xlu1 %v5106_v12, %s7339_s21  ;;  %v2967_v10 = vpop.f32.mrf.mxu0  ;;  %v6603_v47 = vcombine.low %v3791_v6, %v3749_v2  ;;  %v3918_v35 = vld [vmem:[#allocation3 + $0x3c] sm:$0xe]  ;;  %v9201_v59 = vcombine.low %v3748_v45, %v3749_v2  ;;  %v9203_v27 = vld [vmem:[#allocation3 + $0x44] ss:$0 sps:$4 sm:$0x11]   ;;  %v4636_v41 = vrot.slane %v4634_v1, 1 }
 0x1e9   : > { %v3099_v39 = vmax.f32 %v3067_v3, 0.0  ;;  %v3065_v29 = vsub.f32 %v2967_v10, %v8929_v30  ;;  %v6697_v48 = vcombine.low %v3918_v35, %v3874_v17  ;;  %v4350_v13 = vrot.slane %v9186_v40, 1  ;;  %v3854_v63 = vld [vmem:[#allocation3 + $0x3c] sm:$0xe]  ;;  %v9230_v45 = vld [vmem:[%s10270_s3] ss:$0 sm:$0xff] }
 0x1ea   : > { %4767 = vrot.lane.b32.xlu0 %v4606_v52, %s7333_s28  ;;  %v6908_v19 = vpop.f32.mrf.mxu0  ;;  %v4346_v28 = vrot.slane %v6603_v47, 1  ;;  %v4347_v11 = vrot.slane %v9195_v36, 1  ;;  %v4632_v50 = vshrl.u32 %v9165_v58, 16  ;;  %v4639_v4 = vshll.u32 %v9177_v43, 16 }
 0x1eb   : > { %v3131_v0 = vadd.f32 %v8929_v30, %v3099_v39  ;;  %v3097_v9 = vmax.f32 %v3065_v29, 0.0  ;;  %v3068_v56 = vsub.f32 %v6908_v19, %v8929_v30  ;;  %v4860_v46 = vsel %vm1459_vm6, %v4858_v14, %v4859_v62  ;;  %v9224_v55 = vld [vmem:[#allocation3 + $0x44] ss:$0 sps:$4 sm:$0x11]   ;;  %v3675_v14 = vld [vmem:[#allocation3 + $0x60] sm:$0xf] }
 0x1ec   : > { %4257 = vrot.lane.b32.xlu1 %v4106_v51, %s7328_s23  ;;  %v2970_v34 = vpop.f32.mrf.mxu0  ;;  %v5364_v38 = vrot.slane %v6697_v48, 1  ;;  %v5365_v49 = vrot.slane %v9203_v27, 1  ;;  %v4637_v24 = vor.u32 %v4636_v41, %v4632_v50  ;;  %v4351_v58 = vsel %vm1459_vm6, %v4349_v37, %v4350_v13  ;;  %v3668_v37 = vld [vmem:[#allocation3 + $0x54] sm:$0xf] }
 0x1ed   : > { %v6829_v7 = vpack.c.bf16 %v3131_v0, %v3131_v0  ;;  %v3129_v42 = vadd.f32 %v8929_v30, %v3097_v9  ;;  %v3100_v21 = vmax.f32 %v3068_v56, 0.0  ;;  %v3066_v54 = vsub.f32 %v2970_v34, %v8929_v30  ;;  %v3679_v34 = vld [vmem:[#allocation3 + $0x68] sm:$0x1] }
 0x1ee   : > { %4499 = vrot.lane.b32.xlu0 %v9191_v20, %s7331_s26  ;;  %v4348_v12 = vsel %vm1459_vm6, %v4346_v28, %v4347_v11  ;;  %v4641_v52 = vrot.slane %v4639_v4, 1  ;;  %v6650_v15 = vcombine.low %v3854_v63, %v9175_v61  ;;  %v5366_v10 = vsel %vm1459_vm6, %v5364_v38, %v5365_v49 }
 0x1ef   : > { %v3421_v17 = vshrl.u32 %v6829_v7, 16  ;;  %v6827_v31 = vpack.c.bf16 %v3129_v42, %v3129_v42  ;;  %v3132_v2 = vadd.f32 %v8929_v30, %v3100_v21  ;;  %v3098_v43 = vmax.f32 %v3066_v54, 0.0 }
 0x1f0   : > { %5009 = vrot.lane.b32.xlu1 %v9193_v22, %s7336_s13  ;;  %v3424_v3 = vshll.u32 %v6829_v7, 16  ;;  %v4642_v47 = vsel %vm10301_vm3, %v4637_v24, %v4641_v52  ;;  %v4134_v1 = vshll.u32 %v9184_v18, 16  ;;  %v4855_v19 = vrot.slane %v6650_v15, 1  ;;  %vm10307_vm3 = vmmov %vm10291_vm2 }
 0x1f1   : > { %v3423_v44 = vrot.slane %v3421_v17, 7  ;;  %v3404_v51 = vshrl.u32 %v6827_v31, 16  ;;  %v6830_v30 = vpack.c.bf16 %v3132_v2, %v3132_v2  ;;  %v3130_v6 = vadd.f32 %v9230_v45, %v3098_v43  ;;  %v3672_v17 = vld [vmem:[#allocation3 + $0x5c] sm:$0x1] }
 0x1f2   : > { %5411 = vrot.lane.b32.xlu0 %v5369_v32, %s7338_s20  ;;  %v3407_v29 = vshll.u32 %v6827_v31, 16  ;;  %v4856_v32 = vrot.slane %v9224_v55, 1  ;;  %v4132_v48 = vshrl.u32 %v9184_v18, 16  ;;  %v4136_v11 = vrot.slane %v4134_v1, 1 }
 0x1f3   : > { %v3426_v39 = vor.u32 %v3424_v3, %v3423_v44  ;;  %v3406_v61 = vrot.slane %v3404_v51, 7  ;;  %v3429_v62 = vshrl.u32 %v6830_v30, 16  ;;  %v6828_v35 = vpack.c.bf16 %v3130_v6, %v3130_v6 }
 0x1f4   : > { %4901 = vrot.lane.b32.xlu1 %v4860_v46, %s7337_s14  ;;  %v3432_v56 = vshll.u32 %v6830_v30, 16  ;;  %v3427_v13 = vrot.slane %v3423_v44, 4  ;;  %v4139_v50 = vshll.u32 %v9186_v40, 16  ;;  %v5134_v21 = vshll.u32 %v9167_v8, 16 }
 0x1f5   : > { %v3676_v41 = vsel %vm8940_vm9, %v3426_v39, %v3675_v14  ;;  %v3409_v0 = vor.u32 %v3407_v29, %v3406_v61  ;;  %v3431_v9 = vrot.slane %v3429_v62, 7  ;;  %v3412_v28 = vshrl.u32 %v6828_v35, 16 }
 0x1f6   : > { %4391 = vrot.lane.b32.xlu0 %v4351_v58, %s7334_s29  ;;  %3677 = vst [vmem:[#allocation3 + $0x60] sm:$0xf] %v3676_v41  ;;  %v3415_v46 = vshll.u32 %v6828_v35, 16  ;;  %v5132_v38 = vshrl.u32 %v9167_v8, 16  ;;  %v5139_v49 = vshll.u32 %v9169_v57, 16  ;;  %v5136_v31 = vrot.slane %v5134_v21, 1 }
 0x1f7   : > { %v3669_v4 = vsel %vm8940_vm9, %v3409_v0, %v3668_v37  ;;  %v3434_v7 = vor.u32 %v3432_v56, %v3431_v9  ;;  %v3436_v42 = vrot.slane %v3431_v9, 4  ;;  %v3414_v54 = vrot.slane %v3412_v28, 7 }
 0x1f8   : > { %3670 = vst [vmem:[#allocation3 + $0x54] sm:$0xf] %v3669_v4  ;;  %4389 = vrot.lane.b32.xlu1 %v4348_v12, %s7334_s29  ;;  %v5122_v2 = vshll.u32 %v9193_v22, 16  ;;  %v3410_v58 = vrot.slane %v3406_v61, 4  ;;  %v5127_v8 = vshll.u32 %v9203_v27, 16  ;;  %v4857_v57 = vsel %vm1459_vm6, %v4855_v19, %v4856_v32 }
 0x1f9   : > { %v3435_v40 = vsel %vm7515_vm7, %v3427_v13, %v3434_v7  ;;  %v3680_v24 = vsel %vm8951_vm4, %v3436_v42, %v3679_v34  ;;  %v3417_v63 = vor.u32 %v3415_v46, %v3414_v54  ;;  %v3419_v43 = vrot.slane %v3414_v54, 4 }
 0x1fa   : > { %5409 = vrot.lane.b32.xlu0 %v5366_v10, %s7338_s20  ;;  %3678 = vst.msk [vmem:[#allocation3 + $0x64] sm:$0xf] %vm3149_vm0, %v3435_v40  ;;  %3681 = vst [vmem:[#allocation3 + $0x68] sm:$0x1] %v3680_v24  ;;  %v4137_v12 = vor.u32 %v4136_v11, %v4132_v48  ;;  %v5137_v52 = vor.u32 %v5136_v31, %v5132_v38  ;;  %v4622_v15 = vshll.u32 %v9191_v20, 16  ;;  %v4141_v27 = vrot.slane %v4139_v50, 1 }
 0x1fb   : > { %v3418_v44 = vsel %vm7515_vm7, %v3410_v58, %v3417_v63  ;;  %v3673_v3 = vsel %vm8951_vm4, %v3419_v43, %v3672_v17  ;;  %v5141_v51 = vrot.slane %v5139_v49, 1  ;;  %v5120_v30 = vshrl.u32 %v9193_v22, 16 }
 0x1fc   : > { %4773 = vrot.lane.b32.xlu1 %v4642_v47, %s7333_s28  ;;  %3671 = vst.msk [vmem:[#allocation3 + $0x58] sm:$0xf] %vm3149_vm0, %v3418_v44  ;;  %3674 = vst [vmem:[#allocation3 + $0x5c] sm:$0x1] %v3673_v3  ;;  %v5124_v14 = vrot.slane %v5122_v2, 1  ;;  %v5129_v6 = vrot.slane %v5127_v8, 1  ;;  %v4142_v61 = vsel %vm10302_vm8, %v4137_v12, %v4141_v27 }
 0x1fd   : > { %v4620_v10 = vshrl.u32 %v9191_v20, 16  ;;  %v4627_v1 = vshll.u32 %v9224_v55, 16  ;;  %v4122_v39 = vshll.u32 %v9201_v59, 16  ;;  %v5142_v47 = vsel %vm10303_vm5, %v5137_v52, %v5141_v51  ;;  %v3816_v29 = vld [vmem:[#allocation3 + $0x60] sm:$0xf]  ;;  %vm10308_vm8 = vmmov %vm10291_vm2 }
 0x1fe   : > { %4899 = vrot.lane.b32.xlu0 %v4857_v57, %s7337_s14  ;;  %v3879_v62 = vld [vmem:[#allocation3 + $0x60] sm:$0xf]  ;;  %v4624_v37 = vrot.slane %v4622_v15, 1  ;;  %v4120_v35 = vshrl.u32 %v9201_v59, 16  ;;  %v4127_v20 = vshll.u32 %v9195_v36, 16  ;;  %v5125_v9 = vor.u32 %v5124_v14, %v5120_v30  ;;  %vm10309_vm5 = vmmov %vm10291_vm2 }
 0x1ff   : > { %v4124_v22 = vrot.slane %v4122_v39, 1  ;;  %v3921_v19 = vld [vmem:[#allocation3 + $0x60] sm:$0xe]  ;;  %v4629_v28 = vrot.slane %v4627_v1, 1  ;;  %v3814_v38 = vld [vmem:[#allocation3 + $0x54] sm:$0xf] }
 0x200   : > { %4263 = vrot.lane.b32.xlu1 %v4142_v61, %s7328_s23  ;;  %v3857_v55 = vld [vmem:[#allocation3 + $0x60] sm:$0xe]  ;;  %v4625_v34 = vor.u32 %v4624_v37, %v4620_v10  ;;  %v4129_v36 = vrot.slane %v4127_v20, 1  ;;  %v3877_v49 = vld [vmem:[#allocation3 + $0x54] sm:$0xf]  ;;  %v5130_v2 = vsel %vm10291_vm2, %v5125_v9, %v5129_v6 }
 0x201   : > { %v3817_v32 = vld [vmem:[#allocation3 + $0x64] sm:$0xf]  ;;  %v9280_v56 = vld [vmem:[#allocation3 + $0x68] ss:$0 sps:$4 sm:$0x11]   ;;  %v4125_v11 = vor.u32 %v4124_v22, %v4120_v35 }
 0x202   : > { %5283 = vrot.lane.b32.xlu0 %v5142_v47, %s7339_s21  ;;  %v3880_v48 = vld [vmem:[#allocation3 + $0x64] sm:$0xf]  ;;  %v9276_v41 = vcombine.low %v3816_v29, %v3817_v32  ;;  %v6653_v50 = vcombine.low %v3857_v55, %v3817_v32  ;;  %v3794_v7 = vld [vmem:[#allocation3 + $0x60] sm:$0xe]  ;;  %v5374_v17 = vrot.slane %v9280_v56, 1  ;;  %v4630_v57 = vsel %vm10304_vm11, %v4625_v34, %v4629_v28  ;;  %vm10310_vm11 = vmmov %vm10291_vm2 }
 0x203   : > { %v9278_v0 = vcombine.low %v3879_v62, %v3880_v48  ;;  %v6700_v13 = vcombine.low %v3921_v19, %v3880_v48  ;;  %v3755_v4 = vld [vmem:[#allocation3 + $0x64] sm:$0xf]  ;;  %v9286_v42 = vld [vmem:[#allocation3 + $0x58] sm:$0xf]  ;;  %v3754_v54 = vld [vmem:[#allocation3 + $0x60] sm:$0xf]  ;;  %v4130_v12 = vsel %vm10305_vm13, %v4125_v11, %v4129_v36  ;;  %v9319_v19 = vpop.permute.xlu0 %4251 }
 0x204   : > { %4505 = vrot.lane.b32.xlu1 %v9276_v41, %s7331_s26  ;;  %v9288_v21 = vld [vmem:[#allocation3 + $0x68] ss:$0 sps:$4 sm:$0x11]   ;;  %v3878_v40 = vld [vmem:[#allocation3 + $0x58] sm:$0xf]  ;;  %v6606_v63 = vcombine.low %v3794_v7, %v3755_v4  ;;  %v4864_v52 = vrot.slane %v6653_v50, 1  ;;  %v9299_v15 = vcombine.low %v3754_v54, %v3755_v4  ;;  %v9305_v27 = vcombine.low %v3814_v38, %v9286_v42 }
 0x205   : > { %v5373_v24 = vrot.slane %v6700_v13, 1  ;;  %v9293_v58 = vld [vmem:[#allocation3 + $0x68] ss:$0 sps:$4 sm:$0x11]   ;;  %v9295_v43 = vld [vmem:[#allocation3 + $0x58] sm:$0xf]  ;;  %v9307_v51 = vcombine.low %v3877_v49, %v3878_v40 }
 0x206   : > { %5015 = vrot.lane.b32.xlu0 %v9278_v0, %s7336_s13  ;;  %v6911_v46 = vpop.f32.mrf.mxu0  ;;  %v3793_v30 = vld [vmem:[#allocation3 + $0x54] sm:$0xe]  ;;  %v9309_v14 = vld [vmem:[#allocation3 + $0x5c] ss:$0 sps:$4 sm:$0x11]   ;;  %v4865_v1 = vrot.slane %v9288_v21, 1 }
 0x207   : > { %v3071_v31 = vsub.f32 %v6911_v46, %v9230_v45  ;;  %v5375_v10 = vsel %vm1459_vm6, %v5373_v24, %v5374_v17  ;;  %v6605_v39 = vcombine.low %v3793_v30, %v9295_v43  ;;  %v9314_v61 = vld [vmem:[#allocation3 + $0x5c] ss:$0 sps:$4 sm:$0x11]   ;;  %v4658_v47 = vshll.u32 %v9276_v41, 16  ;;  %v3920_v22 = vld [vmem:[#allocation3 + $0x54] sm:$0xe] }
 0x208   : > { %v2983_v8 = vpop.f32.mrf.mxu0  ;;  %5281 = vrot.lane.b32.xlu1 %v5130_v2, %s7339_s21  ;;  %v4355_v35 = vrot.slane %v6606_v63, 1  ;;  %v4356_v55 = vrot.slane %v9293_v58, 1  ;;  %v4353_v48 = vrot.slane %v9309_v14, 1  ;;  %v6699_v9 = vcombine.low %v3920_v22, %v3878_v40  ;;  %v9335_v2 = vld [vmem:[#allocation3 + $0x5c] ss:$0 sps:$4 sm:$0x11]  }
 0x209   : > { %v3103_v44 = vmax.f32 %v3071_v31, 0.0  ;;  %v3069_v3 = vsub.f32 %v2983_v8, %v9230_v45  ;;  %v4352_v32 = vrot.slane %v6605_v39, 1  ;;  %v5371_v4 = vrot.slane %v9314_v61, 1 }
 0x20a   : > { %4771 = vrot.lane.b32.xlu0 %v4630_v57, %s7333_s28  ;;  %v6912_v6 = vpop.f32.mrf.mxu0  ;;  %v5370_v50 = vrot.slane %v6699_v9, 1  ;;  %v4656_v7 = vshrl.u32 %v9276_v41, 16  ;;  %v4660_v36 = vrot.slane %v4658_v47, 1  ;;  %v4866_v49 = vsel %vm1459_vm6, %v4864_v52, %v4865_v1  ;;  %v3689_v52 = vld [vmem:[#allocation3 + $0x78] sm:$0xf] }
 0x20b   : > { %v3135_v29 = vadd.f32 %v9230_v45, %v3103_v44  ;;  %v3101_v62 = vmax.f32 %v3069_v3, 0.0  ;;  %v3072_v37 = vsub.f32 %v6912_v6, %v9230_v45  ;;  %v4357_v24 = vsel %vm1459_vm6, %v4355_v35, %v4356_v55  ;;  %v9341_v3 = vpop.permute.xlu0 %4379 }
 0x20c   : > { %v2986_v20 = vpop.f32.mrf.mxu0  ;;  %4261 = vrot.lane.b32.xlu1 %v4130_v12, %s7328_s23  ;;  %v4354_v17 = vsel %vm1459_vm6, %v4352_v32, %v4353_v48  ;;  %v4663_v31 = vshll.u32 %v9288_v21, 16  ;;  %v3856_v12 = vld [vmem:[#allocation3 + $0x54] sm:$0xe]  ;;  %v5372_v30 = vsel %vm1459_vm6, %v5370_v50, %v5371_v4  ;;  %v4661_v21 = vor.u32 %v4660_v36, %v4656_v7 }
 0x20d   : > { %v6833_v13 = vpack.c.bf16 %v3135_v29, %v3135_v29  ;;  %v3133_v34 = vadd.f32 %v9230_v45, %v3101_v62  ;;  %v3104_v28 = vmax.f32 %v3072_v37, 0.0  ;;  %v3070_v11 = vsub.f32 %v2986_v20, %v9230_v45  ;;  %v3682_v37 = vld [vmem:[#allocation3 + $0x6c] sm:$0xf] }
 0x20e   : > { %4503 = vrot.lane.b32.xlu0 %v9305_v27, %s7331_s26  ;;  %v6652_v6 = vcombine.low %v3856_v12, %v9286_v42  ;;  %v4665_v22 = vrot.slane %v4663_v31, 1  ;;  %v3693_v42 = vld [vmem:[#allocation3 + $0x80] sm:$0x1]  ;;  %vm5563_vm13 = vcmask 326656  }
 0x20f   : > { %v3455_v54 = vshrl.u32 %v6833_v13, 16  ;;  %v6831_v46 = vpack.c.bf16 %v3133_v34, %v3133_v34  ;;  %v3136_v38 = vadd.f32 %v9230_v45, %v3104_v28  ;;  %v3102_v40 = vmax.f32 %v3070_v11, 0.0 }
 0x210   : > { %v3458_v8 = vshll.u32 %v6833_v13, 16  ;;  %5013 = vrot.lane.b32.xlu1 %v9307_v51, %s7336_s13  ;;  %v4861_v13 = vrot.slane %v6652_v6, 1  ;;  %v4156_v34 = vshrl.u32 %v9299_v15, 16  ;;  %v4158_v28 = vshll.u32 %v9299_v15, 16 }
 0x211   : > { %v3457_v63 = vrot.slane %v3455_v54, 7  ;;  %v3438_v57 = vshrl.u32 %v6831_v46, 16  ;;  %v6834_v41 = vpack.c.bf16 %v3136_v38, %v3136_v38  ;;  %v3134_v44 = vadd.f32 %v9230_v45, %v3102_v40 }
 0x212   : > { %5415 = vrot.lane.b32.xlu0 %v5375_v10, %s7338_s20  ;;  %v3441_v47 = vshll.u32 %v6831_v46, 16  ;;  %v4862_v10 = vrot.slane %v9335_v2, 1  ;;  %v5158_v40 = vshll.u32 %v9278_v0, 16  ;;  %v5163_v6 = vshll.u32 %v9280_v56, 16 }
 0x213   : > { %v3460_v1 = vor.u32 %v3458_v8, %v3457_v63  ;;  %v3440_v39 = vrot.slane %v3438_v57, 7  ;;  %v3463_v29 = vshrl.u32 %v6834_v41, 16  ;;  %v3461_v62 = vrot.slane %v3457_v63, 4  ;;  %v3686_v63 = vld [vmem:[#allocation3 + $0x74] sm:$0x1] }
 0x214   : > { %v6832_v35 = vpack.c.bf16 %v3134_v44, %v3134_v44  ;;  %v3466_v48 = vshll.u32 %v6834_v41, 16  ;;  %4905 = vrot.lane.b32.xlu1 %v4866_v49, %s7337_s14  ;;  %v4160_v49 = vrot.slane %v4158_v28, 1  ;;  %v4163_v8 = vshll.u32 %v9293_v58, 16 }
 0x215   : > { %v3690_v20 = vsel %vm8940_vm9, %v3460_v1, %v3689_v52  ;;  %v3443_v55 = vor.u32 %v3441_v47, %v3440_v39  ;;  %v3465_v32 = vrot.slane %v3463_v29, 7  ;;  %v3444_v11 = vrot.slane %v3440_v39, 4  ;;  %v3752_v52 = vld [vmem:[#allocation3 + $0x54] sm:$0xf] }
 0x216   : > { %4395 = vrot.lane.b32.xlu0 %v4357_v24, %s7334_s29  ;;  %3691 = vst [vmem:[#allocation3 + $0x78] sm:$0xf] %v3690_v20  ;;  %v3446_v9 = vshrl.u32 %v6832_v35, 16  ;;  %v3449_v54 = vshll.u32 %v6832_v35, 16  ;;  %v5156_v57 = vshrl.u32 %v9278_v0, 16  ;;  %v5160_v44 = vrot.slane %v5158_v40, 1 }
 0x217   : > { %v3683_v50 = vsel %vm8940_vm9, %v3443_v55, %v3682_v37  ;;  %v3468_v4 = vor.u32 %v3466_v48, %v3465_v32  ;;  %v3470_v7 = vrot.slane %v3465_v32, 4  ;;  %v9370_v1 = vcombine.low %v3752_v52, %v9295_v43 }
 0x218   : > { %3684 = vst [vmem:[#allocation3 + $0x6c] sm:$0xf] %v3683_v50  ;;  %v3448_v36 = vrot.slane %v3446_v9, 7  ;;  %v9354_v46 = vpop.permute.xlu1 %4493  ;;  %4393 = vrot.lane.b32.xlu1 %v4354_v17, %s7334_s29  ;;  %v4666_v17 = vsel %vm10306_vm15, %v4661_v21, %v4665_v22  ;;  %v5146_v58 = vshll.u32 %v9307_v51, 16  ;;  %v5161_v56 = vor.u32 %v5160_v44, %v5156_v57 }
 0x219   : > { %v9356_v38 = vpop.permute.xlu0 %5003  ;;  %v3469_v24 = vsel %vm7515_vm7, %v3461_v62, %v3468_v4  ;;  %v3694_v31 = vsel %vm8951_vm4, %v3470_v7, %v3693_v42  ;;  %v4161_v62 = vor.u32 %v4160_v49, %v4156_v34  ;;  %v5436_v43 = vsel %vm2597_vm12, %v8825_v53, %v9319_v19 }
 0x21a   : > { %5413 = vrot.lane.b32.xlu0 %v5372_v30, %s7338_s20  ;;  %3692 = vst.msk [vmem:[#allocation3 + $0x7c] sm:$0xf] %vm3149_vm0, %v3469_v24  ;;  %3695 = vst [vmem:[#allocation3 + $0x80] sm:$0x1] %v3694_v31  ;;  %v3451_v41 = vor.u32 %v3449_v54, %v3448_v36  ;;  %v3453_v12 = vrot.slane %v3448_v36, 4  ;;  %v4863_v30 = vsel %vm1459_vm6, %v4861_v13, %v4862_v10  ;;  %v5148_v21 = vrot.slane %v5146_v58, 1 }
 0x21b   : > { %v4165_v37 = vrot.slane %v4163_v8, 1  ;;  %v5165_v35 = vrot.slane %v5163_v6, 1  ;;  %v5144_v22 = vshrl.u32 %v9307_v51, 16  ;;  %v4646_v10 = vshll.u32 %v9305_v27, 16 }
 0x21c   : > { %v3452_v0 = vsel %vm7515_vm7, %v3444_v11, %v3451_v41  ;;  %v3687_v39 = vsel %vm8951_vm4, %v3453_v12, %v3686_v63  ;;  %v9379_v47 = vpop.permute.xlu1 %4893  ;;  %4777 = vrot.lane.b32.xlu1 %v4666_v17, %s7333_s28  ;;  %v5151_v32 = vshll.u32 %v9314_v61, 16  ;;  %v4644_v48 = vshrl.u32 %v9305_v27, 16 }
 0x21d   : > { %v4492_v29 = vpop.permute.xlu0 %4491  ;;  %3685 = vst.msk [vmem:[#allocation3 + $0x70] sm:$0xf] %vm3149_vm0, %v3452_v0  ;;  %3688 = vst [vmem:[#allocation3 + $0x74] sm:$0x1] %v3687_v39  ;;  %v3820_v20 = vld [vmem:[#allocation3 + $0x78] sm:$0xf]  ;;  %v4166_v9 = vsel %vm10307_vm3, %v4161_v62, %v4165_v37  ;;  %v5166_v13 = vsel %vm10308_vm8, %v5161_v56, %v5165_v35  ;;  %v5149_v50 = vor.u32 %v5148_v21, %v5144_v22 }
 0x21e   : > { %4903 = vrot.lane.b32.xlu0 %v4863_v30, %s7337_s14  ;;  %v3883_v55 = vld [vmem:[#allocation3 + $0x78] sm:$0xf]  ;;  %v4651_v42 = vshll.u32 %v9335_v2, 16  ;;  %v4146_v53 = vshll.u32 %v9370_v1, 16  ;;  %v4648_v34 = vrot.slane %v4646_v10, 1  ;;  %v4144_v51 = vshrl.u32 %v9370_v1, 16  ;;  %vm10311_vm8 = vmmov %vm10291_vm2 }
 0x21f   : > { %v3923_v28 = vld [vmem:[#allocation3 + $0x78] sm:$0xe]  ;;  %v4151_v7 = vshll.u32 %v9309_v14, 16  ;;  %v5468_v31 = vsel %vm10277_vm14, %v5436_v43, %v9341_v3  ;;  %v5153_v12 = vrot.slane %v5151_v32, 1  ;;  %v3818_v17 = vld [vmem:[#allocation3 + $0x6c] sm:$0xf] }
 0x220   : > { %v9393_v19 = vpop.permute.xlu1 %4381  ;;  %v3859_v11 = vld [vmem:[#allocation3 + $0x78] sm:$0xe]  ;;  %4267 = vrot.lane.b32.xlu1 %v4166_v9, %s7328_s23  ;;  %v4148_v4 = vrot.slane %v4146_v53, 1  ;;  %v4649_v49 = vor.u32 %v4648_v34, %v4644_v48  ;;  %v4653_v52 = vrot.slane %v4651_v42, 1  ;;  %v3881_v30 = vld [vmem:[#allocation3 + $0x6c] sm:$0xf]  ;;  %v9423_v62 = vsel %vm10276_vm1, %v5468_v31, %v4492_v29 }
 0x221   : > { %v9400_v27 = vpop.permute.xlu0 %5403  ;;  %v3821_v61 = vld [vmem:[#allocation3 + $0x7c] sm:$0xf]  ;;  %v9407_v40 = vld [vmem:[#allocation3 + $0x80] ss:$0 sps:$4 sm:$0x11]   ;;  %v4153_v3 = vrot.slane %v4151_v7, 1  ;;  %v5154_v43 = vsel %vm10309_vm5, %v5149_v50, %v5153_v12 }
 0x222   : > { %5287 = vrot.lane.b32.xlu0 %v5166_v13, %s7339_s21  ;;  %v3884_v2 = vld [vmem:[#allocation3 + $0x7c] sm:$0xf]  ;;  %v9403_v36 = vcombine.low %v3820_v20, %v3821_v61  ;;  %v4149_v63 = vor.u32 %v4148_v4, %v4144_v51  ;;  %v9411_v8 = vld [vmem:[#allocation3 + $0x80] ss:$0 sps:$4 sm:$0x11]   ;;  %v6655_v57 = vcombine.low %v3859_v11, %v3821_v61  ;;  %v5380_v6 = vrot.slane %v9407_v40, 1 }
 0x223   : > { %v9405_v54 = vcombine.low %v3883_v55, %v3884_v2  ;;  %v6702_v24 = vcombine.low %v3923_v28, %v3884_v2  ;;  %v3759_v39 = vld [vmem:[#allocation3 + $0x7c] sm:$0xf]  ;;  %v4654_v21 = vsel %vm10291_vm2, %v4649_v49, %v4653_v52  ;;  %v4871_v37 = vrot.slane %v9411_v8, 1  ;;  %v3796_v35 = vld [vmem:[#allocation3 + $0x78] sm:$0xe] }
 0x224   : > { %v9413_v41 = vpop.permute.xlu1 %4765  ;;  %v9415_v14 = vld [vmem:[#allocation3 + $0x70] sm:$0xf]  ;;  %4509 = vrot.lane.b32.xlu1 %v9403_v36, %s7331_s26  ;;  %v4870_v0 = vrot.slane %v6655_v57, 1  ;;  %v4154_v20 = vsel %vm10310_vm11, %v4149_v63, %v4153_v3  ;;  %v3758_v55 = vld [vmem:[#allocation3 + $0x78] sm:$0xf]  ;;  %v6608_v48 = vcombine.low %v3796_v35, %v3759_v39  ;;  %v4682_v29 = vshll.u32 %v9403_v36, 16  ;;  %vm10312_vm11 = vmmov %vm10311_vm8 }
 0x225   : > { %v5379_v44 = vrot.slane %v6702_v24, 1  ;;  %v3882_v58 = vld [vmem:[#allocation3 + $0x70] sm:$0xf]  ;;  %v9428_v22 = vpop.permute.xlu0 %4383  ;;  %v9432_v32 = vld [vmem:[#allocation3 + $0x80] ss:$0 sps:$4 sm:$0x11]   ;;  %v9436_v9 = vcombine.low %v3818_v17, %v9415_v14  ;;  %v9448_v50 = vcombine.low %v3758_v55, %v3759_v39 }
 0x226   : > { %5019 = vrot.lane.b32.xlu0 %v9405_v54, %s7336_s13  ;;  %v6915_v56 = vpop.f32.mrf.mxu0  ;;  %v9438_v13 = vcombine.low %v3881_v30, %v3882_v58  ;;  %v3757_v51 = vld [vmem:[#allocation3 + $0x70] sm:$0xf]  ;;  %v4680_v28 = vshrl.u32 %v9403_v36, 16  ;;  %v9446_v2 = vsel %vm1459_vm6, %v4870_v0, %v4871_v37  ;;  %v3756_v4 = vld [vmem:[#allocation3 + $0x6c] sm:$0xf]  ;;  %v4361_v31 = vrot.slane %v6608_v48, 1 }
 0x227   : > { %v3075_v10 = vsub.f32 %v6915_v56, %v9230_v45  ;;  %v5381_v34 = vsel %vm1459_vm6, %v5379_v44, %v5380_v6  ;;  %v3795_v7 = vld [vmem:[#allocation3 + $0x6c] sm:$0xe]  ;;  %v9450_v49 = vld [vmem:[#allocation3 + $0x74] ss:$0 sps:$4 sm:$0x11]   ;;  %v4362_v63 = vrot.slane %v9432_v32, 1 }
 0x228   : > { %v4256_v42 = vpop.permute.xlu1 %4255  ;;  %v2999_v53 = vpop.f32.mrf.mxu0  ;;  %5285 = vrot.lane.b32.xlu1 %v5154_v43, %s7339_s21  ;;  %v6607_v57 = vcombine.low %v3795_v7, %v3757_v51  ;;  %v3922_v12 = vld [vmem:[#allocation3 + $0x6c] sm:$0xe]  ;;  %v9459_v3 = vld [vmem:[#allocation3 + $0x74] ss:$0 sps:$4 sm:$0x11]   ;;  %v4684_v17 = vrot.slane %v4682_v29, 1 }
 0x229   : > { %v3107_v11 = vmax.f32 %v3075_v10, 0.0  ;;  %v3073_v61 = vsub.f32 %v2999_v53, %v9230_v45  ;;  %v9454_v24 = vsel %vm2597_vm12, %v8998_v26, %v4256_v42  ;;  %v4359_v39 = vrot.slane %v9450_v49, 1  ;;  %v9465_v37 = vpop.permute.xlu0 %4891  ;;  %v9474_v42 = vld [vmem:[#allocation3 + $0x74] ss:$0 sps:$4 sm:$0x11]  }
 0x22a   : > { %4775 = vrot.lane.b32.xlu0 %v4654_v21, %s7333_s28  ;;  %v6916_v36 = vpop.f32.mrf.mxu0  ;;  %v4358_v0 = vrot.slane %v6607_v57, 1  ;;  %v9462_v26 = vcombine.low %v3756_v4, %v3757_v51  ;;  %v6701_v56 = vcombine.low %v3922_v12, %v3882_v58  ;;  %v4363_v55 = vsel %vm1459_vm6, %v4361_v31, %v4362_v63 }
 0x22b   : > { %v3139_v52 = vadd.f32 %v9230_v45, %v3107_v11  ;;  %v3105_v44 = vmax.f32 %v3073_v61, 0.0  ;;  %v3076_v6 = vsub.f32 %v6916_v36, %v9230_v45  ;;  %v5377_v29 = vrot.slane %v9459_v3, 1 }
 0x22c   : > { %v3002_v30 = vpop.f32.mrf.mxu0  ;;  %4265 = vrot.lane.b32.xlu1 %v4154_v20, %s7328_s23  ;;  %v5376_v48 = vrot.slane %v6701_v56, 1  ;;  %v4687_v58 = vshll.u32 %v9411_v8, 16  ;;  %v4685_v61 = vor.u32 %v4684_v17, %v4680_v28  ;;  %v3858_v20 = vld [vmem:[#allocation3 + $0x6c] sm:$0xe]  ;;  %v4360_v36 = vsel %vm1459_vm6, %v4358_v0, %v4359_v39 }
 0x22d   : > { %v6837_v43 = vpack.c.bf16 %v3139_v52, %v3139_v52  ;;  %v3137_v21 = vadd.f32 %v9230_v45, %v3105_v44  ;;  %v3108_v35 = vmax.f32 %v3076_v6, 0.0  ;;  %v3074_v10 = vsub.f32 %v3002_v30, %v9230_v45  ;;  %v3703_v52 = vld [vmem:[#allocation3 + $0x90] sm:$0xf]  ;;  %v9485_v56 = vpop.permute.xlu0 %5275 }
 0x22e   : > { %4507 = vrot.lane.b32.xlu0 %v9436_v9, %s7331_s26  ;;  %v6654_v57 = vcombine.low %v3858_v20, %v9415_v14  ;;  %v5378_v8 = vsel %vm1459_vm6, %v5376_v48, %v5377_v29  ;;  %v4689_v44 = vrot.slane %v4687_v58, 1  ;;  %v4868_v17 = vrot.slane %v9474_v42, 1 }
 0x22f   : > { %v3489_v53 = vshrl.u32 %v6837_v43, 16  ;;  %v6835_v51 = vpack.c.bf16 %v3137_v21, %v3137_v21  ;;  %v3140_v11 = vadd.f32 %v9230_v45, %v3108_v35  ;;  %v3492_v4 = vshll.u32 %v6837_v43, 16  ;;  %v3696_v21 = vld [vmem:[#allocation3 + $0x84] sm:$0xf] }
 0x230   : > { %v3106_v7 = vmax.f32 %v3074_v10, 0.0  ;;  %5017 = vrot.lane.b32.xlu1 %v9438_v13, %s7336_s13  ;;  %v4867_v6 = vrot.slane %v6654_v57, 1  ;;  %vm5596_vm15 = vcmask 392192   ;;  %vm5629_vm3 = vcmask 457728  }
 0x231   : > { %v3491_v31 = vrot.slane %v3489_v53, 7  ;;  %v3472_v63 = vshrl.u32 %v6835_v51, 16  ;;  %v6838_v12 = vpack.c.bf16 %v3140_v11, %v3140_v11  ;;  %v3475_v0 = vshll.u32 %v6835_v51, 16  ;;  %v3707_v11 = vld [vmem:[#allocation3 + $0x98] sm:$0x1] }
 0x232   : > { %5419 = vrot.lane.b32.xlu0 %v5381_v34, %s7338_s20  ;;  %v3138_v28 = vadd.f32 %v9230_v45, %v3106_v7  ;;  %v4690_v10 = vsel %vm10311_vm8, %v4685_v61, %v4689_v44  ;;  %vm5662_vm5 = vcmask 523264   ;;  %v4869_v53 = vsel %vm1459_vm6, %v4867_v6, %v4868_v17  ;;  %v3700_v6 = vld [vmem:[#allocation3 + $0x8c] sm:$0x1] }
 0x233   : > { %v3494_v30 = vor.u32 %v3492_v4, %v3491_v31  ;;  %v3474_v14 = vrot.slane %v3472_v63, 7  ;;  %v3497_v39 = vshrl.u32 %v6838_v12, 16  ;;  %v3495_v43 = vrot.slane %v3491_v31, 4 }
 0x234   : > { %v3500_v34 = vshll.u32 %v6838_v12, 16  ;;  %v6836_v35 = vpack.c.bf16 %v3138_v28, %v3138_v28  ;;  %4909 = vrot.lane.b32.xlu1 %v9446_v2, %s7337_s14  ;;  %v9497_v61 = vsel %vm10277_vm14, %v9454_v24, %v9428_v22  ;;  %v4182_v4 = vshll.u32 %v9448_v50, 16 }
 0x235   : > { %v3704_v48 = vsel %vm8940_vm9, %v3494_v30, %v3703_v52  ;;  %v3477_v29 = vor.u32 %v3475_v0, %v3474_v14  ;;  %v3499_v58 = vrot.slane %v3497_v39, 7  ;;  %v3478_v51 = vrot.slane %v3474_v14, 4 }
 0x236   : > { %4399 = vrot.lane.b32.xlu0 %v4363_v55, %s7334_s29  ;;  %3705 = vst [vmem:[#allocation3 + $0x90] sm:$0xf] %v3704_v48  ;;  %v3480_v20 = vshrl.u32 %v6836_v35, 16  ;;  %v4187_v63 = vshll.u32 %v9432_v32, 16  ;;  %v3483_v52 = vshll.u32 %v6836_v35, 16  ;;  %vm5807_vm2 = vcmask 584704  }
 0x237   : > { %v3697_v7 = vsel %vm8940_vm9, %v3477_v29, %v3696_v21  ;;  %v3502_v2 = vor.u32 %v3500_v34, %v3499_v58  ;;  %v3504_v57 = vrot.slane %v3499_v58, 4  ;;  %v9502_v55 = vpop.permute.xlu1 %4497  ;;  %v4184_v28 = vrot.slane %v4182_v4, 1 }
 0x238   : > { %v9504_v31 = vpop.permute.xlu0 %5007  ;;  %3698 = vst [vmem:[#allocation3 + $0x84] sm:$0xf] %v3697_v7  ;;  %v3482_v12 = vrot.slane %v3480_v20, 7  ;;  %v5182_v22 = vshll.u32 %v9405_v54, 16  ;;  %4397 = vrot.lane.b32.xlu1 %v4360_v36, %s7334_s29  ;;  %v4180_v32 = vshrl.u32 %v9448_v50, 16  ;;  %v5187_v17 = vshll.u32 %v9407_v40, 16 }
 0x239   : > { %v3503_v24 = vsel %vm7515_vm7, %v3495_v43, %v3502_v2  ;;  %v3708_v44 = vsel %vm8951_vm4, %v3504_v57, %v3707_v11  ;;  %v5180_v0 = vshrl.u32 %v9405_v54, 16  ;;  %v4189_v35 = vrot.slane %v4187_v63, 1 }
 0x23a   : > { %5417 = vrot.lane.b32.xlu0 %v5378_v8, %s7338_s20  ;;  %3706 = vst.msk [vmem:[#allocation3 + $0x94] sm:$0xf] %vm3149_vm0, %v3503_v24  ;;  %3709 = vst [vmem:[#allocation3 + $0x98] sm:$0x1] %v3708_v44  ;;  %v3485_v30 = vor.u32 %v3483_v52, %v3482_v12  ;;  %v3487_v14 = vrot.slane %v3482_v12, 4  ;;  %v5184_v39 = vrot.slane %v5182_v22, 1  ;;  %v4185_v34 = vor.u32 %v4184_v28, %v4180_v32 }
 0x23b   : > { %v4254_v43 = vpop.permute.xlu1 %4253  ;;  %v5170_v36 = vshll.u32 %v9438_v13, 16  ;;  %v5175_v8 = vshll.u32 %v9459_v3, 16  ;;  %v5168_v4 = vshrl.u32 %v9438_v13, 16  ;;  %v4668_v63 = vshrl.u32 %v9436_v9, 16  ;;  %v7239_v13 = vld [vmem:[%s10269_s2 + $0x20] ss:$0 sps:$4 sm:$0xff]  }
 0x23c   : > { %v4764_v21 = vpop.permute.xlu0 %4763  ;;  %v3486_v48 = vsel %vm7515_vm7, %v3478_v51, %v3485_v30  ;;  %v3701_v40 = vsel %vm8951_vm4, %v3487_v14, %v3700_v6  ;;  %v5438_v29 = vsel %vm2597_vm12, %v9030_v25, %v4254_v43  ;;  %4781 = vrot.lane.b32.xlu1 %v4690_v10, %s7333_s28  ;;  %v5189_v51 = vrot.slane %v5187_v17, 1 }
 0x23d   : > { %v5532_v54 = vsel %vm2795_vm10, %v9423_v62, %v4764_v21  ;;  %3699 = vst.msk [vmem:[#allocation3 + $0x88] sm:$0xf] %vm3149_vm0, %v3486_v48  ;;  %3702 = vst [vmem:[#allocation3 + $0x8c] sm:$0x1] %v3701_v40  ;;  %v5470_v58 = vsel %vm10277_vm14, %v5438_v29, %v9393_v19  ;;  %v5172_v11 = vrot.slane %v5170_v36, 1  ;;  %v5185_v20 = vor.u32 %v5184_v39, %v5180_v0 }
 0x23e   : > { %v5565_v3 = vsel %vm5563_vm13, %v5532_v54, %v9465_v37  ;;  %4907 = vrot.lane.b32.xlu0 %v4869_v53, %s7337_s14  ;;  %v5502_v25 = vsel %vm10276_vm1, %v5470_v58, %v9354_v46  ;;  %v4190_v53 = vsel %vm10312_vm11, %v4185_v34, %v4189_v35  ;;  %v5177_v2 = vrot.slane %v5175_v8, 1  ;;  %v3824_v44 = vld [vmem:[#allocation3 + $0x90] sm:$0xf] }
 0x23f   : > { %v5598_v62 = vsel %vm5596_vm15, %v5565_v3, %v9356_v38  ;;  %v5534_v37 = vsel %vm2795_vm10, %v5502_v25, %v9413_v41  ;;  %v5006_v10 = vpop.permute.xlu1 %5005  ;;  %v5190_v57 = vsel %vm10311_vm8, %v5185_v20, %v5189_v51  ;;  %v5173_v38 = vor.u32 %v5172_v11, %v5168_v4  ;;  %v3924_v24 = vld [vmem:[#allocation3 + $0x84] sm:$0xe] }
 0x240   : > { %v5631_v19 = vsel %vm5629_vm3, %v5598_v62, %v9485_v56  ;;  %v4496_v7 = vpop.permute.xlu0 %4495  ;;  %v5567_v41 = vsel %vm5563_vm13, %v5534_v37, %v9379_v47  ;;  %4271 = vrot.lane.b32.xlu1 %v4190_v53, %s7328_s23  ;;  %vm5988_vm11 = vcmask 588800   ;;  %v4675_v28 = vshll.u32 %v9474_v42, 16  ;;  %v9568_v47 = vld [vmem:[%s10269_s2 + $0x18] sm:$0xff]  }
 0x241   : > { %v5664_v46 = vsel %vm5662_vm5, %v5631_v19, %v9400_v27  ;;  %v4670_v27 = vshll.u32 %v9436_v9, 16  ;;  %v9559_v52 = vsel %vm10276_vm1, %v9497_v61, %v4496_v7  ;;  %v4170_v22 = vshll.u32 %v9462_v26, 16  ;;  %v9563_v6 = vld [vmem:[#allocation3 + $0x94] sm:$0xf]  ;;  %v3822_v30 = vld [vmem:[#allocation3 + $0x84] sm:$0xf] }
 0x242   : > { %v6710_v56 = vcombine.low %v5664_v46, %v5664_v46  ;;  %v6711_v12 = vcombine.high %v5664_v46, %v5664_v46  ;;  %5291 = vrot.lane.b32.xlu0 %v5190_v57, %s7339_s21  ;;  %v4168_v32 = vshrl.u32 %v9462_v26, 16  ;;  %v4175_v17 = vshll.u32 %v9450_v49, 16  ;;  %v9578_v14 = vld [vmem:[#allocation3 + $0x84] sm:$0xe]  ;;  %v9591_v29 = vld [vmem:[#allocation3 + $0x94] sm:$0xf] }
 0x243   : > { %v9572_v9 = vpop.permute.xlu1 %4897  ;;  %v4672_v42 = vrot.slane %v4670_v27, 1  ;;  %vm6037_vm8 = vcmask 1043456   ;;  %v9581_v0 = vsel %vm5596_vm15, %v5567_v41, %v5006_v10  ;;  %vm10313_vm1 = vsmask.f32 7424  ;;  %v3797_v11 = vld [vmem:[#allocation3 + $0x84] sm:$0xe] }
 0x244   : > { %5808 = vst.msk [vmem:[#allocation4] sm:$0xf] %vm5807_vm2, %v6710_v56  ;;  %5809 = vst.msk [vmem:[#allocation4 + $0x4] sm:$0xf] %vm5807_vm2, %v6711_v12  ;;  %v9574_v61 = vpop.permute.xlu0 %5407  ;;  %v5178_v39 = vsel %vm10313_vm1, %v5173_v38, %v5177_v2  ;;  %v4677_v43 = vrot.slane %v4675_v28, 1  ;;  %v4172_v21 = vrot.slane %v4170_v22, 1  ;;  %6968 = vmatprep.subr.msk.bf16.mxu1 %vm6037_vm8, %v7239_v13  ;;  %v9589_v40 = vcombine.low %v3824_v44, %v9563_v6 }
 0x245   : > { %v3886_v34 = vld [vmem:[#allocation3 + $0x88] sm:$0xf]  ;;  %5289 = vrot.lane.b32.xlu1 %v5178_v39, %s7339_s21  ;;  %v4673_v35 = vor.u32 %v4672_v42, %v4668_v63  ;;  %v4177_v36 = vrot.slane %v4175_v17, 1  ;;  %v9586_v8 = vld [vmem:[#allocation3 + $0x8c] ss:$0 sps:$4 sm:$0x11]   ;;  %vm10314_vm14 = vmmov %vm10313_vm1 }
 0x246   : > { %v6703_v49 = vcombine.low %v3924_v24, %v3886_v34  ;;  %v3823_v48 = vld [vmem:[#allocation3 + $0x88] sm:$0xf]  ;;  %v6919_v54 = vpop.f32.mrf.mxu0  ;;  %v4173_v58 = vor.u32 %v4172_v21, %v4168_v32  ;;  %v9595_v51 = vld [vmem:[#allocation3 + $0x8c] ss:$0 sps:$4 sm:$0x11]   ;;  %v6039_v62 = vsel %vm6037_vm8, %v7239_v13, 0  ;;  %vm10316_vm8 = vmmov %vm10313_vm1 }
 0x247   : > { %v9593_v3 = vcombine.low %v3822_v30, %v3823_v48  ;;  %v6656_v25 = vcombine.low %v9578_v14, %v3823_v48  ;;  %v4678_v20 = vsel %vm10313_vm1, %v4673_v35, %v4677_v43  ;;  %v9600_v4 = vpop.permute.xlu1 %4385  ;;  %v3079_v19 = vsub.f32 %v6919_v54, %v9230_v45  ;;  %v3761_v53 = vld [vmem:[#allocation3 + $0x88] sm:$0xf]  ;;  %6926 = vmatpush3.bf16.msra.mxu1 %v6039_v62  ;;  %v3887_v2 = vld [vmem:[#allocation3 + $0x90] sm:$0xf]  ;;  %v3885_v22 = vld [vmem:[#allocation3 + $0x84] sm:$0xf] }
 0x248   : > { %v9603_v37 = vpop.permute.xlu0 %4387  ;;  %v5382_v10 = vrot.slane %v6703_v49, 1  ;;  %v5383_v7 = vrot.slane %v9586_v8, 1  ;;  %v9606_v46 = vld [vmem:[#allocation3 + $0x90] sm:$0xe]  ;;  %4779 = vrot.lane.b32.xlu0 %v4678_v20, %s7333_s28  ;;  %v4178_v57 = vsel %vm10314_vm14, %v4173_v58, %v4177_v36  ;;  %v3015_v38 = vpop.f32.mrf.mxu0  ;;  %v4699_v45 = vshll.u32 %v9595_v51, 16  ;;  %6927 = vmatprep.subr.bf16.mxu1 %v9568_v47  ;;  %v7243_v44 = vld [vmem:[%s10269_s2 + $0x10] sm:$0xff]   ;;  %vm10315_vm14 = vmmov %vm10313_vm1 }
 0x249   : > { %v4692_v63 = vshrl.u32 %v9593_v3, 16  ;;  %v4694_v13 = vshll.u32 %v9593_v3, 16  ;;  %v9613_v56 = vld [vmem:[#allocation3 + $0x8c] ss:$0 sps:$4 sm:$0x11]   ;;  %v3111_v12 = vmax.f32 %v3079_v19, 0.0  ;;  %4269 = vrot.lane.b32.xlu1 %v4178_v57, %s7328_s23  ;;  %v6609_v24 = vcombine.low %v3797_v11, %v3761_v53 }
 0x24a   : > { %v9620_v41 = vld [vmem:[%s10270_s3] ss:$0 sm:$0xff]  ;;  %v5384_v28 = vsel %vm1459_vm6, %v5382_v10, %v5383_v7  ;;  %v6920_v42 = vpop.f32.mrf.mxu0  ;;  %v9627_v32 = vcombine.low %v3885_v22, %v3886_v34  ;;  %v9630_v14 = vcombine.low %v3887_v2, %v9591_v29  ;;  %v6704_v39 = vcombine.low %v9606_v46, %v9591_v29  ;;  %v7246_v62 = vld [vmem:[%s10269_s2 + $0x8] sm:$0xff]   ;;  %v3760_v57 = vld [vmem:[#allocation3 + $0x84] sm:$0xf] }
 0x24b   : > { %v3077_v27 = vsub.f32 %v3015_v38, %v9620_v41  ;;  %v7232_v17 = vld [vmem:[#allocation4] sm:$0xff]   ;;  %v4696_v30 = vrot.slane %v4694_v13, 1  ;;  %v3143_v43 = vadd.f32 %v9620_v41, %v3111_v12  ;;  %v3080_v35 = vsub.f32 %v6920_v42, %v9620_v41  ;;  %6928 = vmatpush3.bf16.msra.mxu1 %v9568_v47  ;;  %v9645_v20 = vld [vmem:[#allocation3 + $0x90] sm:$0xe]  ;;  %v9648_v47 = vpop.permute.xlu1 %4769 }
 0x24c   : > { %v9636_v36 = vpop.permute.xlu0 %5405  ;;  %v4701_v49 = vrot.slane %v4699_v45, 1  ;;  %5421 = vrot.lane.b32.xlu0 %v5384_v28, %s7338_s20  ;;  %v3018_v34 = vpop.f32.mrf.mxu0  ;;  %6935 = vmatprep.mubr.msk.bf16.mxu1 %vm5988_vm11, %v7232_v17  ;;  %v4364_v54 = vrot.slane %v6609_v24, 1  ;;  %v4365_v58 = vrot.slane %v9613_v56, 1  ;;  %v4873_v11 = vrot.slane %v6656_v25, 1  ;;  %v7247_v17 = vld [vmem:[%s10269_s2] sm:$0xff]  }
 0x24d   : > { %v3109_v21 = vmax.f32 %v3077_v27, 0.0  ;;  %v4697_v48 = vor.u32 %v4696_v30, %v4692_v63  ;;  %v6841_v19 = vpack.c.bf16 %v3143_v43, %v3143_v43  ;;  %v3112_v7 = vmax.f32 %v3080_v35, 0.0  ;;  %5021 = vrot.lane.b32.xlu1 %v9627_v32, %s7336_s13  ;;  %6929 = vmatprep.subr.bf16.mxu1 %v7243_v44  ;;  %v3717_v35 = vld [vmem:[#allocation3 + $0xa8] sm:$0xf] }
 0x24e   : > { %v3078_v2 = vsub.f32 %v3018_v34, %v9620_v41  ;;  %v9654_v38 = vcombine.low %v3760_v57, %v3761_v53  ;;  %v4874_v63 = vrot.slane %v9595_v51, 1  ;;  %v6657_v13 = vcombine.low %v9645_v20, %v9563_v6  ;;  %v3710_v57 = vld [vmem:[#allocation3 + $0x9c] sm:$0xf]  ;;  %v9754_v46 = vld [vmem:[#allocation3 + $0x98] ss:$0 sps:$4 sm:$0x11]  }
 0x24f   : > { %v3141_v10 = vadd.f32 %v9620_v41, %v3109_v21  ;;  %v4702_v25 = vsel %vm10315_vm14, %v4697_v48, %v4701_v49  ;;  %v3523_v45 = vshrl.u32 %v6841_v19, 16  ;;  %v3144_v27 = vadd.f32 %v9620_v41, %v3112_v7  ;;  %6930 = vmatpush3.bf16.msra.mxu1 %v7243_v44  ;;  %vm10317_vm14 = vmmov %vm10313_vm1 }
 0x250   : > { %v9660_v28 = vpop.permute.xlu0 %4895  ;;  %v4366_v22 = vsel %vm1459_vm6, %v4364_v54, %v4365_v58  ;;  %v3526_v24 = vshll.u32 %v6841_v19, 16  ;;  %v3110_v42 = vmax.f32 %v3078_v2, 0.0  ;;  %4511 = vrot.lane.b32.xlu0 %v9593_v3, %s7331_s26  ;;  %v5192_v53 = vshrl.u32 %v9627_v32, 16  ;;  %6931 = vmatprep.subr.bf16.mxu1 %v7246_v62  ;;  %v9675_v19 = vpop.permute.xlu1 %4259 }
 0x251   : > { %v6839_v12 = vpack.c.bf16 %v3141_v10, %v3141_v10  ;;  %v5194_v51 = vshll.u32 %v9627_v32, 16  ;;  %v3525_v30 = vrot.slane %v3523_v45, 7  ;;  %v6842_v21 = vpack.c.bf16 %v3144_v27, %v3144_v27  ;;  %4513 = vrot.lane.b32.xlu1 %v9589_v40, %s7331_s26 }
 0x252   : > { %v4875_v44 = vsel %vm1459_vm6, %v4873_v11, %v4874_v63  ;;  %v3142_v3 = vadd.f32 %v9620_v41, %v3110_v42  ;;  %v5199_v32 = vshll.u32 %v9586_v8, 16  ;;  %v4192_v7 = vshrl.u32 %v9654_v38, 16  ;;  %v9684_v42 = vld [vmem:[#allocation3 + $0x98] ss:$0 sps:$4 sm:$0x11]  }
 0x253   : > { %v3506_v43 = vshrl.u32 %v6839_v12, 16  ;;  %v3509_v49 = vshll.u32 %v6839_v12, 16  ;;  %v5196_v34 = vrot.slane %v5194_v51, 1  ;;  %v3528_v48 = vor.u32 %v3526_v24, %v3525_v30  ;;  %6932 = vmatpush3.bf16.msra.mxu1 %v7246_v62  ;;  %v3721_v51 = vld [vmem:[#allocation3 + $0xb0] sm:$0x1] }
 0x254   : > { %v3531_v58 = vshrl.u32 %v6842_v21, 16  ;;  %v9677_v10 = vpop.permute.xlu0 %5279  ;;  %v3529_v2 = vrot.slane %v3525_v30, 4  ;;  %v3534_v11 = vshll.u32 %v6842_v21, 16  ;;  %v6840_v63 = vpack.c.bf16 %v3142_v3, %v3142_v3  ;;  %4783 = vrot.lane.b32.xlu0 %v4702_v25, %s7333_s28  ;;  %6933 = vmatprep.subr.bf16.mxu1 %v7247_v17 }
 0x255   : > { %v3508_v54 = vrot.slane %v3506_v43, 7  ;;  %v5197_v45 = vor.u32 %v5196_v34, %v5192_v53  ;;  %v3718_v8 = vsel %vm8940_vm9, %v3528_v48, %v3717_v35  ;;  %4401 = vrot.lane.b32.xlu1 %v4366_v22, %s7334_s29  ;;  %v5201_v24 = vrot.slane %v5199_v32, 1 }
 0x256   : > { %v3533_v27 = vrot.slane %v3531_v58, 7  ;;  %3719 = vst [vmem:[#allocation3 + $0xa8] sm:$0xf] %v3718_v8  ;;  %v3514_v30 = vshrl.u32 %v6840_v63, 16  ;;  %v3517_v43 = vshll.u32 %v6840_v63, 16  ;;  %v4194_v21 = vshll.u32 %v9654_v38, 16  ;;  %v9689_v35 = vpop.permute.xlu1 %4501 }
 0x257   : > { %v3511_v12 = vor.u32 %v3509_v49, %v3508_v54  ;;  %v3512_v62 = vrot.slane %v3508_v54, 4  ;;  %v4199_v22 = vshll.u32 %v9613_v56, 16  ;;  %6934 = vmatpush3.bf16.msra.mxu1 %v7247_v17  ;;  %v5202_v32 = vsel %vm10316_vm8, %v5197_v45, %v5201_v24 }
 0x258   : > { %v3536_v53 = vor.u32 %v3534_v11, %v3533_v27  ;;  %v3538_v3 = vrot.slane %v3533_v27, 4  ;;  %v9691_v49 = vpop.permute.xlu0 %5011  ;;  %v3516_v34 = vrot.slane %v3514_v30, 7  ;;  %4911 = vrot.lane.b32.xlu0 %v4875_v44, %s7337_s14  ;;  %v4196_v48 = vrot.slane %v4194_v21, 1  ;;  %v3714_v11 = vld [vmem:[#allocation3 + $0xa4] sm:$0x1] }
 0x259   : > { %v3711_v25 = vsel %vm8940_vm9, %v3511_v12, %v3710_v57  ;;  %v5206_v54 = vshll.u32 %v9630_v14, 16  ;;  %5293 = vrot.lane.b32.xlu1 %v5202_v32, %s7339_s21  ;;  %v5204_v56 = vshrl.u32 %v9630_v14, 16  ;;  %v5211_v17 = vshll.u32 %v9684_v42, 16  ;;  %v9705_v12 = vld [vmem:[#allocation3 + $0x98] ss:$0 sps:$4 sm:$0x11]  }
 0x25a   : > { %3712 = vst [vmem:[#allocation3 + $0x9c] sm:$0xf] %v3711_v25  ;;  %v3537_v58 = vsel %vm7515_vm7, %v3529_v2, %v3536_v53  ;;  %v3722_v57 = vsel %vm8951_vm4, %v3538_v3, %v3721_v51  ;;  %v3519_v44 = vor.u32 %v3517_v43, %v3516_v34  ;;  %v3521_v63 = vrot.slane %v3516_v34, 4  ;;  %v5278_v2 = vpop.permute.xlu1 %5277 }
 0x25b   : > { %3720 = vst.msk [vmem:[#allocation3 + $0xac] sm:$0xf] %vm3149_vm0, %v3537_v58  ;;  %3723 = vst [vmem:[#allocation3 + $0xb0] sm:$0x1] %v3722_v57  ;;  %v4197_v45 = vor.u32 %v4196_v48, %v4192_v7  ;;  %v5208_v8 = vrot.slane %v5206_v54, 1  ;;  %v4201_v24 = vrot.slane %v4199_v22, 1  ;;  %v5633_v7 = vsel %vm5629_vm3, %v9581_v0, %v5278_v2 }
 0x25c   : > { %v4768_v27 = vpop.permute.xlu0 %4767  ;;  %v5213_v51 = vrot.slane %v5211_v17, 1  ;;  %v4704_v30 = vshrl.u32 %v9589_v40, 16  ;;  %v4706_v21 = vshll.u32 %v9589_v40, 16  ;;  %v3520_v25 = vsel %vm7515_vm7, %v3512_v62, %v3519_v44  ;;  %5023 = vrot.lane.b32.xlu0 %v9630_v14, %s7336_s13  ;;  %v3763_v57 = vld [vmem:[#allocation3 + $0x94] sm:$0xf] }
 0x25d   : > { %v3715_v53 = vsel %vm8951_vm4, %v3521_v63, %v3714_v11  ;;  %v5536_v43 = vsel %vm2795_vm10, %v9559_v52, %v4768_v27  ;;  %3713 = vst.msk [vmem:[#allocation3 + $0xa0] sm:$0xf] %vm3149_vm0, %v3520_v25  ;;  %v5666_v40 = vsel %vm5662_vm5, %v5633_v7, %v9636_v36  ;;  %v4202_v3 = vsel %vm10313_vm1, %v4197_v45, %v4201_v24  ;;  %v3762_v63 = vld [vmem:[#allocation3 + $0x90] sm:$0xf] }
 0x25e   : > { %3716 = vst [vmem:[#allocation3 + $0xa4] sm:$0x1] %v3715_v53  ;;  %v5569_v62 = vsel %vm5563_vm13, %v5536_v43, %v9660_v28  ;;  %v5209_v22 = vor.u32 %v5208_v8, %v5204_v56  ;;  %v6712_v34 = vcombine.low %v5666_v40, %v5666_v40  ;;  %v6713_v14 = vcombine.high %v5666_v40, %v5666_v40  ;;  %v4258_v48 = vpop.permute.xlu1 %4257  ;;  %v3798_v45 = vld [vmem:[#allocation3 + $0x90] sm:$0xe] }
 0x25f   : > { %v5602_v0 = vsel %vm5596_vm15, %v5569_v62, %v9504_v31  ;;  %4273 = vrot.lane.b32.xlu1 %v4202_v3, %s7328_s23  ;;  %v4708_v52 = vrot.slane %v4706_v21, 1  ;;  %v5444_v32 = vsel %vm2597_vm12, %v9080_v33, %v9675_v19  ;;  %v4711_v58 = vshll.u32 %v9705_v12, 16 }
 0x260   : > { %v5635_v36 = vsel %vm5629_vm3, %v5602_v0, %v9677_v10  ;;  %v5214_v28 = vsel %vm10317_vm14, %v5209_v22, %v5213_v51  ;;  %v4500_v54 = vpop.permute.xlu0 %4499  ;;  %5810 = vst.msk [vmem:[#allocation4 + $0x8] sm:$0xf] %vm5807_vm2, %v6712_v34  ;;  %5811 = vst.msk [vmem:[#allocation4 + $0xc] sm:$0xf] %vm5807_vm2, %v6713_v14  ;;  %v5442_v33 = vsel %vm2597_vm12, %v9096_v60, %v4258_v48  ;;  %v5385_v10 = vrot.slane %v6704_v39, 1 }
 0x261   : > { %v5668_v31 = vsel %vm5662_vm5, %v5635_v36, %v9574_v61  ;;  %5295 = vrot.lane.b32.xlu0 %v5214_v28, %s7339_s21  ;;  %v4709_v19 = vor.u32 %v4708_v52, %v4704_v30  ;;  %vm10318_vm8 = vcmask 130048   ;;  %v4713_v44 = vrot.slane %v4711_v58, 1  ;;  %v3889_v2 = vld [vmem:[#allocation3 + $0x9c] sm:$0xf] }
 0x262   : > { %v6714_v11 = vcombine.low %v5668_v31, %v5668_v31  ;;  %v6715_v56 = vcombine.high %v5668_v31, %v5668_v31  ;;  %v5474_v17 = vsel %vm10318_vm8, %v5442_v33, %v9600_v4  ;;  %vm10319_vm1 = vcmask 195584   ;;  %vm10320_vm14 = vmmov %vm10318_vm8  ;;  %v3926_v51 = vld [vmem:[#allocation3 + $0x9c] sm:$0xe] }
 0x263   : > { %v5506_v61 = vsel %vm10319_vm1, %v5474_v17, %v9502_v55  ;;  %v5386_v8 = vrot.slane %v9684_v42, 1  ;;  %v4876_v60 = vrot.slane %v6657_v13, 1  ;;  %v4877_v29 = vrot.slane %v9705_v12, 1  ;;  %v9761_v55 = vpop.permute.xlu1 %5009  ;;  %v6923_v27 = vpop.f32.mrf.mxu0  ;;  %v3826_v48 = vld [vmem:[#allocation3 + $0x9c] sm:$0xf] }
 0x264   : > { %5812 = vst.msk [vmem:[#allocation4 + $0x10] sm:$0xf] %vm5807_vm2, %v6714_v11  ;;  %5813 = vst.msk [vmem:[#allocation4 + $0x14] sm:$0xf] %vm5807_vm2, %v6715_v56  ;;  %v5476_v4 = vsel %vm10320_vm14, %v5444_v32, %v9603_v37  ;;  %vm10321_vm8 = vsmask.f32 7424  ;;  %v9763_v42 = vpop.permute.xlu0 %5411  ;;  %v9765_v6 = vcombine.low %v3762_v63, %v3763_v57  ;;  %v6610_v20 = vcombine.low %v3798_v45, %v3763_v57 }
 0x265   : > { %v4714_v39 = vsel %vm10321_vm8, %v4709_v19, %v4713_v44  ;;  %v9768_v13 = vsel %vm10319_vm1, %v5476_v4, %v4500_v54  ;;  %v5387_v12 = vsel %vm1459_vm6, %v5385_v10, %v5386_v8  ;;  %v5538_v37 = vsel %vm2795_vm10, %v5506_v61, %v9648_v47  ;;  %v3890_v24 = vld [vmem:[#allocation3 + $0xa0] sm:$0xf]  ;;  %v7249_v53 = vld [vmem:[#allocation3 + $0xa4] ss:$0 sps:$4 sm:$0x11]   ;;  %v3031_v43 = vpop.f32.mrf.mxu0  ;;  %vm10322_vm14 = vmmov %vm10321_vm8 }
 0x266   : > { %4785 = vrot.lane.b32.xlu1 %v4714_v39, %s7333_s28  ;;  %5423 = vrot.lane.b32.xlu0 %v5387_v12, %s7338_s20  ;;  %v3083_v30 = vsub.f32 %v6923_v27, %v9620_v41  ;;  %v4878_v21 = vsel %vm1459_vm6, %v4876_v60, %v4877_v29  ;;  %v6673_v25 = vcombine.low %v3889_v2, %v3890_v24  ;;  %v4367_v40 = vrot.slane %v6610_v20, 1  ;;  %v9780_v22 = vld [vmem:[#allocation3 + $0xa0] sm:$0xf]  ;;  %v3764_v17 = vld [vmem:[#allocation3 + $0x9c] sm:$0xf]  ;;  %vm10323_vm1 = vmmov %vm10321_vm8 }
 0x267   : > { %v6705_v7 = vcombine.low %v3926_v51, %v3890_v24  ;;  %v4368_v62 = vrot.slane %v9754_v46, 1  ;;  %v4204_v3 = vshrl.u32 %v9765_v6, 16  ;;  %v4206_v47 = vshll.u32 %v9765_v6, 16  ;;  %v9783_v0 = vpop.permute.xlu1 %4901  ;;  %v7250_v28 = vld [vmem:[#allocation4 + $0x8] sm:$0xff]   ;;  %v6924_v54 = vpop.f32.mrf.mxu0 }
 0x268   : > { %v3115_v34 = vmax.f32 %v3083_v30, 0.0  ;;  %v3081_v14 = vsub.f32 %v3031_v43, %v9620_v41  ;;  %v9785_v52 = vpop.permute.xlu0 %4391  ;;  %v5389_v36 = vrot.slane %v7249_v53, 1  ;;  %v5216_v58 = vshrl.u32 %v6673_v25, 16  ;;  %6936 = vmatmul.mubr.msk.bf16.vlgmr.msra.gmra.mxu1 %vm5988_vm11, %v7250_v28  ;;  %v9793_v44 = vld [vmem:[#allocation3 + $0xa0] sm:$0xf] }
 0x269   : > { %v5388_v32 = vrot.slane %v6705_v7, 1  ;;  %v5218_v31 = vshll.u32 %v6673_v25, 16  ;;  %v5223_v33 = vshll.u32 %v7249_v53, 16  ;;  %v4211_v19 = vshll.u32 %v9754_v46, 16  ;;  %v3034_v45 = vpop.f32.mrf.mxu0  ;;  %v3799_v30 = vld [vmem:[#allocation3 + $0x9c] sm:$0xe] }
 0x26a   : > { %4913 = vrot.lane.b32.xlu1 %v4878_v21, %s7337_s14  ;;  %v3147_v10 = vadd.f32 %v9620_v41, %v3115_v34  ;;  %v3113_v57 = vmax.f32 %v3081_v14, 0.0  ;;  %v3084_v11 = vsub.f32 %v6924_v54, %v9620_v41  ;;  %v9797_v63 = vsel %vm5563_vm13, %v5538_v37, %v9572_v9  ;;  %v9810_v12 = vld [vmem:[#allocation3 + $0xa4] ss:$0 sps:$4 sm:$0x11]   ;;  %v3731_v54 = vld [vmem:[#allocation3 + $0xc0] sm:$0xf] }
 0x26b   : > { %v5390_v56 = vsel %vm1459_vm6, %v5388_v32, %v5389_v36  ;;  %v7251_v61 = vld [vmem:[#allocation4 + $0x10] sm:$0xff]   ;;  %v5220_v8 = vrot.slane %v5218_v31, 1  ;;  %v4369_v60 = vsel %vm1459_vm6, %v4367_v40, %v4368_v62  ;;  %v9802_v29 = vcombine.low %v3826_v48, %v9780_v22  ;;  %v9806_v20 = vpop.permute.xlu1 %4389 }
 0x26c   : > { %5425 = vrot.lane.b32.xlu0 %v5390_v56, %s7338_s20  ;;  %v6845_v46 = vpack.c.bf16 %v3147_v10, %v3147_v10  ;;  %v3145_v4 = vadd.f32 %v9620_v41, %v3113_v57  ;;  %v3116_v39 = vmax.f32 %v3084_v11, 0.0  ;;  %v3082_v2 = vsub.f32 %v3034_v45, %v9620_v41  ;;  %v9808_v9 = vpop.permute.xlu0 %5409  ;;  %6939 = vmatprep.mubr.msk.bf16.mxu1 %vm5988_vm11, %v7251_v61  ;;  %v3724_v11 = vld [vmem:[#allocation3 + $0xb4] sm:$0xf]  ;;  %v9833_v61 = vld [vmem:[#allocation3 + $0xa4] ss:$0 sps:$4 sm:$0x11]  }
 0x26d   : > { %v5221_v37 = vor.u32 %v5220_v8, %v5216_v58  ;;  %v5225_v27 = vrot.slane %v5223_v33, 1  ;;  %v4208_v24 = vrot.slane %v4206_v47, 1  ;;  %v9815_v51 = vcombine.low %v3764_v17, %v9793_v44 }
 0x26e   : > { %5025 = vrot.lane.b32.xlu1 %v6673_v25, %s7336_s13  ;;  %v3557_v21 = vshrl.u32 %v6845_v46, 16  ;;  %v6843_v53 = vpack.c.bf16 %v3145_v4, %v3145_v4  ;;  %v3148_v7 = vadd.f32 %v9620_v41, %v3116_v39  ;;  %v6611_v43 = vcombine.low %v3799_v30, %v9793_v44 }
 0x26f   : > { %v3114_v40 = vmax.f32 %v3082_v2, 0.0  ;;  %v5226_v62 = vsel %vm10322_vm14, %v5221_v37, %v5225_v27  ;;  %v4209_v25 = vor.u32 %v4208_v24, %v4204_v3  ;;  %v4213_v34 = vrot.slane %v4211_v19, 1  ;;  %v9821_v28 = vpop.permute.xlu1 %4773  ;;  %v3735_v27 = vld [vmem:[#allocation3 + $0xc8] sm:$0x1] }
 0x270   : > { %4403 = vrot.lane.b32.xlu0 %v4369_v60, %s7334_s29  ;;  %v3559_v14 = vrot.slane %v3557_v21, 7  ;;  %v3560_v32 = vshll.u32 %v6845_v46, 16  ;;  %v3540_v47 = vshrl.u32 %v6843_v53, 16  ;;  %v6846_v36 = vpack.c.bf16 %v3148_v7, %v3148_v7  ;;  %v9823_v48 = vpop.permute.xlu0 %4899 }
 0x271   : > { %v3146_v58 = vadd.f32 %v9620_v41, %v3114_v40  ;;  %v4216_v31 = vshrl.u32 %v9815_v51, 16  ;;  %v4218_v33 = vshll.u32 %v9815_v51, 16  ;;  %v4223_v3 = vshll.u32 %v9810_v12, 16 }
 0x272   : > { %5297 = vrot.lane.b32.xlu1 %v5226_v62, %s7339_s21  ;;  %v3562_v19 = vor.u32 %v3560_v32, %v3559_v14  ;;  %v3542_v10 = vrot.slane %v3540_v47, 7  ;;  %v3543_v57 = vshll.u32 %v6843_v53, 16  ;;  %v3565_v56 = vshrl.u32 %v6846_v36, 16 }
 0x273   : > { %v3563_v17 = vrot.slane %v3559_v14, 4  ;;  %v6844_v44 = vpack.c.bf16 %v3146_v58, %v3146_v58  ;;  %v4214_v45 = vsel %vm10321_vm8, %v4209_v25, %v4213_v34  ;;  %v4220_v41 = vrot.slane %v4218_v33, 1  ;;  %v9837_v39 = vpop.permute.xlu1 %4263  ;;  %v3728_v25 = vld [vmem:[#allocation3 + $0xbc] sm:$0x1]  ;;  %vm10329_vm8 = vmmov %vm10323_vm1 }
 0x274   : > { %4515 = vrot.lane.b32.xlu0 %v9802_v29, %s7331_s26  ;;  %v3732_v8 = vsel %vm8940_vm9, %v3562_v19, %v3731_v54  ;;  %v3545_v60 = vor.u32 %v3543_v57, %v3542_v10  ;;  %v3567_v46 = vrot.slane %v3565_v56, 7  ;;  %v3568_v4 = vshll.u32 %v6846_v36, 16  ;;  %v9839_v2 = vpop.permute.xlu0 %5283  ;;  %v9847_v36 = vld [vmem:[#allocation3 + $0xac] sm:$0xf]  ;;  %v3862_v19 = vld [vmem:[#allocation3 + $0x9c] sm:$0xe] }
 0x275   : > { %3733 = vst [vmem:[#allocation3 + $0xc0] sm:$0xf] %v3732_v8  ;;  %v3546_v37 = vrot.slane %v3542_v10, 4  ;;  %v3548_v24 = vshrl.u32 %v6844_v44, 16  ;;  %v4221_v30 = vor.u32 %v4220_v41, %v4216_v31  ;;  %v4225_v21 = vrot.slane %v4223_v3, 1 }
 0x276   : > { %4275 = vrot.lane.b32.xlu1 %v4214_v45, %s7328_s23  ;;  %v3725_v53 = vsel %vm8940_vm9, %v3545_v60, %v3724_v11  ;;  %v3570_v7 = vor.u32 %v3568_v4, %v3567_v46  ;;  %v3572_v40 = vrot.slane %v3567_v46, 4  ;;  %v3551_v62 = vshll.u32 %v6844_v44, 16  ;;  %v3828_v10 = vld [vmem:[#allocation3 + $0xa8] sm:$0xf]  ;;  %v9861_v44 = vld [vmem:[#allocation3 + $0xac] sm:$0xf]  ;;  %vm10324_vm9 = vmmov %vm10323_vm1 }
 0x277   : > { %3726 = vst [vmem:[#allocation3 + $0xb4] sm:$0xf] %v3725_v53  ;;  %v3550_v34 = vrot.slane %v3548_v24, 7  ;;  %v4226_v14 = vsel %vm10323_vm1, %v4221_v30, %v4225_v21  ;;  %v4718_v32 = vshll.u32 %v9802_v29, 16  ;;  %v4723_v47 = vshll.u32 %v9833_v61, 16  ;;  %v9853_v58 = vpop.permute.xlu1 %4505 }
 0x278   : > { %v3571_v54 = vsel %vm7515_vm7, %v3563_v17, %v3570_v7  ;;  %v3736_v16 = vsel %vm8951_vm4, %v3572_v40, %v3735_v27  ;;  %v9855_v31 = vpop.permute.xlu0 %5015  ;;  %v4370_v33 = vrot.slane %v6611_v43, 1  ;;  %v4371_v3 = vrot.slane %v9810_v12, 1  ;;  %v9868_v8 = vld [vmem:[#allocation3 + $0xb0] ss:$0 sps:$4 sm:$0x11]  }
 0x279   : > { %3734 = vst.msk [vmem:[#allocation3 + $0xc4] sm:$0xf] %vm3149_vm0, %v3571_v54  ;;  %3737 = vst [vmem:[#allocation3 + $0xc8] sm:$0x1] %v3736_v16  ;;  %v3553_v57 = vor.u32 %v3551_v62, %v3550_v34  ;;  %v3555_v11 = vrot.slane %v3550_v34, 4  ;;  %v4716_v56 = vshrl.u32 %v9802_v29, 16  ;;  %v5604_v43 = vsel %vm5596_vm15, %v9797_v63, %v9761_v55 }
 0x27a   : > { %4277 = vrot.lane.b32.xlu1 %v4226_v14, %s7328_s23  ;;  %v4720_v17 = vrot.slane %v4718_v32, 1  ;;  %v4725_v45 = vrot.slane %v4723_v47, 1  ;;  %v6658_v12 = vcombine.low %v3862_v19, %v9780_v22  ;;  %v6627_v41 = vcombine.low %v3828_v10, %v9847_v36  ;;  %v3891_v27 = vld [vmem:[#allocation3 + $0xa8] sm:$0xf] }
 0x27b   : > { %v3554_v60 = vsel %vm7515_vm7, %v3546_v37, %v3553_v57  ;;  %v3729_v29 = vsel %vm8951_vm4, %v3555_v11, %v3728_v25  ;;  %v4372_v4 = vsel %vm1459_vm6, %v4370_v33, %v4371_v3  ;;  %v4880_v22 = vrot.slane %v9833_v61, 1  ;;  %v5282_v63 = vpop.permute.xlu1 %5281  ;;  %v9891_v32 = vld [vmem:[#allocation3 + $0xb0] ss:$0 sps:$4 sm:$0x11]   ;;  %v3927_v57 = vld [vmem:[#allocation3 + $0xa8] sm:$0xe]  ;;  %vm10325_vm4 = vmmov %vm10323_vm1 }
 0x27c   : > { %v4721_v46 = vor.u32 %v4720_v17, %v4716_v56  ;;  %3727 = vst.msk [vmem:[#allocation3 + $0xb8] sm:$0xf] %vm3149_vm0, %v3554_v60  ;;  %3730 = vst [vmem:[#allocation3 + $0xbc] sm:$0x1] %v3729_v29  ;;  %v4879_v55 = vrot.slane %v6658_v12, 1  ;;  %v4772_v24 = vpop.permute.xlu0 %4771  ;;  %v6674_v30 = vcombine.low %v3891_v27, %v9861_v44  ;;  %v4730_v21 = vshll.u32 %v6627_v41, 16 }
 0x27d   : > { %v5637_v5 = vsel %vm5629_vm3, %v5604_v43, %v5282_v63  ;;  %v5540_v37 = vsel %vm2795_vm10, %v9768_v13, %v4772_v24  ;;  %v4728_v53 = vshrl.u32 %v6627_v41, 16  ;;  %v4735_v62 = vshll.u32 %v9868_v8, 16  ;;  %vm10326_vm7 = vmmov %vm10323_vm1 }
 0x27e   : > { %v4726_v23 = vsel %vm10324_vm9, %v4721_v46, %v4725_v45  ;;  %4405 = vrot.lane.b32.xlu1 %v4372_v4, %s7334_s29  ;;  %v5670_v61 = vsel %vm5662_vm5, %v5637_v5, %v9808_v9  ;;  %v5573_v7 = vsel %vm5563_vm13, %v5540_v37, %v9823_v48  ;;  %v4732_v40 = vrot.slane %v4730_v21, 1  ;;  %v3893_v29 = vld [vmem:[#allocation3 + $0xb4] sm:$0xf]  ;;  %vm10330_vm9 = vmmov %vm10323_vm1 }
 0x27f   : > { %4787 = vrot.lane.b32.xlu0 %v4726_v23, %s7333_s28  ;;  %v6716_v25 = vcombine.low %v5670_v61, %v5670_v61  ;;  %v6717_v34 = vcombine.high %v5670_v61, %v5670_v61  ;;  %v5606_v14 = vsel %vm5596_vm15, %v5573_v7, %v9691_v49  ;;  %v4262_v47 = vpop.permute.xlu1 %4261  ;;  %v5230_v16 = vshll.u32 %v6674_v30, 16  ;;  %v3863_v49 = vld [vmem:[#allocation3 + $0xa8] sm:$0xe]  ;;  %v3928_v63 = vld [vmem:[#allocation3 + $0xb4] sm:$0xe] }
 0x280   : > { %v5639_v13 = vsel %vm5629_vm3, %v5606_v14, %v9839_v2  ;;  %v9895_v54 = vpop.permute.xlu0 %4503  ;;  %v4733_v9 = vor.u32 %v4732_v40, %v4728_v53  ;;  %v4881_v48 = vsel %vm1459_vm6, %v4879_v55, %v4880_v22  ;;  %v4737_v19 = vrot.slane %v4735_v62, 1  ;;  %v3766_v55 = vld [vmem:[#allocation3 + $0xa8] sm:$0xf]  ;;  %v3767_v22 = vld [vmem:[#allocation3 + $0xac] sm:$0xf] }
 0x281   : > { %5814 = vst.msk [vmem:[#allocation4 + $0x18] sm:$0xf] %vm5807_vm2, %v6716_v25  ;;  %5815 = vst.msk [vmem:[#allocation4 + $0x1c] sm:$0xf] %vm5807_vm2, %v6717_v34  ;;  %v5672_v33 = vsel %vm5662_vm5, %v5639_v13, %v9763_v42  ;;  %v5228_v10 = vshrl.u32 %v6674_v30, 16  ;;  %v5232_v11 = vrot.slane %v5230_v16, 1  ;;  %v6659_v17 = vcombine.low %v3863_v49, %v9847_v36 }
 0x282   : > { %4517 = vrot.lane.b32.xlu1 %v6627_v41, %s7331_s26  ;;  %v6718_v2 = vcombine.low %v5672_v33, %v5672_v33  ;;  %v6719_v3 = vcombine.high %v5672_v33, %v5672_v33  ;;  %v5235_v56 = vshll.u32 %v9891_v32, 16  ;;  %v4738_v42 = vsel %vm10325_vm4, %v4733_v9, %v4737_v19  ;;  %v3768_v14 = vld [vmem:[#allocation3 + $0xb4] sm:$0xf] }
 0x283   : > { %4915 = vrot.lane.b32.xlu0 %v4881_v48, %s7337_s14  ;;  %v3894_v43 = vld [vmem:[#allocation3 + $0xb8] sm:$0xf]  ;;  %v9909_v45 = vpop.permute.xlu1 %5013  ;;  %v4883_v41 = vrot.slane %v9868_v8, 1  ;;  %v6706_v60 = vcombine.low %v3927_v57, %v9861_v44  ;;  %v5233_v46 = vor.u32 %v5232_v11, %v5228_v10  ;;  %v4882_v36 = vrot.slane %v6659_v17, 1  ;;  %v3800_v10 = vld [vmem:[#allocation3 + $0xa8] sm:$0xe] }
 0x284   : > { %5816 = vst.msk [vmem:[#allocation4 + $0x20] sm:$0xf] %vm5807_vm2, %v6718_v2  ;;  %5817 = vst.msk [vmem:[#allocation4 + $0x24] sm:$0xf] %vm5807_vm2, %v6719_v3  ;;  %v9911_v12 = vpop.permute.xlu0 %5415  ;;  %v6675_v4 = vcombine.low %v3893_v29, %v3894_v43  ;;  %v5237_v24 = vrot.slane %v5235_v56, 1  ;;  %v5392_v21 = vrot.slane %v9891_v32, 1  ;;  %v5446_v44 = vsel %vm2597_vm12, %v9201_v59, %v4262_v47 }
 0x285   : > { %v7268_v27 = vld [vmem:[#allocation3 + $0xbc] ss:$0 sps:$4 sm:$0x11]   ;;  %v9918_v5 = vld [vmem:[#allocation3 + $0xb8] sm:$0xf]  ;;  %v4884_v8 = vsel %vm1459_vm6, %v4882_v36, %v4883_v41  ;;  %v5391_v37 = vrot.slane %v6706_v60, 1  ;;  %v9927_v40 = vcombine.low %v3766_v55, %v3767_v22  ;;  %v6707_v25 = vcombine.low %v3928_v63, %v3894_v43 }
 0x286   : > { %4789 = vrot.lane.b32.xlu1 %v4738_v42, %s7333_s28  ;;  %v5242_v23 = vshll.u32 %v6675_v4, 16  ;;  %v5238_v62 = vsel %vm10326_vm7, %v5233_v46, %v5237_v24  ;;  %v5240_v59 = vshrl.u32 %v6675_v4, 16  ;;  %v5247_v32 = vshll.u32 %v7268_v27, 16  ;;  %v9934_v47 = vld [vmem:[#allocation3 + $0xb8] sm:$0xf] }
 0x287   : > { %5027 = vrot.lane.b32.xlu0 %v6674_v30, %s7336_s13  ;;  %v9923_v53 = vpop.permute.xlu1 %4905  ;;  %v7273_v30 = vld [vmem:[#allocation3 + $0xb0] ss:$0 sps:$4 sm:$0x11]   ;;  %v4230_v13 = vshll.u32 %v9927_v40, 16  ;;  %vm10327_vm0 = vcmask 130048   ;;  %v9939_v48 = vcombine.low %v3768_v14, %v9918_v5  ;;  %v5393_v33 = vsel %vm1459_vm6, %v5391_v37, %v5392_v21 }
 0x288   : > { %v9925_v61 = vpop.permute.xlu0 %4395  ;;  %v7270_v7 = vld [vmem:[#allocation4 + $0x18] sm:$0xff]   ;;  %v5244_v34 = vrot.slane %v5242_v23, 1  ;;  %v5478_v9 = vsel %vm10327_vm0, %v5446_v44, %v9806_v20  ;;  %v5395_v49 = vrot.slane %v7268_v27, 1  ;;  %v5394_v56 = vrot.slane %v6707_v25, 1  ;;  %v9961_v44 = vld [vmem:[#allocation3 + $0xc4] sm:$0xf]  ;;  %vm10331_vm4 = vmmov %vm10327_vm0 }
 0x289   : > { %6940 = vmatmul.mubr.msk.bf16.gmra.mxu1 %vm5988_vm11, %v7270_v7  ;;  %v4232_v57 = vrot.slane %v4230_v13, 1  ;;  %v3830_v11 = vld [vmem:[#allocation3 + $0xb4] sm:$0xf]  ;;  %v6612_v20 = vcombine.low %v3800_v10, %v3767_v22  ;;  %v4242_v43 = vshll.u32 %v9939_v48, 16  ;;  %v5249_v42 = vrot.slane %v5247_v32, 1  ;;  %vm10333_vm0 = vmmov %vm10323_vm1 }
 0x28a   : > { %4917 = vrot.lane.b32.xlu1 %v4884_v8, %s7337_s14  ;;  %v5245_v19 = vor.u32 %v5244_v34, %v5240_v59  ;;  %v6628_v17 = vcombine.low %v3830_v11, %v9934_v47  ;;  %v4228_v41 = vshrl.u32 %v9927_v40, 16  ;;  %v4235_v60 = vshll.u32 %v7273_v30, 16  ;;  %v7277_v29 = vld [vmem:[#allocation3 + $0xbc] ss:$0 sps:$4 sm:$0x11]  }
 0x28b   : > { %5299 = vrot.lane.b32.xlu0 %v5238_v62, %s7339_s21  ;;  %v7271_v16 = vld [vmem:[#allocation4 + $0x20] sm:$0xff]   ;;  %v9942_v2 = vpop.permute.xlu1 %4393  ;;  %vm10328_vm14 = vcmask 195584   ;;  %v4244_v22 = vrot.slane %v4242_v43, 1  ;;  %v5396_v63 = vsel %vm1459_vm6, %v5394_v56, %v5395_v49  ;;  %v4373_v24 = vrot.slane %v6612_v20, 1  ;;  %v3832_v7 = vld [vmem:[#allocation3 + $0xc0] sm:$0xf] }
 0x28c   : > { %v9944_v3 = vpop.permute.xlu0 %5413  ;;  %6943 = vmatprep.mubr.msk.bf16.mxu1 %vm5988_vm11, %v7271_v16  ;;  %v5510_v46 = vsel %vm10328_vm14, %v5478_v9, %v9689_v35  ;;  %v5250_v36 = vsel %vm10329_vm8, %v5245_v19, %v5249_v42  ;;  %v4233_v55 = vor.u32 %v4232_v57, %v4228_v41  ;;  %v4374_v21 = vrot.slane %v7273_v30, 1  ;;  %v9967_v25 = vld [vmem:[#allocation3 + $0xbc] ss:$0 sps:$4 sm:$0x11]   ;;  %v3801_v34 = vld [vmem:[#allocation3 + $0xb4] sm:$0xe]  ;;  %vm10332_vm7 = vmmov %vm10328_vm14 }
 0x28d   : > { %v4742_v23 = vshll.u32 %v6628_v17, 16  ;;  %v4237_v35 = vrot.slane %v4235_v60, 1  ;;  %v4240_v8 = vshrl.u32 %v9939_v48, 16  ;;  %v4247_v37 = vshll.u32 %v7277_v29, 16  ;;  %v9982_v19 = vld [vmem:[#allocation3 + $0xc4] sm:$0xf]  ;;  %vm10334_vm14 = vmmov %vm10333_vm0 }
 0x28e   : > { %5029 = vrot.lane.b32.xlu1 %v6675_v4, %s7336_s13  ;;  %v5542_v62 = vsel %vm2795_vm10, %v5510_v46, %v9821_v28  ;;  %v6613_v13 = vcombine.low %v3801_v34, %v9918_v5  ;;  %v9974_v9 = vcombine.low %v3832_v7, %v9961_v44  ;;  %v4375_v16 = vsel %vm1459_vm6, %v4373_v24, %v4374_v21  ;;  %v3897_v10 = vld [vmem:[#allocation3 + $0xcc] sm:$0xf]  ;;  %v3864_v20 = vld [vmem:[#allocation3 + $0xb4] sm:$0xe]  ;;  %v3895_v60 = vld [vmem:[#allocation3 + $0xc0] sm:$0xf] }
 0x28f   : > { %5427 = vrot.lane.b32.xlu0 %v5393_v33, %s7338_s20  ;;  %v9955_v4 = vpop.permute.xlu1 %4777  ;;  %v4238_v14 = vsel %vm10323_vm1, %v4233_v55, %v4237_v35  ;;  %v4245_v32 = vor.u32 %v4244_v22, %v4240_v8  ;;  %v4744_v33 = vrot.slane %v4742_v23, 1  ;;  %v5448_v28 = vsel %vm2597_vm12, %v9184_v18, %v9837_v39  ;;  %v10001_v22 = vld [vmem:[#allocation3 + $0xc8] ss:$0 sps:$4 sm:$0x11]   ;;  %vm10335_vm8 = vmmov %vm10333_vm0 }
 0x290   : > { %v9957_v27 = vpop.permute.xlu0 %4903  ;;  %v4249_v49 = vrot.slane %v4247_v37, 1  ;;  %v5575_v5 = vsel %vm5563_vm13, %v5542_v62, %v9783_v0  ;;  %v4740_v57 = vshrl.u32 %v6628_v17, 16  ;;  %v4747_v11 = vshll.u32 %v9967_v25, 16  ;;  %vm10336_vm1 = vmmov %vm10331_vm4 }
 0x291   : > { %v4377_v56 = vrot.slane %v7277_v29, 1  ;;  %v4376_v18 = vrot.slane %v6613_v13, 1  ;;  %v6660_v39 = vcombine.low %v3864_v20, %v9934_v47  ;;  %v4754_v46 = vshll.u32 %v9974_v9, 16 }
 0x292   : > { %5301 = vrot.lane.b32.xlu1 %v5250_v36, %s7339_s21  ;;  %v4250_v43 = vsel %vm10330_vm9, %v4245_v32, %v4249_v49  ;;  %v9994_v36 = vld [vmem:[#allocation3 + $0xd0] sm:$0xf]  ;;  %v4745_v0 = vor.u32 %v4744_v33, %v4740_v57  ;;  %v6676_v29 = vcombine.low %v3895_v60, %v9982_v19  ;;  %v5480_v55 = vsel %vm10331_vm4, %v5448_v28, %v9785_v52  ;;  %v7284_v28 = vld [vmem:[#allocation3 + $0xc8] ss:$0 sps:$4 sm:$0x11]   ;;  %vm10337_vm9 = vmmov %vm10333_vm0 }
 0x293   : > { %5429 = vrot.lane.b32.xlu0 %v5396_v63, %s7338_s20  ;;  %v9970_v59 = vpop.permute.xlu1 %4267  ;;  %v5512_v47 = vsel %vm10332_vm7, %v5480_v55, %v9895_v54  ;;  %v5608_v63 = vsel %vm5596_vm15, %v5575_v5, %v9909_v45  ;;  %v4749_v24 = vrot.slane %v4747_v11, 1  ;;  %v10008_v21 = vcombine.low %v3897_v10, %v9994_v36  ;;  %v3865_v49 = vld [vmem:[#allocation3 + $0xc0] sm:$0xe]  ;;  %vm10338_vm4 = vmmov %vm10332_vm7 }
 0x294   : > { %v5288_v30 = vpop.permute.xlu0 %5287  ;;  %v4378_v23 = vsel %vm1459_vm6, %v4376_v18, %v4377_v56  ;;  %v4885_v35 = vrot.slane %v6660_v39, 1  ;;  %v4886_v8 = vrot.slane %v9967_v25, 1  ;;  %v5254_v62 = vshll.u32 %v6676_v29, 16  ;;  %v7290_v18 = vld [vmem:[#allocation3 + $0xd4] ss:$0 sps:$4 sm:$0x11]   ;;  %vm10339_vm7 = vmmov %vm10336_vm1 }
 0x295   : > { %v4750_v7 = vsel %vm10333_vm0, %v4745_v0, %v4749_v24  ;;  %v4759_v32 = vshll.u32 %v10001_v22, 16  ;;  %v6661_v11 = vcombine.low %v3865_v49, %v9961_v44  ;;  %v5266_v44 = vshll.u32 %v10008_v21, 16  ;;  %vm10341_vm0 = vmmov %vm10336_vm1 }
 0x296   : > { %4279 = vrot.lane.b32.xlu1 %v4238_v14, %s7328_s23  ;;  %v4752_v14 = vshrl.u32 %v9974_v9, 16  ;;  %v5252_v39 = vshrl.u32 %v6676_v29, 16  ;;  %v5259_v60 = vshll.u32 %v7284_v28, 16  ;;  %v4889_v55 = vrot.slane %v10001_v22, 1 }
 0x297   : > { %4407 = vrot.lane.b32.xlu0 %v4375_v16, %s7334_s29  ;;  %v9988_v42 = vpop.permute.xlu1 %4509 }
 0x298   : > { %v9990_v41 = vpop.permute.xlu0 %5019 }
 0x29a   : > { %4281 = vrot.lane.b32.xlu1 %v4250_v43, %s7328_s23  ;;  %v4761_v43 = vrot.slane %v4759_v32, 1 }
 0x29b   : > { %4519 = vrot.lane.b32.xlu0 %v6628_v17, %s7331_s26  ;;  %v5286_v52 = vpop.permute.xlu1 %5285  ;;  %v4756_v17 = vrot.slane %v4754_v46, 1 }
 0x29c   : > { %v4776_v37 = vpop.permute.xlu0 %4775  ;;  %v5641_v54 = vsel %vm5629_vm3, %v5608_v63, %v5286_v52  ;;  %v5261_v52 = vrot.slane %v5259_v60, 1 }
 0x29d   : > { %v5544_v45 = vsel %vm2795_vm10, %v5512_v47, %v4776_v37  ;;  %v5674_v34 = vsel %vm5662_vm5, %v5641_v54, %v9944_v3  ;;  %v4757_v3 = vor.u32 %v4756_v17, %v4752_v14  ;;  %v3929_v47 = vld [vmem:[#allocation3 + $0xc0] sm:$0xe]  ;;  %v3930_v37 = vld [vmem:[#allocation3 + $0xcc] sm:$0xe] }
 0x29e   : > { %4409 = vrot.lane.b32.xlu1 %v4378_v23, %s7334_s29  ;;  %v5577_v25 = vsel %vm5563_vm13, %v5544_v45, %v9957_v27  ;;  %v6720_v13 = vcombine.low %v5674_v34, %v5674_v34  ;;  %v6721_v16 = vcombine.high %v5674_v34, %v5674_v34  ;;  %v4887_v27 = vsel %vm1459_vm6, %v4885_v35, %v4886_v8 }
 0x29f   : > { %4791 = vrot.lane.b32.xlu0 %v4750_v7, %s7333_s28  ;;  %v5610_v33 = vsel %vm5596_vm15, %v5577_v25, %v9855_v31  ;;  %v4266_v5 = vpop.permute.xlu1 %4265  ;;  %v5256_v31 = vrot.slane %v5254_v62, 1  ;;  %v6708_v24 = vcombine.low %v3929_v47, %v9982_v19  ;;  %v5264_v23 = vshrl.u32 %v10008_v21, 16 }
 0x2a0   : > { %v5643_v10 = vsel %vm5629_vm3, %v5610_v33, %v5288_v30  ;;  %v10026_v57 = vpop.permute.xlu0 %4507  ;;  %5818 = vst.msk [vmem:[#allocation4 + $0x28] sm:$0xf] %vm5807_vm2, %v6720_v13  ;;  %5819 = vst.msk [vmem:[#allocation4 + $0x2c] sm:$0xf] %vm5807_vm2, %v6721_v16  ;;  %v5268_v35 = vrot.slane %v5266_v44, 1  ;;  %v5271_v8 = vshll.u32 %v7290_v18, 16  ;;  %v5450_v45 = vsel %vm2597_vm12, %v9370_v1, %v4266_v5 }
 0x2a1   : > { %v5676_v56 = vsel %vm5662_vm5, %v5643_v10, %v9911_v12  ;;  %v4762_v12 = vsel %vm10334_vm14, %v4757_v3, %v4761_v43  ;;  %v5257_v63 = vor.u32 %v5256_v31, %v5252_v39  ;;  %v5398_v62 = vrot.slane %v7284_v28, 1  ;;  %vm10342_vm14 = vmmov %vm10338_vm4 }
 0x2a2   : > { %4521 = vrot.lane.b32.xlu1 %v9974_v9, %s7331_s26  ;;  %v6722_v30 = vcombine.low %v5676_v56, %v5676_v56  ;;  %v6723_v20 = vcombine.high %v5676_v56, %v5676_v56  ;;  %v4888_v9 = vrot.slane %v6661_v11, 1  ;;  %v5269_v34 = vor.u32 %v5268_v35, %v5264_v23 }
 0x2a3   : > { %4919 = vrot.lane.b32.xlu0 %v4887_v27, %s7337_s14  ;;  %v5018_v46 = vpop.permute.xlu1 %5017  ;;  %v5262_v19 = vsel %vm10335_vm8, %v5257_v63, %v5261_v52  ;;  %v5273_v25 = vrot.slane %v5271_v8, 1  ;;  %v6709_v14 = vcombine.low %v3930_v37, %v9994_v36  ;;  %v5482_v13 = vsel %vm10336_vm1, %v5450_v45, %v9942_v2  ;;  %vm10343_vm8 = vmmov %vm10341_vm0 }
 0x2a4   : > { %5820 = vst.msk [vmem:[#allocation4 + $0x30] sm:$0xf] %vm5807_vm2, %v6722_v30  ;;  %5821 = vst.msk [vmem:[#allocation4 + $0x34] sm:$0xf] %vm5807_vm2, %v6723_v20  ;;  %v10041_v0 = vpop.permute.xlu0 %5419  ;;  %v4890_v17 = vsel %vm1459_vm6, %v4888_v9, %v4889_v55  ;;  %v5401_v10 = vrot.slane %v7290_v18, 1  ;;  %v5514_v36 = vsel %vm10338_vm4, %v5482_v13, %v9853_v58  ;;  %v5452_v58 = vsel %vm2597_vm12, %v9299_v15, %v9970_v59 }
 0x2a5   : > { %v5274_v28 = vsel %vm10337_vm9, %v5269_v34, %v5273_v25  ;;  %v5400_v49 = vrot.slane %v6709_v14, 1  ;;  %v5546_v3 = vsel %vm2795_vm10, %v5514_v36, %v9955_v4  ;;  %v5484_v4 = vsel %vm10339_vm7, %v5452_v58, %v9925_v61  ;;  %vm10344_vm1 = vmmov %vm10338_vm4 }
 0x2a6   : > { %4793 = vrot.lane.b32.xlu1 %v4762_v12, %s7333_s28  ;;  %v5579_v27 = vsel %vm5563_vm13, %v5546_v3, %v9923_v53  ;;  %vm10345_vm9 = vmmov %vm10341_vm0  ;;  %s10188_s28 = scalar_lea.vmem %s10271_s4, %s6781_s19 }
 0x2a7   : > { %5031 = vrot.lane.b32.xlu0 %v6676_v29, %s7336_s13  ;;  %v10049_v7 = vpop.permute.xlu1 %4909  ;;  %v7288_v22 = vld [vmem:[#allocation4 + $0x28] sm:$0xff]   ;;  %v5397_v29 = vrot.slane %v6708_v24, 1  ;;  %v5612_v31 = vsel %vm5596_vm15, %v5579_v27, %v5018_v46  ;;  %vm10347_vm7 = vmmov %vm10341_vm0 }
 0x2a8   : > { %v10051_v54 = vpop.permute.xlu0 %4399  ;;  %6944 = vmatmul.mubr.msk.bf16.gmra.mxu1 %vm5988_vm11, %v7288_v22 }
 0x2a9   : > { %v5399_v33 = vsel %vm1459_vm6, %v5397_v29, %v5398_v62 }
 0x2aa   : > { %4921 = vrot.lane.b32.xlu1 %v4890_v17, %s7337_s14 }
 0x2ab   : > { %5303 = vrot.lane.b32.xlu0 %v5262_v19, %s7339_s21  ;;  %v7289_v32 = vld [vmem:[#allocation4 + $0x30] sm:$0xff]   ;;  %v4398_v16 = vpop.permute.xlu1 %4397 }
 0x2ac   : > { %v5418_v1 = vpop.permute.xlu0 %5417  ;;  %6947 = vmatprep.mubr.msk.bf16.mxu1 %vm5988_vm11, %v7289_v32 }
 0x2ae   : > { %5033 = vrot.lane.b32.xlu1 %v10008_v21, %s7336_s13  ;;  %v5402_v21 = vsel %vm1459_vm6, %v5400_v49, %v5401_v10  ;;  %vm10340_vm6 = vmmov %vm10338_vm4 }
 0x2af   : > { %5431 = vrot.lane.b32.xlu0 %v5399_v33, %s7338_s20  ;;  %v4782_v5 = vpop.permute.xlu1 %4781  ;;  %v5516_v53 = vsel %vm10340_vm6, %v5484_v4, %v10026_v57  ;;  %vm10346_vm4 = vmmov %vm10344_vm1 }
 0x2b0   : > { %v4908_v2 = vpop.permute.xlu0 %4907  ;;  %vm10348_vm6 = vmmov %vm10344_vm1 }
 0x2b2   : > { %5305 = vrot.lane.b32.xlu1 %v5274_v28, %s7339_s21 }
 0x2b3   : > { %v4272_v11 = vpop.permute.xlu1 %4271 }
 0x2b4   : > { %v5292_v56 = vpop.permute.xlu0 %5291  ;;  %v5456_v14 = vsel %vm2597_vm12, %v9448_v50, %v4272_v11 }
 0x2b5   : > { %v5488_v32 = vsel %vm10343_vm8, %v5456_v14, %v10051_v54  ;;  %vm10350_vm8 = vmmov %vm10341_vm0 }
 0x2b6   : > { %5433 = vrot.lane.b32.xlu1 %v5402_v21, %s7338_s20 }
 0x2b7   : > { %v5290_v30 = vpop.permute.xlu1 %5289 }
 0x2b8   : > { %v5645_v20 = vsel %vm5629_vm3, %v5612_v31, %v5290_v30 }
 0x2b9   : > { %v5678_v43 = vsel %vm5662_vm5, %v5645_v20, %v5418_v1 }
 0x2ba   : > { %v6724_v18 = vcombine.low %v5678_v43, %v5678_v43  ;;  %v6725_v44 = vcombine.high %v5678_v43, %v5678_v43  ;;  %v4780_v39 = vpop.permute.xlu0 %4779 }
 0x2bb   : > { %v5548_v60 = vsel %vm2795_vm10, %v5516_v53, %v4780_v39  ;;  %v4270_v12 = vpop.permute.xlu1 %4269 }
 0x2bc   : > { %5822 = vst.msk [vmem:[#allocation4 + $0x38] sm:$0xf] %vm5807_vm2, %v6724_v18  ;;  %5823 = vst.msk [vmem:[#allocation4 + $0x3c] sm:$0xf] %vm5807_vm2, %v6725_v44  ;;  %v5581_v15 = vsel %vm5563_vm13, %v5548_v60, %v4908_v2  ;;  %v5454_v61 = vsel %vm2597_vm12, %v9462_v26, %v4270_v12 }
 0x2bd   : > { %v5614_v59 = vsel %vm5596_vm15, %v5581_v15, %v9990_v41  ;;  %v5486_v55 = vsel %vm10341_vm0, %v5454_v61, %v4398_v16 }
 0x2be   : > { %v5647_v57 = vsel %vm5629_vm3, %v5614_v59, %v5292_v56  ;;  %v5422_v46 = vpop.permute.xlu0 %5421  ;;  %v5518_v26 = vsel %vm10342_vm14, %v5486_v55, %v9988_v42  ;;  %vm10349_vm14 = vmmov %vm10344_vm1 }
 0x2bf   : > { %v5680_v9 = vsel %vm5662_vm5, %v5647_v57, %v10041_v0  ;;  %v5022_v47 = vpop.permute.xlu1 %5021  ;;  %v5550_v8 = vsel %vm2795_vm10, %v5518_v26, %v4782_v5 }
 0x2c0   : > { %v6726_v63 = vcombine.low %v5680_v9, %v5680_v9  ;;  %v6727_v24 = vcombine.high %v5680_v9, %v5680_v9  ;;  %v5583_v37 = vsel %vm5563_vm13, %v5550_v8, %v10049_v7 }
 0x2c1   : > { %v5616_v45 = vsel %vm5596_vm15, %v5583_v37, %v5022_v47 }
 0x2c2   : > { %5824 = vst.msk [vmem:[#allocation4 + $0x40] sm:$0xf] %vm5807_vm2, %v6726_v63  ;;  %5825 = vst.msk [vmem:[#allocation4 + $0x44] sm:$0xf] %vm5807_vm2, %v6727_v24  ;;  %v4512_v23 = vpop.permute.xlu0 %4511 }
 0x2c3   : > { %v4514_v41 = vpop.permute.xlu1 %4513  ;;  %v7292_v35 = vld [vmem:[#allocation4 + $0x38] sm:$0xff]   ;;  %v5520_v16 = vsel %vm10344_vm1, %v5488_v32, %v4512_v23 }
 0x2c4   : > { %6948 = vmatmul.mubr.msk.bf16.gmra.mxu1 %vm5988_vm11, %v7292_v35 }
 0x2c6   : > { %v4784_v0 = vpop.permute.xlu0 %4783 }
 0x2c7   : > { %v4402_v52 = vpop.permute.xlu1 %4401  ;;  %v5552_v1 = vsel %vm2795_vm10, %v5520_v16, %v4784_v0 }
 0x2c9   : > { %v7293_v17 = vld [vmem:[#allocation4 + $0x40] sm:$0xff]  }
 0x2ca   : > { %v4912_v22 = vpop.permute.xlu0 %4911  ;;  %6951 = vmatprep.mubr.msk.bf16.mxu1 %vm5988_vm11, %v7293_v17 }
 0x2cb   : > { %v5294_v19 = vpop.permute.xlu1 %5293  ;;  %v5585_v33 = vsel %vm5563_vm13, %v5552_v1, %v4912_v22 }
 0x2cc   : > { %v5649_v42 = vsel %vm5629_vm3, %v5616_v45, %v5294_v19 }
 0x2cd   : > { %v5682_v29 = vsel %vm5662_vm5, %v5649_v42, %v5422_v46 }
 0x2ce   : > { %v6728_v62 = vcombine.low %v5682_v29, %v5682_v29  ;;  %v6729_v34 = vcombine.high %v5682_v29, %v5682_v29  ;;  %v5024_v25 = vpop.permute.xlu0 %5023 }
 0x2cf   : > { %v5618_v28 = vsel %vm5596_vm15, %v5585_v33, %v5024_v25 }
 0x2d0   : > { %5826 = vst.msk [vmem:[#allocation4 + $0x48] sm:$0xf] %vm5807_vm2, %v6728_v62  ;;  %5827 = vst.msk [vmem:[#allocation4 + $0x4c] sm:$0xf] %vm5807_vm2, %v6729_v34 }
 0x2d1   : > { %v4274_v7 = vpop.permute.xlu1 %4273 }
 0x2d2   : > { %v5458_v50 = vsel %vm2597_vm12, %v9654_v38, %v4274_v7 }
 0x2d3   : > { %v5296_v13 = vpop.permute.xlu0 %5295  ;;  %v5490_v21 = vsel %vm10345_vm9, %v5458_v50, %v4402_v52  ;;  %vm10351_vm9 = vmmov %vm10341_vm0 }
 0x2d4   : > { %v5651_v10 = vsel %vm5629_vm3, %v5618_v28, %v5296_v13  ;;  %v5522_v27 = vsel %vm10346_vm4, %v5490_v21, %v4514_v41  ;;  %vm10352_vm4 = vmmov %vm10344_vm1 }
 0x2d7   : > { %v7294_v5 = vld [vmem:[#allocation4 + $0x48] sm:$0xff]  }
 0x2d8   : > { %v4786_v49 = vpop.permute.xlu1 %4785  ;;  %v5424_v36 = vpop.permute.xlu0 %5423  ;;  %6952 = vmatmul.mubr.msk.bf16.gmra.mxu1 %vm5988_vm11, %v7294_v5 }
 0x2d9   : > { %v5684_v2 = vsel %vm5662_vm5, %v5651_v10, %v5424_v36  ;;  %v5554_v58 = vsel %vm2795_vm10, %v5522_v27, %v4786_v49 }
 0x2da   : > { %v6730_v54 = vcombine.low %v5684_v2, %v5684_v2  ;;  %v6731_v3 = vcombine.high %v5684_v2, %v5684_v2 }
 0x2dc   : > { %v4914_v11 = vpop.permute.xlu1 %4913  ;;  %5828 = vst.msk [vmem:[#allocation4 + $0x50] sm:$0xf] %vm5807_vm2, %v6730_v54  ;;  %5829 = vst.msk [vmem:[#allocation4 + $0x54] sm:$0xf] %vm5807_vm2, %v6731_v3 }
 0x2dd   : > { %v5587_v31 = vsel %vm5563_vm13, %v5554_v58, %v4914_v11 }
 0x2de   : > { %v5426_v38 = vpop.permute.xlu0 %5425 }
 0x2e0   : > { %v5026_v56 = vpop.permute.xlu1 %5025 }
 0x2e1   : > { %v5620_v30 = vsel %vm5596_vm15, %v5587_v31, %v5026_v56 }
 0x2e2   : > { %v4404_v53 = vpop.permute.xlu0 %4403 }
 0x2e3   : > { %v7295_v4 = vld [vmem:[#allocation4 + $0x50] sm:$0xff]  }
 0x2e4   : > { %v5298_v20 = vpop.permute.xlu1 %5297  ;;  %6955 = vmatprep.mubr.msk.bf16.mxu1 %vm5988_vm11, %v7295_v4 }
 0x2e5   : > { %v5653_v43 = vsel %vm5629_vm3, %v5620_v30, %v5298_v20 }
 0x2e6   : > { %v5686_v18 = vsel %vm5662_vm5, %v5653_v43, %v5426_v38  ;;  %v4516_v12 = vpop.permute.xlu0 %4515 }
 0x2e7   : > { %v6732_v44 = vcombine.low %v5686_v18, %v5686_v18  ;;  %v6733_v39 = vcombine.high %v5686_v18, %v5686_v18 }
 0x2e8   : > { %v4276_v60 = vpop.permute.xlu1 %4275 }
 0x2e9   : > { %5830 = vst.msk [vmem:[#allocation4 + $0x58] sm:$0xf] %vm5807_vm2, %v6732_v44  ;;  %5831 = vst.msk [vmem:[#allocation4 + $0x5c] sm:$0xf] %vm5807_vm2, %v6733_v39  ;;  %v5460_v9 = vsel %vm2597_vm12, %v9765_v6, %v4276_v60 }
 0x2ea   : > { %v5492_v47 = vsel %vm10347_vm7, %v5460_v9, %v4404_v53 }
 0x2eb   : > { %v5524_v26 = vsel %vm10348_vm6, %v5492_v47, %v4516_v12 }
 0x2ec   : > { %v4278_v15 = vpop.permute.xlu1 %4277 }
 0x2ed   : > { %v5462_v8 = vsel %vm2597_vm12, %v9815_v51, %v4278_v15 }
 0x2f0   : > { %v4406_v61 = vpop.permute.xlu1 %4405  ;;  %v7296_v59 = vld [vmem:[#allocation4 + $0x58] sm:$0xff]  }
 0x2f1   : > { %v4788_v57 = vpop.permute.xlu0 %4787  ;;  %6956 = vmatmul.mubr.msk.bf16.gmra.mxu1 %vm5988_vm11, %v7296_v59  ;;  %v5494_v52 = vsel %vm10341_vm0, %v5462_v8, %v4406_v61 }
 0x2f2   : > { %v5556_v35 = vsel %vm2795_vm10, %v5524_v26, %v4788_v57 }
 0x2f4   : > { %v4518_v46 = vpop.permute.xlu1 %4517 }
 0x2f5   : > { %v4916_v55 = vpop.permute.xlu0 %4915  ;;  %v5526_v17 = vsel %vm10349_vm14, %v5494_v52, %v4518_v46 }
 0x2f6   : > { %v5589_v0 = vsel %vm5563_vm13, %v5556_v35, %v4916_v55 }
 0x2f8   : > { %v4790_v63 = vpop.permute.xlu1 %4789 }
 0x2f9   : > { %v5028_v24 = vpop.permute.xlu0 %5027  ;;  %v5558_v19 = vsel %vm2795_vm10, %v5526_v17, %v4790_v63 }
 0x2fa   : > { %v5622_v6 = vsel %vm5596_vm15, %v5589_v0, %v5028_v24 }
 0x2fc   : > { %v4918_v23 = vpop.permute.xlu1 %4917 }
 0x2fd   : > { %v5300_v41 = vpop.permute.xlu0 %5299  ;;  %v5591_v29 = vsel %vm5563_vm13, %v5558_v19, %v4918_v23 }
 0x2fe   : > { %v5655_v22 = vsel %vm5629_vm3, %v5622_v6, %v5300_v41 }
 0x300   : > { %v5030_v37 = vpop.permute.xlu1 %5029 }
 0x301   : > { %v5428_v45 = vpop.permute.xlu0 %5427  ;;  %v5624_v34 = vsel %vm5596_vm15, %v5591_v29, %v5030_v37 }
 0x302   : > { %v5688_v42 = vsel %vm5662_vm5, %v5655_v22, %v5428_v45 }
 0x303   : > { %v6734_v62 = vcombine.low %v5688_v42, %v5688_v42  ;;  %v6735_v51 = vcombine.high %v5688_v42, %v5688_v42 }
 0x304   : > { %v5302_v25 = vpop.permute.xlu1 %5301 }
 0x305   : > { %5832 = vst.msk [vmem:[#allocation4 + $0x60] sm:$0xf] %vm5807_vm2, %v6734_v62  ;;  %5833 = vst.msk [vmem:[#allocation4 + $0x64] sm:$0xf] %vm5807_vm2, %v6735_v51  ;;  %v5430_v14 = vpop.permute.xlu0 %5429  ;;  %v5657_v7 = vsel %vm5629_vm3, %v5624_v34, %v5302_v25 }
 0x306   : > { %v5690_v32 = vsel %vm5662_vm5, %v5657_v7, %v5430_v14 }
 0x307   : > { %v6736_v13 = vcombine.low %v5690_v32, %v5690_v32  ;;  %v6737_v16 = vcombine.high %v5690_v32, %v5690_v32 }
 0x308   : > { %v4280_v1 = vpop.permute.xlu1 %4279 }
 0x309   : > { %5834 = vst.msk [vmem:[#allocation4 + $0x68] sm:$0xf] %vm5807_vm2, %v6736_v13  ;;  %5835 = vst.msk [vmem:[#allocation4 + $0x6c] sm:$0xf] %vm5807_vm2, %v6737_v16  ;;  %v4408_v33 = vpop.permute.xlu0 %4407  ;;  %v5464_v54 = vsel %vm2597_vm12, %v9927_v40, %v4280_v1 }
 0x30a   : > { %v5496_v21 = vsel %vm10350_vm8, %v5464_v54, %v4408_v33 }
 0x30c   : > { %v7297_v28 = vld [vmem:[#allocation4 + $0x60] sm:$0xff]   ;;  %v4282_v49 = vpop.permute.xlu1 %4281 }
 0x30d   : > { %v4520_v50 = vpop.permute.xlu0 %4519  ;;  %6959 = vmatprep.mubr.msk.bf16.mxu1 %vm5988_vm11, %v7297_v28  ;;  %v5466_v40 = vsel %vm2597_vm12, %v9939_v48, %v4282_v49 }
 0x30e   : > { %v5528_v38 = vsel %vm10344_vm1, %v5496_v21, %v4520_v50 }
 0x310   : > { %v4410_v10 = vpop.permute.xlu1 %4409  ;;  %v7298_v36 = vld [vmem:[#allocation4 + $0x68] sm:$0xff]  }
 0x311   : > { %v4792_v5 = vpop.permute.xlu0 %4791  ;;  %6960 = vmatmul.mubr.msk.bf16.gmra.mxu1 %vm5988_vm11, %v7298_v36  ;;  %v5498_v44 = vsel %vm10351_vm9, %v5466_v40, %v4410_v10 }
 0x312   : > { %v5560_v31 = vsel %vm2795_vm10, %v5528_v38, %v4792_v5 }
 0x314   : > { %v4522_v2 = vpop.permute.xlu1 %4521 }
 0x315   : > { %v4920_v3 = vpop.permute.xlu0 %4919  ;;  %v5530_v12 = vsel %vm10352_vm4, %v5498_v44, %v4522_v2 }
 0x316   : > { %v5593_v30 = vsel %vm5563_vm13, %v5560_v31, %v4920_v3 }
 0x318   : > { %v4794_v11 = vpop.permute.xlu1 %4793 }
 0x319   : > { %v5032_v27 = vpop.permute.xlu0 %5031  ;;  %v5562_v61 = vsel %vm2795_vm10, %v5530_v12, %v4794_v11 }
 0x31a   : > { %v5626_v20 = vsel %vm5596_vm15, %v5593_v30, %v5032_v27 }
 0x31c   : > { %v4922_v56 = vpop.permute.xlu1 %4921 }
 0x31d   : > { %v5304_v58 = vpop.permute.xlu0 %5303  ;;  %v5595_v59 = vsel %vm5563_vm13, %v5562_v61, %v4922_v56 }
 0x31e   : > { %v5659_v43 = vsel %vm5629_vm3, %v5626_v20, %v5304_v58 }
 0x320   : > { %v5034_v4 = vpop.permute.xlu1 %5033 }
 0x321   : > { %v5432_v53 = vpop.permute.xlu0 %5431  ;;  %v5628_v57 = vsel %vm5596_vm15, %v5595_v59, %v5034_v4 }
 0x322   : > { %v5692_v18 = vsel %vm5662_vm5, %v5659_v43, %v5432_v53 }
 0x323   : > { %v6738_v39 = vcombine.low %v5692_v18, %v5692_v18  ;;  %v6739_v60 = vcombine.high %v5692_v18, %v5692_v18 }
 0x324   : > { %v5306_v15 = vpop.permute.xlu1 %5305 }
 0x325   : > { %5836 = vst.msk [vmem:[#allocation4 + $0x70] sm:$0xf] %vm5807_vm2, %v6738_v39  ;;  %5837 = vst.msk [vmem:[#allocation4 + $0x74] sm:$0xf] %vm5807_vm2, %v6739_v60  ;;  %v5661_v48 = vsel %vm5629_vm3, %v5628_v57, %v5306_v15 }
 0x328   : > { %v5434_v46 = vpop.permute.xlu1 %5433  ;;  %v6937_v63 = vpop.f32.mrf.mxu1 }
 0x329   : > { %v5694_v9 = vsel %vm5662_vm5, %v5661_v48, %v5434_v46  ;;  %6205 = vst.msk [vmem:[%s10188_s28 + $0x10] sm:$0xff] %vm2597_vm12, %v6937_v63 }
 0x32a   : > { %v6740_v55 = vcombine.low %v5694_v9, %v5694_v9  ;;  %v6741_v47 = vcombine.high %v5694_v9, %v5694_v9  ;;  %v6075_v26 = vpop.f32.mrf.mxu1 }
 0x32b   : > { %6203 = vst.msk [vmem:[%s10188_s28] sm:$0xff] %vm2597_vm12, %v6075_v26 }
 0x32c   : > { %5838 = vst.msk [vmem:[#allocation4 + $0x78] sm:$0xf] %vm5807_vm2, %v6740_v55  ;;  %5839 = vst.msk [vmem:[#allocation4 + $0x7c] sm:$0xf] %vm5807_vm2, %v6741_v47  ;;  %v7299_v24 = vld [vmem:[#allocation4 + $0x70] sm:$0xff]   ;;  %v6938_v23 = vpop.f32.mrf.mxu1 }
 0x32d   : > { %6963 = vmatprep.mubr.msk.bf16.mxu1 %vm5988_vm11, %v7299_v24  ;;  %6206 = vst.msk [vmem:[%s10188_s28 + $0x18] sm:$0xff] %vm2597_vm12, %v6938_v23 }
 0x32e   : > { %v6078_v41 = vpop.f32.mrf.mxu1 }
 0x32f   : > { %6204 = vst.msk [vmem:[%s10188_s28 + $0x8] sm:$0xff] %vm2597_vm12, %v6078_v41 }
 0x333   : > { %v7300_v35 = vld [vmem:[#allocation4 + $0x78] sm:$0xff]  }
 0x334   : > { %6964 = vmatmul.mubr.msk.bf16.gmra.mxu1 %vm5988_vm11, %v7300_v35 }
 0x349   : > { %v6941_v8 = vpop.f32.mrf.mxu1 }
 0x34a   : > { %6209 = vst.msk [vmem:[%s10188_s28 + $0x30] sm:$0xff] %vm2597_vm12, %v6941_v8 }
 0x34b   : > { %v6091_v0 = vpop.f32.mrf.mxu1 }
 0x34c   : > { %6207 = vst.msk [vmem:[%s10188_s28 + $0x20] sm:$0xff] %vm2597_vm12, %v6091_v0 }
 0x34d   : > { %v6942_v52 = vpop.f32.mrf.mxu1 }
 0x34e   : > { %6210 = vst.msk [vmem:[%s10188_s28 + $0x38] sm:$0xff] %vm2597_vm12, %v6942_v52 }
 0x34f   : > { %v6094_v6 = vpop.f32.mrf.mxu1 }
 0x350   : > { %6208 = vst.msk [vmem:[%s10188_s28 + $0x28] sm:$0xff] %vm2597_vm12, %v6094_v6 }
 0x368   : > { %v6945_v37 = vpop.f32.mrf.mxu1 }
 0x369   : > { %6213 = vst.msk [vmem:[%s10188_s28 + $0x50] sm:$0xff] %vm2597_vm12, %v6945_v37 }
 0x36a   : > { %v6107_v17 = vpop.f32.mrf.mxu1 }
 0x36b   : > { %6211 = vst.msk [vmem:[%s10188_s28 + $0x40] sm:$0xff] %vm2597_vm12, %v6107_v17 }
 0x36c   : > { %v6946_v22 = vpop.f32.mrf.mxu1 }
 0x36d   : > { %6214 = vst.msk [vmem:[%s10188_s28 + $0x58] sm:$0xff] %vm2597_vm12, %v6946_v22 }
 0x36e   : > { %v6110_v45 = vpop.f32.mrf.mxu1 }
 0x36f   : > { %6212 = vst.msk [vmem:[%s10188_s28 + $0x48] sm:$0xff] %vm2597_vm12, %v6110_v45 }
 0x384   : > { %v6949_v19 = vpop.f32.mrf.mxu1 }
 0x385   : > { %6217 = vst.msk [vmem:[%s10188_s28 + $0x70] sm:$0xff] %vm2597_vm12, %v6949_v19 }
 0x386   : > { %v6123_v42 = vpop.f32.mrf.mxu1 }
 0x387   : > { %6215 = vst.msk [vmem:[%s10188_s28 + $0x60] sm:$0xff] %vm2597_vm12, %v6123_v42 }
 0x388   : > { %v6950_v29 = vpop.f32.mrf.mxu1 }
 0x389   : > { %6218 = vst.msk [vmem:[%s10188_s28 + $0x78] sm:$0xff] %vm2597_vm12, %v6950_v29 }
 0x38a   : > { %v6126_v62 = vpop.f32.mrf.mxu1 }
 0x38b   : > { %6216 = vst.msk [vmem:[%s10188_s28 + $0x68] sm:$0xff] %vm2597_vm12, %v6126_v62 }
 0x398   : > { %v6953_v51 = vpop.f32.mrf.mxu1 }
 0x399   : > { %6221 = vst.msk [vmem:[%s10188_s28 + $0x90] sm:$0xff] %vm2597_vm12, %v6953_v51 }
 0x39a   : > { %v6139_v34 = vpop.f32.mrf.mxu1 }
 0x39b   : > { %6219 = vst.msk [vmem:[%s10188_s28 + $0x80] sm:$0xff] %vm2597_vm12, %v6139_v34 }
 0x39c   : > { %v6954_v25 = vpop.f32.mrf.mxu1 }
 0x39d   : > { %6222 = vst.msk [vmem:[%s10188_s28 + $0x98] sm:$0xff] %vm2597_vm12, %v6954_v25 }
 0x39e   : > { %v6142_v14 = vpop.f32.mrf.mxu1 }
 0x39f   : > { %6220 = vst.msk [vmem:[%s10188_s28 + $0x88] sm:$0xff] %vm2597_vm12, %v6142_v14 }
 0x3b1   : > { %v6957_v7 = vpop.f32.mrf.mxu1 }
 0x3b2   : > { %6225 = vst.msk [vmem:[%s10188_s28 + $0xb0] sm:$0xff] %vm2597_vm12, %v6957_v7 }
 0x3b3   : > { %v6155_v32 = vpop.f32.mrf.mxu1 }
 0x3b4   : > { %6223 = vst.msk [vmem:[%s10188_s28 + $0xa0] sm:$0xff] %vm2597_vm12, %v6155_v32 }
 0x3b5   : > { %v6958_v13 = vpop.f32.mrf.mxu1 }
 0x3b6   : > { %6226 = vst.msk [vmem:[%s10188_s28 + $0xb8] sm:$0xff] %vm2597_vm12, %v6958_v13 }
 0x3b7   : > { %v6158_v16 = vpop.f32.mrf.mxu1 }
 0x3b8   : > { %6224 = vst.msk [vmem:[%s10188_s28 + $0xa8] sm:$0xff] %vm2597_vm12, %v6158_v16 }
 0x3d1   : > { %v6961_v1 = vpop.f32.mrf.mxu1 }
 0x3d2   : > { %6229 = vst.msk [vmem:[%s10188_s28 + $0xd0] sm:$0xff] %vm2597_vm12, %v6961_v1 }
 0x3d3   : > { %v6171_v33 = vpop.f32.mrf.mxu1 }
 0x3d4   : > { %6227 = vst.msk [vmem:[%s10188_s28 + $0xc0] sm:$0xff] %vm2597_vm12, %v6171_v33 }
 0x3d5   : > { %v6962_v28 = vpop.f32.mrf.mxu1 }
 0x3d6   : > { %6230 = vst.msk [vmem:[%s10188_s28 + $0xd8] sm:$0xff] %vm2597_vm12, %v6962_v28 }
 0x3d7   : > { %v6174_v49 = vpop.f32.mrf.mxu1 }
 0x3d8   : > { %6228 = vst.msk [vmem:[%s10188_s28 + $0xc8] sm:$0xff] %vm2597_vm12, %v6174_v49 }
 0x3f4   : > { %v6965_v50 = vpop.f32.mrf.mxu1 }
 0x3f5   : > { %6233 = vst.msk [vmem:[%s10188_s28 + $0xf0] sm:$0xff] %vm2597_vm12, %v6965_v50 }
 0x3f6   : > { %v6187_v10 = vpop.f32.mrf.mxu1 }
 0x3f7   : > { %6231 = vst.msk [vmem:[%s10188_s28 + $0xe0] sm:$0xff] %vm2597_vm12, %v6187_v10 }
 0x3f8   : > { %v6966_v36 = vpop.f32.mrf.mxu1 }
 0x3f9   : > { %6234 = vst.msk [vmem:[%s10188_s28 + $0xf8] sm:$0xff] %vm2597_vm12, %v6966_v36 }
 0x3fa   : > { %v6190_v5 = vpop.f32.mrf.mxu1 }
 0x3fb   : > { %6232 = vst.msk [vmem:[%s10188_s28 + $0xe8] sm:$0xff] %vm2597_vm12, %v6190_v5 }
 0x3fc PF: > { %s14_s17 = sadd.s32 1, %s7325_s17   ;;  %s10353_s15 = smov %s7321_s16 }
 0x3fd   : > { %p11_p5 = scmp.ge.s32.totalorder %s14_s17, 4   ;;  %s10354_s16 = smov %s10356_s18 }
 0x3ff   :  { %13 = sbr.rel (!%p11_p5) target bundleno = 2 (0x2), region = 77 }

</bundles_post_ra>
